<compile_context>
chip_gen: v7x
topology: tpu7x:2x2x1
jax: 0.10.0
libtpu: 0.0.40
codegen_flags: <defaults>
</compile_context>

<pallas_src>
import functools
import math

import jax
import jax.numpy as jnp
from jax import lax
from jax.experimental import pallas as pl
from jax.experimental.pallas import tpu as pltpu

F32 = jnp.float32
BF16 = jnp.bfloat16


def _elu(x):
    # ELU(alpha=1):  x if x > 0 else exp(x) - 1
    return jnp.where(x > 0, x, jnp.exp(jnp.minimum(x, 0.0)) - 1.0)


def _layer_norm(x, w, b, eps=1e-12):
    u = jnp.mean(x, axis=-1, keepdims=True)
    s = jnp.mean((x - u) ** 2, axis=-1, keepdims=True)
    return w * ((x - u) / jnp.sqrt(s + eps)) + b


def _mm(a, w):
    """(S,K)@(K,N) on the MXU: operands cast to the (bf16) weight dtype, f32 acc."""
    return jnp.dot(a.astype(w.dtype), w, preferred_element_type=F32)


def _mm_t(a, b):
    """A @ B^T by contracting the last dim of both operands (no explicit .T)."""
    return lax.dot_general(a, b, (((1,), (1,)), ((), ())),
                           preferred_element_type=F32)


def _dist_layer_kernel(num_heads, head_dim, distance_metric,
                       mean_ref, cov_ref, mask_ref,
                       qkv_w_ref, qkv_b_ref, dense_w_ref, dense_b_ref,
                       aln_w_ref, aln_b_ref,
                       f1w_ref, f1b_ref, f2w_ref, f2b_ref,
                       fln_w_ref, fln_b_ref,
                       mean_out_ref, cov_out_ref, probs_out_ref):
    """One DistLayer forward for one batch element (grid axis = batch)."""
    H = mean_ref.shape[2]

    x_mean = mean_ref[0]            # (S, H) f32
    x_cov = cov_ref[0]              # (S, H) f32
    mask = mask_ref[0]              # (1, S) additive mask (broadcast over queries)

    qkv_b = qkv_b_ref[...]          # (2, 3H) f32

    # Fused Q/K/V projections: one (S,H)@(H,3H) bf16 matmul per stream.
    mean_qkv = _mm(x_mean, qkv_w_ref[0]) + qkv_b[0:1, :]
    cov_qkv = _elu(_mm(x_cov, qkv_w_ref[1]) + qkv_b[1:2, :]) + 1.0

    mean_q, mean_k, mean_v = (mean_qkv[:, :H], mean_qkv[:, H:2 * H],
                              mean_qkv[:, 2 * H:])
    cov_q, cov_k, cov_v = cov_qkv[:, :H], cov_qkv[:, H:2 * H], cov_qkv[:, 2 * H:]

    scale = 1.0 / math.sqrt(head_dim)

    # Head-invariant elementwise work hoisted out of the unrolled head loop
    # (EUP sqrt/log/recip done once over the full hidden width).
    if distance_metric == "wasserstein":
        sqrt_cov_qk = jnp.sqrt(jnp.maximum(cov_qkv[:, :2 * H], 1e-24))  # (S, 2H)
    else:
        inv_cov_k = 1.0 / cov_k
        log_cov_q = jnp.log(cov_q)
        log_cov_k = jnp.log(cov_k)

    mean_ctx_heads = []
    cov_ctx_heads = []

    # NOTE: the unrolled Python loop is fine for small num_heads; for NH >= 8
    # move this onto a grid axis (see module-level TODO) to bound live ranges.
    for h in range(num_heads):
        sl = slice(h * head_dim, (h + 1) * head_dim)
        mq, mk, mv = mean_q[:, sl], mean_k[:, sl], mean_v[:, sl]
        cq, ck, cv = cov_q[:, sl], cov_k[:, sl], cov_v[:, sl]

        if distance_metric == "wasserstein":
            # scores = -scale * wasserstein(q, k) + mask, with the mean and cov
            # cross-terms fused into ONE A@B^T matmul (K = 2*head_dim), the
            # (2*scale) factor folded into the bf16 lhs operand, and the
            # per-key bias folded into the mask row.
            sq = sqrt_cov_qk[:, sl]
            sk = sqrt_cov_qk[:, H + h * head_dim:H + (h + 1) * head_dim]
            lhs = (jnp.concatenate([mq, sq], axis=-1) * (2.0 * scale)).astype(BF16)
            rhs = jnp.concatenate([mk, sk], axis=-1).astype(BF16)
            cross = _mm_t(lhs, rhs)                                     # (S, S)
            bias_q = scale * (jnp.sum(mq * mq, -1, keepdims=True)
                              + jnp.sum(cq, -1, keepdims=True))         # (S, 1)
            bias_k = scale * (jnp.sum(mk * mk, -1, keepdims=True)
                              + jnp.sum(ck, -1, keepdims=True))         # (S, 1)
            row_bias = mask - bias_k.T                                  # (1, S)
            scores = cross - bias_q + row_bias
        else:  # 'kl' — faithful to kl_distance_matmul, log-det via sum-of-logs.
            ick = inv_cov_k[:, sl]
            log_det = (jnp.sum(log_cov_k[:, sl], -1, keepdims=True).T
                       - jnp.sum(log_cov_q[:, sl], -1, keepdims=True))  # (S, S)
            # f32 dots here: the reciprocal operands are precision-sensitive.
            trace_sum = _mm_t(ick, cq)                  # matmul(1/cov2, cov1^T)
            mean_cov_part = _mm_t((mq - mk) ** 2, ick)
            dist = (log_det + mean_cov_part + trace_sum - head_dim) * 0.5
            scores = -dist * scale + mask

        # Numerically-stable softmax with EUP reciprocal (free slot).
        scores = scores - jnp.max(scores, axis=-1, keepdims=True)
        e = jnp.exp(scores)
        probs = e * pl.reciprocal(jnp.sum(e, axis=-1, keepdims=True), approx=True)
        probs_out_ref[0, h] = probs.astype(probs_out_ref.dtype)

        mean_ctx_heads.append(
            jnp.dot(probs.astype(BF16), mv.astype(BF16),
                    preferred_element_type=F32))
        cov_ctx_heads.append(
            jnp.dot((probs * probs).astype(BF16), cv.astype(BF16),
                    preferred_element_type=F32))

    # One full-K (S,H)@(H,H) output dense per stream (no per-head folds).
    mean_ctx = jnp.concatenate(mean_ctx_heads, axis=-1)   # (S, H) f32
    cov_ctx = jnp.concatenate(cov_ctx_heads, axis=-1)

    dense_b = dense_b_ref[...]       # (2, H)
    mean_hidden = _mm(mean_ctx, dense_w_ref[0]) + dense_b[0:1, :]
    cov_hidden = _mm(cov_ctx, dense_w_ref[1]) + dense_b[1:2, :]

    aln_w = aln_w_ref[...]           # (1, H)   (shared LN for both streams,
    aln_b = aln_b_ref[...]           #           as in the reference attention)
    mean_att = _layer_norm(mean_hidden + x_mean, aln_w, aln_b)
    cov_att = _layer_norm(cov_hidden + x_cov, aln_w, aln_b)

    f1b = f1b_ref[...]               # (2, 4H)
    f2b = f2b_ref[...]               # (2, H)
    fln_w = fln_w_ref[...]           # (2, H)
    fln_b = fln_b_ref[...]           # (2, H)

    def intermediate(x, i):
        h1 = _elu(_mm(x, f1w_ref[i]) + f1b[i:i + 1, :])
        h2 = _mm(h1, f2w_ref[i]) + f2b[i:i + 1, :]
        return _layer_norm(h2 + x, fln_w[i:i + 1, :], fln_b[i:i + 1, :])

    mean_out_ref[0] = intermediate(mean_att, 0).astype(mean_out_ref.dtype)
    cov_out_ref[0] = (_elu(intermediate(cov_att, 1)) + 1.0).astype(cov_out_ref.dtype)


_BUFFERED_WEIGHTS_OK = True   # flipped off if this jax build rejects pipeline_mode


@functools.lru_cache(maxsize=None)
def _make_dist_layer_call(B, S, H, num_heads, head_dim, distance_metric,
                          probs_dtype_name, weight_specs, single_buffer_weights,
                          vmem_limit):
    """Builds (and jits) the pallas_call once per shape/config combination, so
    every encoder layer with the same shapes reuses one compiled executable."""
    probs_dtype = jnp.dtype(probs_dtype_name)
    kernel = functools.partial(_dist_layer_kernel, num_heads, head_dim,
                               distance_metric)

    def weight_spec(shape):
        idx = lambda b, _shape=shape: (0,) * len(_shape)
        if single_buffer_weights:
            # Constant across the batch grid -> one buffer is enough.
            return pl.BlockSpec(shape, idx, pipeline_mode=pl.Buffered(1))
        return pl.BlockSpec(shape, idx)

    grid_spec = pltpu.PrefetchScalarGridSpec(
        num_scalar_prefetch=0,
        grid=(B,),
        in_specs=[
            pl.BlockSpec((1, S, H), lambda b: (b, 0, 0)),
            pl.BlockSpec((1, S, H), lambda b: (b, 0, 0)),
            pl.BlockSpec((1, 1, S), lambda b: (b, 0, 0)),
        ] + [weight_spec(shape) for shape, _ in weight_specs],
        out_specs=[
            pl.BlockSpec((1, S, H), lambda b: (b, 0, 0)),
            pl.BlockSpec((1, S, H), lambda b: (b, 0, 0)),
            pl.BlockSpec((1, num_heads, S, S), lambda b: (b, 0, 0, 0)),
        ],
    )
    out_shapes = (
        jax.ShapeDtypeStruct((B, S, H), F32),
        jax.ShapeDtypeStruct((B, S, H), F32),
        jax.ShapeDtypeStruct((B, num_heads, S, S), probs_dtype),
    )
    call = pl.pallas_call(
        kernel,
        out_shape=out_shapes,
        grid_spec=grid_spec,
        compiler_params=pltpu.CompilerParams(
            dimension_semantics=("parallel",),
            vmem_limit_bytes=vmem_limit),
    )
    return jax.jit(call)


def dist_layer(mean, cov, mask, params, *, num_heads,
               distance_metric="wasserstein", probs_dtype=F32):
    """One DistLayer forward.  `mask` is the additive mask of shape (B, 1, S_k)."""
    global _BUFFERED_WEIGHTS_OK

    B, S, H = mean.shape
    head_dim = H // num_heads
    assert mask.shape == (B, 1, S), "pass the additive attention mask as (B, 1, S_k)"

    # Weight / bias operands in kernel-argument order.
    weight_args = (params["qkv_w"], params["qkv_b"],
                   params["dense_w"], params["dense_b"],
                   params["attn_ln_w"], params["attn_ln_b"],
                   params["ffn1_w"], params["ffn1_b"],
                   params["ffn2_w"], params["ffn2_b"],
                   params["ffn_ln_w"], params["ffn_ln_b"])
    weight_specs = tuple((tuple(int(d) for d in w.shape), jnp.dtype(w.dtype).name)
                         for w in weight_args)

    # Explicit VMEM budget from the actual resident tiles (activation blocks
    # double-buffered, weights ideally single-buffered) + Mosaic headroom.
    probs_bytes = num_heads * S * S * jnp.dtype(probs_dtype).itemsize
    step_bytes = (4 * S * H * 4                # mean/cov in + mean/cov out (f32)
                  + S * 4                      # mask block
                  + probs_bytes
                  + sum(int(w.size) * w.dtype.itemsize for w in weight_args))
    vmem_limit = int(min(max(2 * step_bytes + (16 << 20), 32 << 20), 64 << 20))

    args = (mean, cov, mask) + weight_args
    common = (B, S, H, num_heads, head_dim, distance_metric,
              jnp.dtype(probs_dtype).name, weight_specs)

    if _BUFFERED_WEIGHTS_OK:
        try:
            call = _make_dist_layer_call(*common, True, vmem_limit)
            return call(*args)
        except Exception:
            # This jax build does not support BlockSpec pipeline_mode; fall back
            # to default (double-buffered) weight blocks.
            _BUFFERED_WEIGHTS_OK = False
    call = _make_dist_layer_call(*common, False, vmem_limit)
    return call(*args)


def dist_sa_encoder(mean, cov, mask, layer_params, *, num_heads,
                    distance_metric="wasserstein",
                    output_all_encoded_layers=True):
    """Mirrors DistSAEncoder.forward, including the reference's
    `maen_hidden_states` typo (the mean stream is not propagated)."""
    all_encoder_layers = []
    att = None
    for p in layer_params:
        _new_mean, cov, att = dist_layer(mean, cov, mask, p,
                                         num_heads=num_heads,
                                         distance_metric=distance_metric)
        if output_all_encoded_layers:
            all_encoder_layers.append([mean, cov, att])
    if not output_all_encoded_layers:
        all_encoder_layers.append([mean, cov, att])
    return all_encoder_layers


def init_layer_params(key, H):
    k0, k1, k2, k3 = jax.random.split(key, 4)

    def w(k, shape):
        # Weights stored as (in, out), bf16 in HBM (halves weight traffic/VMEM).
        return (jax.random.normal(k, shape, F32) * 0.02).astype(BF16)

    return {
        # index 0 = mean stream [Wq | Wk | Wv], index 1 = cov stream.
        "qkv_w": w(k0, (2, H, 3 * H)),
        "qkv_b": jnp.zeros((2, 3 * H), F32),
        # index 0 = mean_dense, index 1 = cov_dense.
        "dense_w": w(k1, (2, H, H)),
        "dense_b": jnp.zeros((2, H), F32),
        "attn_ln_w": jnp.ones((1, H), F32),
        "attn_ln_b": jnp.zeros((1, H), F32),
        # index 0 = mean_intermediate, index 1 = cov_intermediate.
        "ffn1_w": w(k2, (2, H, 4 * H)),
        "ffn1_b": jnp.zeros((2, 4 * H), F32),
        "ffn2_w": w(k3, (2, 4 * H, H)),
        "ffn2_b": jnp.zeros((2, H), F32),
        "ffn_ln_w": jnp.ones((2, H), F32),
        "ffn_ln_b": jnp.zeros((2, H), F32),
    }


if __name__ == "__main__":
    B, S, H, NH, L = 2, 8, 32, 2, 2   # batch, seq, hidden, heads, layers

    key = jax.random.PRNGKey(0)
    k_mean, k_cov, k_params = jax.random.split(key, 3)

    mean_hidden_states = jax.random.normal(k_mean, (B, S, H), F32)
    # cov stream is a positive "variance-like" tensor in the reference model.
    cov_hidden_states = jax.nn.elu(jax.random.normal(k_cov, (B, S, H), F32)) + 1.0

    # BERT-style additive mask: 0 for attend, -10000 for masked key positions.
    # Passed as (B, 1, S_k); broadcast over heads/queries inside the kernel.
    valid_len = jnp.array([S, S - 2])
    pad = (jnp.arange(S)[None, :] < valid_len[:, None]).astype(F32)     # (B, S)
    attention_mask = (1.0 - pad)[:, None, :] * -10000.0                 # (B, 1, S)

    layer_keys = jax.random.split(k_params, L)
    layer_params = [init_layer_params(k, H) for k in layer_keys]

    outs = dist_sa_encoder(mean_hidden_states, cov_hidden_states, attention_mask,
                           layer_params, num_heads=NH,
                           distance_metric="wasserstein",
                           output_all_encoded_layers=True)

    for layer_out in outs:
        for t in layer_out:
            jax.block_until_ready(t)

    print("KERNEL_OK")
</pallas_src>

<mosaic_0001>
module attributes {stable_mosaic.version = 11 : i64} {
  func.func @_dist_layer_kernel(%arg0: i32, %arg1: memref<1x8x32xf32, #tpu.memory_space<vmem>>, %arg2: memref<1x8x32xf32, #tpu.memory_space<vmem>>, %arg3: memref<1x1x8xf32, #tpu.memory_space<vmem>>, %arg4: memref<2x32x96xbf16, #tpu.memory_space<vmem>>, %arg5: memref<2x96xf32, #tpu.memory_space<vmem>>, %arg6: memref<2x32x32xbf16, #tpu.memory_space<vmem>>, %arg7: memref<2x32xf32, #tpu.memory_space<vmem>>, %arg8: memref<1x32xf32, #tpu.memory_space<vmem>>, %arg9: memref<1x32xf32, #tpu.memory_space<vmem>>, %arg10: memref<2x32x128xbf16, #tpu.memory_space<vmem>>, %arg11: memref<2x128xf32, #tpu.memory_space<vmem>>, %arg12: memref<2x128x32xbf16, #tpu.memory_space<vmem>>, %arg13: memref<2x32xf32, #tpu.memory_space<vmem>>, %arg14: memref<2x32xf32, #tpu.memory_space<vmem>>, %arg15: memref<2x32xf32, #tpu.memory_space<vmem>>, %arg16: memref<1x8x32xf32, #tpu.memory_space<vmem>>, %arg17: memref<1x8x32xf32, #tpu.memory_space<vmem>>, %arg18: memref<1x2x8x8xf32, #tpu.memory_space<vmem>>) attributes {dimension_semantics = [#tpu.dimension_semantics<parallel>], iteration_bounds = array<i64: 2>, scalar_prefetch = 0 : i64, scratch_operands = 0 : i64, tpu.core_type = #tpu.core_type<tc>, window_params = [{transform_indices = @transform_0, window_bounds = array<i64: 1, 8, 32>}, {transform_indices = @transform_1, window_bounds = array<i64: 1, 8, 32>}, {transform_indices = @transform_2, window_bounds = array<i64: 1, 1, 8>}, {pipeline_mode = #tpu.pipeline_mode<synchronous>, transform_indices = @transform_3, window_bounds = array<i64: 2, 32, 96>}, {pipeline_mode = #tpu.pipeline_mode<synchronous>, transform_indices = @transform_4, window_bounds = array<i64: 2, 96>}, {pipeline_mode = #tpu.pipeline_mode<synchronous>, transform_indices = @transform_5, window_bounds = array<i64: 2, 32, 32>}, {pipeline_mode = #tpu.pipeline_mode<synchronous>, transform_indices = @transform_6, window_bounds = array<i64: 2, 32>}, {pipeline_mode = #tpu.pipeline_mode<synchronous>, transform_indices = @transform_7, window_bounds = array<i64: 1, 32>}, {pipeline_mode = #tpu.pipeline_mode<synchronous>, transform_indices = @transform_8, window_bounds = array<i64: 1, 32>}, {pipeline_mode = #tpu.pipeline_mode<synchronous>, transform_indices = @transform_9, window_bounds = array<i64: 2, 32, 128>}, {pipeline_mode = #tpu.pipeline_mode<synchronous>, transform_indices = @transform_10, window_bounds = array<i64: 2, 128>}, {pipeline_mode = #tpu.pipeline_mode<synchronous>, transform_indices = @transform_11, window_bounds = array<i64: 2, 128, 32>}, {pipeline_mode = #tpu.pipeline_mode<synchronous>, transform_indices = @transform_12, window_bounds = array<i64: 2, 32>}, {pipeline_mode = #tpu.pipeline_mode<synchronous>, transform_indices = @transform_13, window_bounds = array<i64: 2, 32>}, {pipeline_mode = #tpu.pipeline_mode<synchronous>, transform_indices = @transform_14, window_bounds = array<i64: 2, 32>}, {transform_indices = @transform_15, window_bounds = array<i64: 1, 8, 32>}, {transform_indices = @transform_16, window_bounds = array<i64: 1, 8, 32>}, {transform_indices = @transform_17, window_bounds = array<i64: 1, 2, 8, 8>}]} {
    %c0 = arith.constant 0 : index
    %c0_0 = arith.constant 0 : index
    %c0_1 = arith.constant 0 : index
    %0 = vector.load %arg1[%c0, %c0_0, %c0_1] : memref<1x8x32xf32, #tpu.memory_space<vmem>>, vector<1x8x32xf32>
    %1 = vector.shape_cast %0 : vector<1x8x32xf32> to vector<8x32xf32>
    %c0_2 = arith.constant 0 : index
    %c0_3 = arith.constant 0 : index
    %c0_4 = arith.constant 0 : index
    %2 = vector.load %arg2[%c0_2, %c0_3, %c0_4] : memref<1x8x32xf32, #tpu.memory_space<vmem>>, vector<1x8x32xf32>
    %3 = vector.shape_cast %2 : vector<1x8x32xf32> to vector<8x32xf32>
    %c0_5 = arith.constant 0 : index
    %c0_6 = arith.constant 0 : index
    %c0_7 = arith.constant 0 : index
    %4 = vector.load %arg3[%c0_5, %c0_6, %c0_7] : memref<1x1x8xf32, #tpu.memory_space<vmem>>, vector<1x1x8xf32>
    %5 = vector.shape_cast %4 : vector<1x1x8xf32> to vector<1x8xf32>
    %c0_8 = arith.constant 0 : index
    %c0_9 = arith.constant 0 : index
    %6 = vector.load %arg5[%c0_8, %c0_9] : memref<2x96xf32, #tpu.memory_space<vmem>>, vector<2x96xf32>
    %c0_10 = arith.constant 0 : index
    %c0_11 = arith.constant 0 : index
    %c0_12 = arith.constant 0 : index
    %7 = vector.load %arg4[%c0_10, %c0_11, %c0_12] : memref<2x32x96xbf16, #tpu.memory_space<vmem>>, vector<1x32x96xbf16>
    %8 = vector.shape_cast %7 : vector<1x32x96xbf16> to vector<32x96xbf16>
    %9 = arith.truncf %1 : vector<8x32xf32> to vector<8x32xbf16>
    %cst = arith.constant dense<0.000000e+00> : vector<8x96xf32>
    %10 = tpu.matmul %9, %8, %cst {dimension_numbers = #tpu.dot_dimension_numbers<[1], [0], [0], [1], [0, 0, 1, 1], [], []>} : vector<8x32xbf16>, vector<32x96xbf16>, vector<8x96xf32> -> vector<8x96xf32>
    %11 = vector.extract_strided_slice %6 {offsets = [0, 0], sizes = [1, 96], strides = [1, 1]} : vector<2x96xf32> to vector<1x96xf32>
    %12 = vector.broadcast %11 : vector<1x96xf32> to vector<8x96xf32>
    %13 = arith.addf %10, %12 : vector<8x96xf32>
    %c1 = arith.constant 1 : index
    %c0_13 = arith.constant 0 : index
    %c0_14 = arith.constant 0 : index
    %14 = vector.load %arg4[%c1, %c0_13, %c0_14] : memref<2x32x96xbf16, #tpu.memory_space<vmem>>, vector<1x32x96xbf16>
    %15 = vector.shape_cast %14 : vector<1x32x96xbf16> to vector<32x96xbf16>
    %16 = arith.truncf %3 : vector<8x32xf32> to vector<8x32xbf16>
    %cst_15 = arith.constant dense<0.000000e+00> : vector<8x96xf32>
    %17 = tpu.matmul %16, %15, %cst_15 {dimension_numbers = #tpu.dot_dimension_numbers<[1], [0], [0], [1], [0, 0, 1, 1], [], []>} : vector<8x32xbf16>, vector<32x96xbf16>, vector<8x96xf32> -> vector<8x96xf32>
    %18 = vector.extract_strided_slice %6 {offsets = [1, 0], sizes = [1, 96], strides = [1, 1]} : vector<2x96xf32> to vector<1x96xf32>
    %19 = vector.broadcast %18 : vector<1x96xf32> to vector<8x96xf32>
    %20 = arith.addf %17, %19 : vector<8x96xf32>
    %cst_16 = arith.constant 0.000000e+00 : f32
    %21 = vector.broadcast %cst_16 : f32 to vector<8x96xf32>
    %22 = arith.cmpf ogt, %20, %21 : vector<8x96xf32>
    %cst_17 = arith.constant 0.000000e+00 : f32
    %23 = vector.broadcast %cst_17 : f32 to vector<8x96xf32>
    %24 = arith.minimumf %20, %23 : vector<8x96xf32>
    %25 = math.exp %24 : vector<8x96xf32>
    %cst_18 = arith.constant 1.000000e+00 : f32
    %26 = vector.broadcast %cst_18 : f32 to vector<8x96xf32>
    %27 = arith.subf %25, %26 : vector<8x96xf32>
    %28 = arith.select %22, %20, %27 : vector<8x96xi1>, vector<8x96xf32>
    %cst_19 = arith.constant 1.000000e+00 : f32
    %29 = vector.broadcast %cst_19 : f32 to vector<8x96xf32>
    %30 = arith.addf %28, %29 : vector<8x96xf32>
    %31 = vector.extract_strided_slice %13 {offsets = [0, 0], sizes = [8, 32], strides = [1, 1]} : vector<8x96xf32> to vector<8x32xf32>
    %32 = vector.extract_strided_slice %13 {offsets = [0, 32], sizes = [8, 32], strides = [1, 1]} : vector<8x96xf32> to vector<8x32xf32>
    %33 = vector.extract_strided_slice %13 {offsets = [0, 64], sizes = [8, 32], strides = [1, 1]} : vector<8x96xf32> to vector<8x32xf32>
    %34 = vector.extract_strided_slice %30 {offsets = [0, 0], sizes = [8, 32], strides = [1, 1]} : vector<8x96xf32> to vector<8x32xf32>
    %35 = vector.extract_strided_slice %30 {offsets = [0, 32], sizes = [8, 32], strides = [1, 1]} : vector<8x96xf32> to vector<8x32xf32>
    %36 = vector.extract_strided_slice %30 {offsets = [0, 64], sizes = [8, 32], strides = [1, 1]} : vector<8x96xf32> to vector<8x32xf32>
    %37 = vector.extract_strided_slice %30 {offsets = [0, 0], sizes = [8, 64], strides = [1, 1]} : vector<8x96xf32> to vector<8x64xf32>
    %cst_20 = arith.constant 1.000000e-24 : f32
    %38 = vector.broadcast %cst_20 : f32 to vector<8x64xf32>
    %39 = arith.maximumf %37, %38 : vector<8x64xf32>
    %40 = math.sqrt %39 : vector<8x64xf32>
    %41 = vector.extract_strided_slice %31 {offsets = [0, 0], sizes = [8, 16], strides = [1, 1]} : vector<8x32xf32> to vector<8x16xf32>
    %42 = vector.extract_strided_slice %32 {offsets = [0, 0], sizes = [8, 16], strides = [1, 1]} : vector<8x32xf32> to vector<8x16xf32>
    %43 = vector.extract_strided_slice %33 {offsets = [0, 0], sizes = [8, 16], strides = [1, 1]} : vector<8x32xf32> to vector<8x16xf32>
    %44 = vector.extract_strided_slice %34 {offsets = [0, 0], sizes = [8, 16], strides = [1, 1]} : vector<8x32xf32> to vector<8x16xf32>
    %45 = vector.extract_strided_slice %35 {offsets = [0, 0], sizes = [8, 16], strides = [1, 1]} : vector<8x32xf32> to vector<8x16xf32>
    %46 = vector.extract_strided_slice %36 {offsets = [0, 0], sizes = [8, 16], strides = [1, 1]} : vector<8x32xf32> to vector<8x16xf32>
    %47 = vector.extract_strided_slice %40 {offsets = [0, 0], sizes = [8, 16], strides = [1, 1]} : vector<8x64xf32> to vector<8x16xf32>
    %48 = vector.extract_strided_slice %40 {offsets = [0, 32], sizes = [8, 16], strides = [1, 1]} : vector<8x64xf32> to vector<8x16xf32>
    %49 = tpu.concatenate %41, %47 in 1 : vector<8x16xf32>, vector<8x16xf32> -> vector<8x32xf32>
    %cst_21 = arith.constant 5.000000e-01 : f32
    %50 = vector.broadcast %cst_21 : f32 to vector<8x32xf32>
    %51 = arith.mulf %49, %50 : vector<8x32xf32>
    %52 = arith.truncf %51 : vector<8x32xf32> to vector<8x32xbf16>
    %53 = tpu.concatenate %42, %48 in 1 : vector<8x16xf32>, vector<8x16xf32> -> vector<8x32xf32>
    %54 = arith.truncf %53 : vector<8x32xf32> to vector<8x32xbf16>
    %cst_22 = arith.constant dense<0.000000e+00> : vector<8x8xf32>
    %55 = tpu.matmul %52, %54, %cst_22 {dimension_numbers = #tpu.dot_dimension_numbers<[1], [1], [0], [0], [0, 0, 1, 0], [], []>} : vector<8x32xbf16>, vector<8x32xbf16>, vector<8x8xf32> -> vector<8x8xf32>
    %56 = arith.mulf %41, %41 : vector<8x16xf32>
    %cst_23 = arith.constant dense<0.000000e+00> : vector<8xf32>
    %57 = vector.multi_reduction <add>, %56, %cst_23 [1] : vector<8x16xf32> to vector<8xf32>
    %58 = vector.shape_cast %57 : vector<8xf32> to vector<8x1xf32>
    %cst_24 = arith.constant dense<0.000000e+00> : vector<8xf32>
    %59 = vector.multi_reduction <add>, %44, %cst_24 [1] : vector<8x16xf32> to vector<8xf32>
    %60 = vector.shape_cast %59 : vector<8xf32> to vector<8x1xf32>
    %61 = arith.addf %58, %60 : vector<8x1xf32>
    %cst_25 = arith.constant 2.500000e-01 : f32
    %62 = vector.broadcast %cst_25 : f32 to vector<8x1xf32>
    %63 = arith.mulf %62, %61 : vector<8x1xf32>
    %64 = arith.mulf %42, %42 : vector<8x16xf32>
    %cst_26 = arith.constant dense<0.000000e+00> : vector<8xf32>
    %65 = vector.multi_reduction <add>, %64, %cst_26 [1] : vector<8x16xf32> to vector<8xf32>
    %66 = vector.shape_cast %65 : vector<8xf32> to vector<8x1xf32>
    %cst_27 = arith.constant dense<0.000000e+00> : vector<8xf32>
    %67 = vector.multi_reduction <add>, %45, %cst_27 [1] : vector<8x16xf32> to vector<8xf32>
    %68 = vector.shape_cast %67 : vector<8xf32> to vector<8x1xf32>
    %69 = arith.addf %66, %68 : vector<8x1xf32>
    %cst_28 = arith.constant 2.500000e-01 : f32
    %70 = vector.broadcast %cst_28 : f32 to vector<8x1xf32>
    %71 = arith.mulf %70, %69 : vector<8x1xf32>
    %72 = tpu.transpose %71, [1, 0] : vector<8x1xf32> -> vector<1x8xf32>
    %73 = arith.subf %5, %72 : vector<1x8xf32>
    %74 = vector.broadcast %63 : vector<8x1xf32> to vector<8x8xf32>
    %75 = arith.subf %55, %74 : vector<8x8xf32>
    %76 = vector.broadcast %73 : vector<1x8xf32> to vector<8x8xf32>
    %77 = arith.addf %75, %76 : vector<8x8xf32>
    %cst_29 = arith.constant dense<0xFF800000> : vector<8xf32>
    %78 = vector.multi_reduction <maximumf>, %77, %cst_29 [1] : vector<8x8xf32> to vector<8xf32>
    %79 = vector.shape_cast %78 : vector<8xf32> to vector<8x1xf32>
    %80 = vector.broadcast %79 : vector<8x1xf32> to vector<8x8xf32>
    %81 = arith.subf %77, %80 : vector<8x8xf32>
    %82 = math.exp %81 : vector<8x8xf32>
    %cst_30 = arith.constant dense<0.000000e+00> : vector<8xf32>
    %83 = vector.multi_reduction <add>, %82, %cst_30 [1] : vector<8x8xf32> to vector<8xf32>
    %84 = vector.shape_cast %83 : vector<8xf32> to vector<8x1xf32>
    %85 = tpu.reciprocal %84 {approx = true} : vector<8x1xf32> -> vector<8x1xf32>
    %86 = vector.broadcast %85 : vector<8x1xf32> to vector<8x8xf32>
    %87 = arith.mulf %82, %86 : vector<8x8xf32>
    %c0_31 = arith.constant 0 : index
    %c0_32 = arith.constant 0 : index
    %c0_33 = arith.constant 0 : index
    %c0_34 = arith.constant 0 : index
    %88 = vector.load %arg18[%c0_31, %c0_32, %c0_33, %c0_34] : memref<1x2x8x8xf32, #tpu.memory_space<vmem>>, vector<1x1x8x8xf32>
    %89 = vector.shape_cast %88 : vector<1x1x8x8xf32> to vector<8x8xf32>
    %90 = vector.shape_cast %87 : vector<8x8xf32> to vector<1x1x8x8xf32>
    tpu.vector_store %arg18[%c0_31, %c0_32, %c0_33, %c0_34], %90 {strides = array<i32>} : memref<1x2x8x8xf32, #tpu.memory_space<vmem>>, vector<1x1x8x8xf32>,
    %91 = arith.truncf %87 : vector<8x8xf32> to vector<8x8xbf16>
    %92 = arith.truncf %43 : vector<8x16xf32> to vector<8x16xbf16>
    %cst_35 = arith.constant dense<0.000000e+00> : vector<8x16xf32>
    %93 = tpu.matmul %91, %92, %cst_35 {dimension_numbers = #tpu.dot_dimension_numbers<[1], [0], [0], [1], [0, 0, 1, 1], [], []>} : vector<8x8xbf16>, vector<8x16xbf16>, vector<8x16xf32> -> vector<8x16xf32>
    %94 = arith.mulf %87, %87 : vector<8x8xf32>
    %95 = arith.truncf %94 : vector<8x8xf32> to vector<8x8xbf16>
    %96 = arith.truncf %46 : vector<8x16xf32> to vector<8x16xbf16>
    %cst_36 = arith.constant dense<0.000000e+00> : vector<8x16xf32>
    %97 = tpu.matmul %95, %96, %cst_36 {dimension_numbers = #tpu.dot_dimension_numbers<[1], [0], [0], [1], [0, 0, 1, 1], [], []>} : vector<8x8xbf16>, vector<8x16xbf16>, vector<8x16xf32> -> vector<8x16xf32>
    %98 = vector.extract_strided_slice %31 {offsets = [0, 16], sizes = [8, 16], strides = [1, 1]} : vector<8x32xf32> to vector<8x16xf32>
    %99 = vector.extract_strided_slice %32 {offsets = [0, 16], sizes = [8, 16], strides = [1, 1]} : vector<8x32xf32> to vector<8x16xf32>
    %100 = vector.extract_strided_slice %33 {offsets = [0, 16], sizes = [8, 16], strides = [1, 1]} : vector<8x32xf32> to vector<8x16xf32>
    %101 = vector.extract_strided_slice %34 {offsets = [0, 16], sizes = [8, 16], strides = [1, 1]} : vector<8x32xf32> to vector<8x16xf32>
    %102 = vector.extract_strided_slice %35 {offsets = [0, 16], sizes = [8, 16], strides = [1, 1]} : vector<8x32xf32> to vector<8x16xf32>
    %103 = vector.extract_strided_slice %36 {offsets = [0, 16], sizes = [8, 16], strides = [1, 1]} : vector<8x32xf32> to vector<8x16xf32>
    %104 = vector.extract_strided_slice %40 {offsets = [0, 16], sizes = [8, 16], strides = [1, 1]} : vector<8x64xf32> to vector<8x16xf32>
    %105 = vector.extract_strided_slice %40 {offsets = [0, 48], sizes = [8, 16], strides = [1, 1]} : vector<8x64xf32> to vector<8x16xf32>
    %106 = tpu.concatenate %98, %104 in 1 : vector<8x16xf32>, vector<8x16xf32> -> vector<8x32xf32>
    %cst_37 = arith.constant 5.000000e-01 : f32
    %107 = vector.broadcast %cst_37 : f32 to vector<8x32xf32>
    %108 = arith.mulf %106, %107 : vector<8x32xf32>
    %109 = arith.truncf %108 : vector<8x32xf32> to vector<8x32xbf16>
    %110 = tpu.concatenate %99, %105 in 1 : vector<8x16xf32>, vector<8x16xf32> -> vector<8x32xf32>
    %111 = arith.truncf %110 : vector<8x32xf32> to vector<8x32xbf16>
    %cst_38 = arith.constant dense<0.000000e+00> : vector<8x8xf32>
    %112 = tpu.matmul %109, %111, %cst_38 {dimension_numbers = #tpu.dot_dimension_numbers<[1], [1], [0], [0], [0, 0, 1, 0], [], []>} : vector<8x32xbf16>, vector<8x32xbf16>, vector<8x8xf32> -> vector<8x8xf32>
    %113 = arith.mulf %98, %98 : vector<8x16xf32>
    %cst_39 = arith.constant dense<0.000000e+00> : vector<8xf32>
    %114 = vector.multi_reduction <add>, %113, %cst_39 [1] : vector<8x16xf32> to vector<8xf32>
    %115 = vector.shape_cast %114 : vector<8xf32> to vector<8x1xf32>
    %cst_40 = arith.constant dense<0.000000e+00> : vector<8xf32>
    %116 = vector.multi_reduction <add>, %101, %cst_40 [1] : vector<8x16xf32> to vector<8xf32>
    %117 = vector.shape_cast %116 : vector<8xf32> to vector<8x1xf32>
    %118 = arith.addf %115, %117 : vector<8x1xf32>
    %cst_41 = arith.constant 2.500000e-01 : f32
    %119 = vector.broadcast %cst_41 : f32 to vector<8x1xf32>
    %120 = arith.mulf %119, %118 : vector<8x1xf32>
    %121 = arith.mulf %99, %99 : vector<8x16xf32>
    %cst_42 = arith.constant dense<0.000000e+00> : vector<8xf32>
    %122 = vector.multi_reduction <add>, %121, %cst_42 [1] : vector<8x16xf32> to vector<8xf32>
    %123 = vector.shape_cast %122 : vector<8xf32> to vector<8x1xf32>
    %cst_43 = arith.constant dense<0.000000e+00> : vector<8xf32>
    %124 = vector.multi_reduction <add>, %102, %cst_43 [1] : vector<8x16xf32> to vector<8xf32>
    %125 = vector.shape_cast %124 : vector<8xf32> to vector<8x1xf32>
    %126 = arith.addf %123, %125 : vector<8x1xf32>
    %cst_44 = arith.constant 2.500000e-01 : f32
    %127 = vector.broadcast %cst_44 : f32 to vector<8x1xf32>
    %128 = arith.mulf %127, %126 : vector<8x1xf32>
    %129 = tpu.transpose %128, [1, 0] : vector<8x1xf32> -> vector<1x8xf32>
    %130 = arith.subf %5, %129 : vector<1x8xf32>
    %131 = vector.broadcast %120 : vector<8x1xf32> to vector<8x8xf32>
    %132 = arith.subf %112, %131 : vector<8x8xf32>
    %133 = vector.broadcast %130 : vector<1x8xf32> to vector<8x8xf32>
    %134 = arith.addf %132, %133 : vector<8x8xf32>
    %cst_45 = arith.constant dense<0xFF800000> : vector<8xf32>
    %135 = vector.multi_reduction <maximumf>, %134, %cst_45 [1] : vector<8x8xf32> to vector<8xf32>
    %136 = vector.shape_cast %135 : vector<8xf32> to vector<8x1xf32>
    %137 = vector.broadcast %136 : vector<8x1xf32> to vector<8x8xf32>
    %138 = arith.subf %134, %137 : vector<8x8xf32>
    %139 = math.exp %138 : vector<8x8xf32>
    %cst_46 = arith.constant dense<0.000000e+00> : vector<8xf32>
    %140 = vector.multi_reduction <add>, %139, %cst_46 [1] : vector<8x8xf32> to vector<8xf32>
    %141 = vector.shape_cast %140 : vector<8xf32> to vector<8x1xf32>
    %142 = tpu.reciprocal %141 {approx = true} : vector<8x1xf32> -> vector<8x1xf32>
    %143 = vector.broadcast %142 : vector<8x1xf32> to vector<8x8xf32>
    %144 = arith.mulf %139, %143 : vector<8x8xf32>
    %c0_47 = arith.constant 0 : index
    %c1_48 = arith.constant 1 : index
    %c0_49 = arith.constant 0 : index
    %c0_50 = arith.constant 0 : index
    %145 = vector.load %arg18[%c0_47, %c1_48, %c0_49, %c0_50] : memref<1x2x8x8xf32, #tpu.memory_space<vmem>>, vector<1x1x8x8xf32>
    %146 = vector.shape_cast %145 : vector<1x1x8x8xf32> to vector<8x8xf32>
    %147 = vector.shape_cast %144 : vector<8x8xf32> to vector<1x1x8x8xf32>
    tpu.vector_store %arg18[%c0_47, %c1_48, %c0_49, %c0_50], %147 {strides = array<i32>} : memref<1x2x8x8xf32, #tpu.memory_space<vmem>>, vector<1x1x8x8xf32>,
    %148 = arith.truncf %144 : vector<8x8xf32> to vector<8x8xbf16>
    %149 = arith.truncf %100 : vector<8x16xf32> to vector<8x16xbf16>
    %cst_51 = arith.constant dense<0.000000e+00> : vector<8x16xf32>
    %150 = tpu.matmul %148, %149, %cst_51 {dimension_numbers = #tpu.dot_dimension_numbers<[1], [0], [0], [1], [0, 0, 1, 1], [], []>} : vector<8x8xbf16>, vector<8x16xbf16>, vector<8x16xf32> -> vector<8x16xf32>
    %151 = arith.mulf %144, %144 : vector<8x8xf32>
    %152 = arith.truncf %151 : vector<8x8xf32> to vector<8x8xbf16>
    %153 = arith.truncf %103 : vector<8x16xf32> to vector<8x16xbf16>
    %cst_52 = arith.constant dense<0.000000e+00> : vector<8x16xf32>
    %154 = tpu.matmul %152, %153, %cst_52 {dimension_numbers = #tpu.dot_dimension_numbers<[1], [0], [0], [1], [0, 0, 1, 1], [], []>} : vector<8x8xbf16>, vector<8x16xbf16>, vector<8x16xf32> -> vector<8x16xf32>
    %155 = tpu.concatenate %93, %150 in 1 : vector<8x16xf32>, vector<8x16xf32> -> vector<8x32xf32>
    %156 = tpu.concatenate %97, %154 in 1 : vector<8x16xf32>, vector<8x16xf32> -> vector<8x32xf32>
    %c0_53 = arith.constant 0 : index
    %c0_54 = arith.constant 0 : index
    %157 = vector.load %arg7[%c0_53, %c0_54] : memref<2x32xf32, #tpu.memory_space<vmem>>, vector<2x32xf32>
    %c0_55 = arith.constant 0 : index
    %c0_56 = arith.constant 0 : index
    %c0_57 = arith.constant 0 : index
    %158 = vector.load %arg6[%c0_55, %c0_56, %c0_57] : memref<2x32x32xbf16, #tpu.memory_space<vmem>>, vector<1x32x32xbf16>
    %159 = vector.shape_cast %158 : vector<1x32x32xbf16> to vector<32x32xbf16>
    %160 = arith.truncf %155 : vector<8x32xf32> to vector<8x32xbf16>
    %cst_58 = arith.constant dense<0.000000e+00> : vector<8x32xf32>
    %161 = tpu.matmul %160, %159, %cst_58 {dimension_numbers = #tpu.dot_dimension_numbers<[1], [0], [0], [1], [0, 0, 1, 1], [], []>} : vector<8x32xbf16>, vector<32x32xbf16>, vector<8x32xf32> -> vector<8x32xf32>
    %162 = vector.extract_strided_slice %157 {offsets = [0, 0], sizes = [1, 32], strides = [1, 1]} : vector<2x32xf32> to vector<1x32xf32>
    %163 = vector.broadcast %162 : vector<1x32xf32> to vector<8x32xf32>
    %164 = arith.addf %161, %163 : vector<8x32xf32>
    %c1_59 = arith.constant 1 : index
    %c0_60 = arith.constant 0 : index
    %c0_61 = arith.constant 0 : index
    %165 = vector.load %arg6[%c1_59, %c0_60, %c0_61] : memref<2x32x32xbf16, #tpu.memory_space<vmem>>, vector<1x32x32xbf16>
    %166 = vector.shape_cast %165 : vector<1x32x32xbf16> to vector<32x32xbf16>
    %167 = arith.truncf %156 : vector<8x32xf32> to vector<8x32xbf16>
    %cst_62 = arith.constant dense<0.000000e+00> : vector<8x32xf32>
    %168 = tpu.matmul %167, %166, %cst_62 {dimension_numbers = #tpu.dot_dimension_numbers<[1], [0], [0], [1], [0, 0, 1, 1], [], []>} : vector<8x32xbf16>, vector<32x32xbf16>, vector<8x32xf32> -> vector<8x32xf32>
    %169 = vector.extract_strided_slice %157 {offsets = [1, 0], sizes = [1, 32], strides = [1, 1]} : vector<2x32xf32> to vector<1x32xf32>
    %170 = vector.broadcast %169 : vector<1x32xf32> to vector<8x32xf32>
    %171 = arith.addf %168, %170 : vector<8x32xf32>
    %c0_63 = arith.constant 0 : index
    %c0_64 = arith.constant 0 : index
    %172 = vector.load %arg8[%c0_63, %c0_64] : memref<1x32xf32, #tpu.memory_space<vmem>>, vector<1x32xf32>
    %c0_65 = arith.constant 0 : index
    %c0_66 = arith.constant 0 : index
    %173 = vector.load %arg9[%c0_65, %c0_66] : memref<1x32xf32, #tpu.memory_space<vmem>>, vector<1x32xf32>
    %174 = arith.addf %164, %1 : vector<8x32xf32>
    %cst_67 = arith.constant dense<0.000000e+00> : vector<8xf32>
    %175 = vector.multi_reduction <add>, %174, %cst_67 [1] : vector<8x32xf32> to vector<8xf32>
    %176 = vector.shape_cast %175 : vector<8xf32> to vector<8x1xf32>
    %cst_68 = arith.constant 3.200000e+01 : f32
    %177 = vector.broadcast %cst_68 : f32 to vector<8x1xf32>
    %178 = arith.divf %176, %177 : vector<8x1xf32>
    %179 = vector.broadcast %178 : vector<8x1xf32> to vector<8x32xf32>
    %180 = arith.subf %174, %179 : vector<8x32xf32>
    %181 = arith.mulf %180, %180 : vector<8x32xf32>
    %cst_69 = arith.constant dense<0.000000e+00> : vector<8xf32>
    %182 = vector.multi_reduction <add>, %181, %cst_69 [1] : vector<8x32xf32> to vector<8xf32>
    %183 = vector.shape_cast %182 : vector<8xf32> to vector<8x1xf32>
    %cst_70 = arith.constant 3.200000e+01 : f32
    %184 = vector.broadcast %cst_70 : f32 to vector<8x1xf32>
    %185 = arith.divf %183, %184 : vector<8x1xf32>
    %186 = vector.broadcast %178 : vector<8x1xf32> to vector<8x32xf32>
    %187 = arith.subf %174, %186 : vector<8x32xf32>
    %cst_71 = arith.constant 9.99999996E-13 : f32
    %188 = vector.broadcast %cst_71 : f32 to vector<8x1xf32>
    %189 = arith.addf %185, %188 : vector<8x1xf32>
    %190 = math.sqrt %189 : vector<8x1xf32>
    %191 = vector.broadcast %190 : vector<8x1xf32> to vector<8x32xf32>
    %192 = arith.divf %187, %191 : vector<8x32xf32>
    %193 = vector.broadcast %172 : vector<1x32xf32> to vector<8x32xf32>
    %194 = arith.mulf %193, %192 : vector<8x32xf32>
    %195 = vector.broadcast %173 : vector<1x32xf32> to vector<8x32xf32>
    %196 = arith.addf %194, %195 : vector<8x32xf32>
    %197 = arith.addf %171, %3 : vector<8x32xf32>
    %cst_72 = arith.constant dense<0.000000e+00> : vector<8xf32>
    %198 = vector.multi_reduction <add>, %197, %cst_72 [1] : vector<8x32xf32> to vector<8xf32>
    %199 = vector.shape_cast %198 : vector<8xf32> to vector<8x1xf32>
    %cst_73 = arith.constant 3.200000e+01 : f32
    %200 = vector.broadcast %cst_73 : f32 to vector<8x1xf32>
    %201 = arith.divf %199, %200 : vector<8x1xf32>
    %202 = vector.broadcast %201 : vector<8x1xf32> to vector<8x32xf32>
    %203 = arith.subf %197, %202 : vector<8x32xf32>
    %204 = arith.mulf %203, %203 : vector<8x32xf32>
    %cst_74 = arith.constant dense<0.000000e+00> : vector<8xf32>
    %205 = vector.multi_reduction <add>, %204, %cst_74 [1] : vector<8x32xf32> to vector<8xf32>
    %206 = vector.shape_cast %205 : vector<8xf32> to vector<8x1xf32>
    %cst_75 = arith.constant 3.200000e+01 : f32
    %207 = vector.broadcast %cst_75 : f32 to vector<8x1xf32>
    %208 = arith.divf %206, %207 : vector<8x1xf32>
    %209 = vector.broadcast %201 : vector<8x1xf32> to vector<8x32xf32>
    %210 = arith.subf %197, %209 : vector<8x32xf32>
    %cst_76 = arith.constant 9.99999996E-13 : f32
    %211 = vector.broadcast %cst_76 : f32 to vector<8x1xf32>
    %212 = arith.addf %208, %211 : vector<8x1xf32>
    %213 = math.sqrt %212 : vector<8x1xf32>
    %214 = vector.broadcast %213 : vector<8x1xf32> to vector<8x32xf32>
    %215 = arith.divf %210, %214 : vector<8x32xf32>
    %216 = vector.broadcast %172 : vector<1x32xf32> to vector<8x32xf32>
    %217 = arith.mulf %216, %215 : vector<8x32xf32>
    %218 = vector.broadcast %173 : vector<1x32xf32> to vector<8x32xf32>
    %219 = arith.addf %217, %218 : vector<8x32xf32>
    %c0_77 = arith.constant 0 : index
    %c0_78 = arith.constant 0 : index
    %220 = vector.load %arg11[%c0_77, %c0_78] : memref<2x128xf32, #tpu.memory_space<vmem>>, vector<2x128xf32>
    %c0_79 = arith.constant 0 : index
    %c0_80 = arith.constant 0 : index
    %221 = vector.load %arg13[%c0_79, %c0_80] : memref<2x32xf32, #tpu.memory_space<vmem>>, vector<2x32xf32>
    %c0_81 = arith.constant 0 : index
    %c0_82 = arith.constant 0 : index
    %222 = vector.load %arg14[%c0_81, %c0_82] : memref<2x32xf32, #tpu.memory_space<vmem>>, vector<2x32xf32>
    %c0_83 = arith.constant 0 : index
    %c0_84 = arith.constant 0 : index
    %223 = vector.load %arg15[%c0_83, %c0_84] : memref<2x32xf32, #tpu.memory_space<vmem>>, vector<2x32xf32>
    %c0_85 = arith.constant 0 : index
    %c0_86 = arith.constant 0 : index
    %c0_87 = arith.constant 0 : index
    %224 = vector.load %arg10[%c0_85, %c0_86, %c0_87] : memref<2x32x128xbf16, #tpu.memory_space<vmem>>, vector<1x32x128xbf16>
    %225 = vector.shape_cast %224 : vector<1x32x128xbf16> to vector<32x128xbf16>
    %226 = arith.truncf %196 : vector<8x32xf32> to vector<8x32xbf16>
    %cst_88 = arith.constant dense<0.000000e+00> : vector<8x128xf32>
    %227 = tpu.matmul %226, %225, %cst_88 {dimension_numbers = #tpu.dot_dimension_numbers<[1], [0], [0], [1], [0, 0, 1, 1], [], []>} : vector<8x32xbf16>, vector<32x128xbf16>, vector<8x128xf32> -> vector<8x128xf32>
    %228 = vector.extract_strided_slice %220 {offsets = [0, 0], sizes = [1, 128], strides = [1, 1]} : vector<2x128xf32> to vector<1x128xf32>
    %229 = vector.broadcast %228 : vector<1x128xf32> to vector<8x128xf32>
    %230 = arith.addf %227, %229 : vector<8x128xf32>
    %cst_89 = arith.constant 0.000000e+00 : f32
    %231 = vector.broadcast %cst_89 : f32 to vector<8x128xf32>
    %232 = arith.cmpf ogt, %230, %231 : vector<8x128xf32>
    %cst_90 = arith.constant 0.000000e+00 : f32
    %233 = vector.broadcast %cst_90 : f32 to vector<8x128xf32>
    %234 = arith.minimumf %230, %233 : vector<8x128xf32>
    %235 = math.exp %234 : vector<8x128xf32>
    %cst_91 = arith.constant 1.000000e+00 : f32
    %236 = vector.broadcast %cst_91 : f32 to vector<8x128xf32>
    %237 = arith.subf %235, %236 : vector<8x128xf32>
    %238 = arith.select %232, %230, %237 : vector<8x128xi1>, vector<8x128xf32>
    %c0_92 = arith.constant 0 : index
    %c0_93 = arith.constant 0 : index
    %c0_94 = arith.constant 0 : index
    %239 = vector.load %arg12[%c0_92, %c0_93, %c0_94] : memref<2x128x32xbf16, #tpu.memory_space<vmem>>, vector<1x128x32xbf16>
    %240 = vector.shape_cast %239 : vector<1x128x32xbf16> to vector<128x32xbf16>
    %241 = arith.truncf %238 : vector<8x128xf32> to vector<8x128xbf16>
    %cst_95 = arith.constant dense<0.000000e+00> : vector<8x32xf32>
    %242 = tpu.matmul %241, %240, %cst_95 {dimension_numbers = #tpu.dot_dimension_numbers<[1], [0], [0], [1], [0, 0, 1, 1], [], []>} : vector<8x128xbf16>, vector<128x32xbf16>, vector<8x32xf32> -> vector<8x32xf32>
    %243 = vector.extract_strided_slice %221 {offsets = [0, 0], sizes = [1, 32], strides = [1, 1]} : vector<2x32xf32> to vector<1x32xf32>
    %244 = vector.broadcast %243 : vector<1x32xf32> to vector<8x32xf32>
    %245 = arith.addf %242, %244 : vector<8x32xf32>
    %246 = arith.addf %245, %196 : vector<8x32xf32>
    %247 = vector.extract_strided_slice %222 {offsets = [0, 0], sizes = [1, 32], strides = [1, 1]} : vector<2x32xf32> to vector<1x32xf32>
    %248 = vector.extract_strided_slice %223 {offsets = [0, 0], sizes = [1, 32], strides = [1, 1]} : vector<2x32xf32> to vector<1x32xf32>
    %cst_96 = arith.constant dense<0.000000e+00> : vector<8xf32>
    %249 = vector.multi_reduction <add>, %246, %cst_96 [1] : vector<8x32xf32> to vector<8xf32>
    %250 = vector.shape_cast %249 : vector<8xf32> to vector<8x1xf32>
    %cst_97 = arith.constant 3.200000e+01 : f32
    %251 = vector.broadcast %cst_97 : f32 to vector<8x1xf32>
    %252 = arith.divf %250, %251 : vector<8x1xf32>
    %253 = vector.broadcast %252 : vector<8x1xf32> to vector<8x32xf32>
    %254 = arith.subf %246, %253 : vector<8x32xf32>
    %255 = arith.mulf %254, %254 : vector<8x32xf32>
    %cst_98 = arith.constant dense<0.000000e+00> : vector<8xf32>
    %256 = vector.multi_reduction <add>, %255, %cst_98 [1] : vector<8x32xf32> to vector<8xf32>
    %257 = vector.shape_cast %256 : vector<8xf32> to vector<8x1xf32>
    %cst_99 = arith.constant 3.200000e+01 : f32
    %258 = vector.broadcast %cst_99 : f32 to vector<8x1xf32>
    %259 = arith.divf %257, %258 : vector<8x1xf32>
    %260 = vector.broadcast %252 : vector<8x1xf32> to vector<8x32xf32>
    %261 = arith.subf %246, %260 : vector<8x32xf32>
    %cst_100 = arith.constant 9.99999996E-13 : f32
    %262 = vector.broadcast %cst_100 : f32 to vector<8x1xf32>
    %263 = arith.addf %259, %262 : vector<8x1xf32>
    %264 = math.sqrt %263 : vector<8x1xf32>
    %265 = vector.broadcast %264 : vector<8x1xf32> to vector<8x32xf32>
    %266 = arith.divf %261, %265 : vector<8x32xf32>
    %267 = vector.broadcast %247 : vector<1x32xf32> to vector<8x32xf32>
    %268 = arith.mulf %267, %266 : vector<8x32xf32>
    %269 = vector.broadcast %248 : vector<1x32xf32> to vector<8x32xf32>
    %270 = arith.addf %268, %269 : vector<8x32xf32>
    %c0_101 = arith.constant 0 : index
    %c0_102 = arith.constant 0 : index
    %c0_103 = arith.constant 0 : index
    %271 = vector.load %arg16[%c0_101, %c0_102, %c0_103] : memref<1x8x32xf32, #tpu.memory_space<vmem>>, vector<1x8x32xf32>
    %272 = vector.shape_cast %271 : vector<1x8x32xf32> to vector<8x32xf32>
    %273 = vector.shape_cast %270 : vector<8x32xf32> to vector<1x8x32xf32>
    tpu.vector_store %arg16[%c0_101, %c0_102, %c0_103], %273 {strides = array<i32>} : memref<1x8x32xf32, #tpu.memory_space<vmem>>, vector<1x8x32xf32>,
    %c1_104 = arith.constant 1 : index
    %c0_105 = arith.constant 0 : index
    %c0_106 = arith.constant 0 : index
    %274 = vector.load %arg10[%c1_104, %c0_105, %c0_106] : memref<2x32x128xbf16, #tpu.memory_space<vmem>>, vector<1x32x128xbf16>
    %275 = vector.shape_cast %274 : vector<1x32x128xbf16> to vector<32x128xbf16>
    %276 = arith.truncf %219 : vector<8x32xf32> to vector<8x32xbf16>
    %cst_107 = arith.constant dense<0.000000e+00> : vector<8x128xf32>
    %277 = tpu.matmul %276, %275, %cst_107 {dimension_numbers = #tpu.dot_dimension_numbers<[1], [0], [0], [1], [0, 0, 1, 1], [], []>} : vector<8x32xbf16>, vector<32x128xbf16>, vector<8x128xf32> -> vector<8x128xf32>
    %278 = vector.extract_strided_slice %220 {offsets = [1, 0], sizes = [1, 128], strides = [1, 1]} : vector<2x128xf32> to vector<1x128xf32>
    %279 = vector.broadcast %278 : vector<1x128xf32> to vector<8x128xf32>
    %280 = arith.addf %277, %279 : vector<8x128xf32>
    %cst_108 = arith.constant 0.000000e+00 : f32
    %281 = vector.broadcast %cst_108 : f32 to vector<8x128xf32>
    %282 = arith.cmpf ogt, %280, %281 : vector<8x128xf32>
    %cst_109 = arith.constant 0.000000e+00 : f32
    %283 = vector.broadcast %cst_109 : f32 to vector<8x128xf32>
    %284 = arith.minimumf %280, %283 : vector<8x128xf32>
    %285 = math.exp %284 : vector<8x128xf32>
    %cst_110 = arith.constant 1.000000e+00 : f32
    %286 = vector.broadcast %cst_110 : f32 to vector<8x128xf32>
    %287 = arith.subf %285, %286 : vector<8x128xf32>
    %288 = arith.select %282, %280, %287 : vector<8x128xi1>, vector<8x128xf32>
    %c1_111 = arith.constant 1 : index
    %c0_112 = arith.constant 0 : index
    %c0_113 = arith.constant 0 : index
    %289 = vector.load %arg12[%c1_111, %c0_112, %c0_113] : memref<2x128x32xbf16, #tpu.memory_space<vmem>>, vector<1x128x32xbf16>
    %290 = vector.shape_cast %289 : vector<1x128x32xbf16> to vector<128x32xbf16>
    %291 = arith.truncf %288 : vector<8x128xf32> to vector<8x128xbf16>
    %cst_114 = arith.constant dense<0.000000e+00> : vector<8x32xf32>
    %292 = tpu.matmul %291, %290, %cst_114 {dimension_numbers = #tpu.dot_dimension_numbers<[1], [0], [0], [1], [0, 0, 1, 1], [], []>} : vector<8x128xbf16>, vector<128x32xbf16>, vector<8x32xf32> -> vector<8x32xf32>
    %293 = vector.extract_strided_slice %221 {offsets = [1, 0], sizes = [1, 32], strides = [1, 1]} : vector<2x32xf32> to vector<1x32xf32>
    %294 = vector.broadcast %293 : vector<1x32xf32> to vector<8x32xf32>
    %295 = arith.addf %292, %294 : vector<8x32xf32>
    %296 = arith.addf %295, %219 : vector<8x32xf32>
    %297 = vector.extract_strided_slice %222 {offsets = [1, 0], sizes = [1, 32], strides = [1, 1]} : vector<2x32xf32> to vector<1x32xf32>
    %298 = vector.extract_strided_slice %223 {offsets = [1, 0], sizes = [1, 32], strides = [1, 1]} : vector<2x32xf32> to vector<1x32xf32>
    %cst_115 = arith.constant dense<0.000000e+00> : vector<8xf32>
    %299 = vector.multi_reduction <add>, %296, %cst_115 [1] : vector<8x32xf32> to vector<8xf32>
    %300 = vector.shape_cast %299 : vector<8xf32> to vector<8x1xf32>
    %cst_116 = arith.constant 3.200000e+01 : f32
    %301 = vector.broadcast %cst_116 : f32 to vector<8x1xf32>
    %302 = arith.divf %300, %301 : vector<8x1xf32>
    %303 = vector.broadcast %302 : vector<8x1xf32> to vector<8x32xf32>
    %304 = arith.subf %296, %303 : vector<8x32xf32>
    %305 = arith.mulf %304, %304 : vector<8x32xf32>
    %cst_117 = arith.constant dense<0.000000e+00> : vector<8xf32>
    %306 = vector.multi_reduction <add>, %305, %cst_117 [1] : vector<8x32xf32> to vector<8xf32>
    %307 = vector.shape_cast %306 : vector<8xf32> to vector<8x1xf32>
    %cst_118 = arith.constant 3.200000e+01 : f32
    %308 = vector.broadcast %cst_118 : f32 to vector<8x1xf32>
    %309 = arith.divf %307, %308 : vector<8x1xf32>
    %310 = vector.broadcast %302 : vector<8x1xf32> to vector<8x32xf32>
    %311 = arith.subf %296, %310 : vector<8x32xf32>
    %cst_119 = arith.constant 9.99999996E-13 : f32
    %312 = vector.broadcast %cst_119 : f32 to vector<8x1xf32>
    %313 = arith.addf %309, %312 : vector<8x1xf32>
    %314 = math.sqrt %313 : vector<8x1xf32>
    %315 = vector.broadcast %314 : vector<8x1xf32> to vector<8x32xf32>
    %316 = arith.divf %311, %315 : vector<8x32xf32>
    %317 = vector.broadcast %297 : vector<1x32xf32> to vector<8x32xf32>
    %318 = arith.mulf %317, %316 : vector<8x32xf32>
    %319 = vector.broadcast %298 : vector<1x32xf32> to vector<8x32xf32>
    %320 = arith.addf %318, %319 : vector<8x32xf32>
    %cst_120 = arith.constant 0.000000e+00 : f32
    %321 = vector.broadcast %cst_120 : f32 to vector<8x32xf32>
    %322 = arith.cmpf ogt, %320, %321 : vector<8x32xf32>
    %cst_121 = arith.constant 0.000000e+00 : f32
    %323 = vector.broadcast %cst_121 : f32 to vector<8x32xf32>
    %324 = arith.minimumf %320, %323 : vector<8x32xf32>
    %325 = math.exp %324 : vector<8x32xf32>
    %cst_122 = arith.constant 1.000000e+00 : f32
    %326 = vector.broadcast %cst_122 : f32 to vector<8x32xf32>
    %327 = arith.subf %325, %326 : vector<8x32xf32>
    %328 = arith.select %322, %320, %327 : vector<8x32xi1>, vector<8x32xf32>
    %cst_123 = arith.constant 1.000000e+00 : f32
    %329 = vector.broadcast %cst_123 : f32 to vector<8x32xf32>
    %330 = arith.addf %328, %329 : vector<8x32xf32>
    %c0_124 = arith.constant 0 : index
    %c0_125 = arith.constant 0 : index
    %c0_126 = arith.constant 0 : index
    %331 = vector.load %arg17[%c0_124, %c0_125, %c0_126] : memref<1x8x32xf32, #tpu.memory_space<vmem>>, vector<1x8x32xf32>
    %332 = vector.shape_cast %331 : vector<1x8x32xf32> to vector<8x32xf32>
    %333 = vector.shape_cast %330 : vector<8x32xf32> to vector<1x8x32xf32>
    tpu.vector_store %arg17[%c0_124, %c0_125, %c0_126], %333 {strides = array<i32>} : memref<1x8x32xf32, #tpu.memory_space<vmem>>, vector<1x8x32xf32>,
    return
  }
  func.func @transform_0(%arg0: i32) -> (i32, i32, i32) {
    %c0_i32 = arith.constant 0 : i32
    %c0_i32_0 = arith.constant 0 : i32
    %c0_i32_1 = arith.constant 0 : i32
    return %arg0, %c0_i32, %c0_i32_0 : i32, i32, i32
  }
  func.func @transform_1(%arg0: i32) -> (i32, i32, i32) {
    %c0_i32 = arith.constant 0 : i32
    %c0_i32_0 = arith.constant 0 : i32
    %c0_i32_1 = arith.constant 0 : i32
    return %arg0, %c0_i32, %c0_i32_0 : i32, i32, i32
  }
  func.func @transform_2(%arg0: i32) -> (i32, i32, i32) {
    %c0_i32 = arith.constant 0 : i32
    %c0_i32_0 = arith.constant 0 : i32
    %c0_i32_1 = arith.constant 0 : i32
    return %arg0, %c0_i32, %c0_i32_0 : i32, i32, i32
  }
  func.func @transform_3(%arg0: i32) -> (i32, i32, i32) {
    %c0_i32 = arith.constant 0 : i32
    %c0_i32_0 = arith.constant 0 : i32
    %c0_i32_1 = arith.constant 0 : i32
    %c0_i32_2 = arith.constant 0 : i32
    return %c0_i32, %c0_i32_0, %c0_i32_1 : i32, i32, i32
  }
  func.func @transform_4(%arg0: i32) -> (i32, i32) {
    %c0_i32 = arith.constant 0 : i32
    %c0_i32_0 = arith.constant 0 : i32
    %c0_i32_1 = arith.constant 0 : i32
    return %c0_i32, %c0_i32_0 : i32, i32
  }
  func.func @transform_5(%arg0: i32) -> (i32, i32, i32) {
    %c0_i32 = arith.constant 0 : i32
    %c0_i32_0 = arith.constant 0 : i32
    %c0_i32_1 = arith.constant 0 : i32
    %c0_i32_2 = arith.constant 0 : i32
    return %c0_i32, %c0_i32_0, %c0_i32_1 : i32, i32, i32
  }
  func.func @transform_6(%arg0: i32) -> (i32, i32) {
    %c0_i32 = arith.constant 0 : i32
    %c0_i32_0 = arith.constant 0 : i32
    %c0_i32_1 = arith.constant 0 : i32
    return %c0_i32, %c0_i32_0 : i32, i32
  }
  func.func @transform_7(%arg0: i32) -> (i32, i32) {
    %c0_i32 = arith.constant 0 : i32
    %c0_i32_0 = arith.constant 0 : i32
    %c0_i32_1 = arith.constant 0 : i32
    return %c0_i32, %c0_i32_0 : i32, i32
  }
  func.func @transform_8(%arg0: i32) -> (i32, i32) {
    %c0_i32 = arith.constant 0 : i32
    %c0_i32_0 = arith.constant 0 : i32
    %c0_i32_1 = arith.constant 0 : i32
    return %c0_i32, %c0_i32_0 : i32, i32
  }
  func.func @transform_9(%arg0: i32) -> (i32, i32, i32) {
    %c0_i32 = arith.constant 0 : i32
    %c0_i32_0 = arith.constant 0 : i32
    %c0_i32_1 = arith.constant 0 : i32
    %c0_i32_2 = arith.constant 0 : i32
    return %c0_i32, %c0_i32_0, %c0_i32_1 : i32, i32, i32
  }
  func.func @transform_10(%arg0: i32) -> (i32, i32) {
    %c0_i32 = arith.constant 0 : i32
    %c0_i32_0 = arith.constant 0 : i32
    %c0_i32_1 = arith.constant 0 : i32
    return %c0_i32, %c0_i32_0 : i32, i32
  }
  func.func @transform_11(%arg0: i32) -> (i32, i32, i32) {
    %c0_i32 = arith.constant 0 : i32
    %c0_i32_0 = arith.constant 0 : i32
    %c0_i32_1 = arith.constant 0 : i32
    %c0_i32_2 = arith.constant 0 : i32
    return %c0_i32, %c0_i32_0, %c0_i32_1 : i32, i32, i32
  }
  func.func @transform_12(%arg0: i32) -> (i32, i32) {
    %c0_i32 = arith.constant 0 : i32
    %c0_i32_0 = arith.constant 0 : i32
    %c0_i32_1 = arith.constant 0 : i32
    return %c0_i32, %c0_i32_0 : i32, i32
  }
  func.func @transform_13(%arg0: i32) -> (i32, i32) {
    %c0_i32 = arith.constant 0 : i32
    %c0_i32_0 = arith.constant 0 : i32
    %c0_i32_1 = arith.constant 0 : i32
    return %c0_i32, %c0_i32_0 : i32, i32
  }
  func.func @transform_14(%arg0: i32) -> (i32, i32) {
    %c0_i32 = arith.constant 0 : i32
    %c0_i32_0 = arith.constant 0 : i32
    %c0_i32_1 = arith.constant 0 : i32
    return %c0_i32, %c0_i32_0 : i32, i32
  }
  func.func @transform_15(%arg0: i32) -> (i32, i32, i32) {
    %c0_i32 = arith.constant 0 : i32
    %c0_i32_0 = arith.constant 0 : i32
    %c0_i32_1 = arith.constant 0 : i32
    return %arg0, %c0_i32, %c0_i32_0 : i32, i32, i32
  }
  func.func @transform_16(%arg0: i32) -> (i32, i32, i32) {
    %c0_i32 = arith.constant 0 : i32
    %c0_i32_0 = arith.constant 0 : i32
    %c0_i32_1 = arith.constant 0 : i32
    return %arg0, %c0_i32, %c0_i32_0 : i32, i32, i32
  }
  func.func @transform_17(%arg0: i32) -> (i32, i32, i32, i32) {
    %c0_i32 = arith.constant 0 : i32
    %c0_i32_0 = arith.constant 0 : i32
    %c0_i32_1 = arith.constant 0 : i32
    %c0_i32_2 = arith.constant 0 : i32
    return %arg0, %c0_i32, %c0_i32_0, %c0_i32_1 : i32, i32, i32, i32
  }
}

module attributes {stable_mosaic.version = 11 : i64} {
  func.func @_dist_layer_kernel(%arg0: i32, %arg1: memref<1x8x32xf32, #tpu.memory_space<vmem>>, %arg2: memref<1x8x32xf32, #tpu.memory_space<vmem>>, %arg3: memref<1x1x8xf32, #tpu.memory_space<vmem>>, %arg4: memref<2x32x96xbf16, #tpu.memory_space<vmem>>, %arg5: memref<2x96xf32, #tpu.memory_space<vmem>>, %arg6: memref<2x32x32xbf16, #tpu.memory_space<vmem>>, %arg7: memref<2x32xf32, #tpu.memory_space<vmem>>, %arg8: memref<1x32xf32, #tpu.memory_space<vmem>>, %arg9: memref<1x32xf32, #tpu.memory_space<vmem>>, %arg10: memref<2x32x128xbf16, #tpu.memory_space<vmem>>, %arg11: memref<2x128xf32, #tpu.memory_space<vmem>>, %arg12: memref<2x128x32xbf16, #tpu.memory_space<vmem>>, %arg13: memref<2x32xf32, #tpu.memory_space<vmem>>, %arg14: memref<2x32xf32, #tpu.memory_space<vmem>>, %arg15: memref<2x32xf32, #tpu.memory_space<vmem>>, %arg16: memref<1x8x32xf32, #tpu.memory_space<vmem>>, %arg17: memref<1x8x32xf32, #tpu.memory_space<vmem>>, %arg18: memref<1x2x8x8xf32, #tpu.memory_space<vmem>>) attributes {dimension_semantics = [#tpu.dimension_semantics<parallel>], iteration_bounds = array<i64: 2>, scalar_prefetch = 0 : i64, scratch_operands = 0 : i64, tpu.core_type = #tpu.core_type<tc>, window_params = [{transform_indices = @transform_0, window_bounds = array<i64: 1, 8, 32>}, {transform_indices = @transform_1, window_bounds = array<i64: 1, 8, 32>}, {transform_indices = @transform_2, window_bounds = array<i64: 1, 1, 8>}, {pipeline_mode = #tpu.pipeline_mode<synchronous>, transform_indices = @transform_3, window_bounds = array<i64: 2, 32, 96>}, {pipeline_mode = #tpu.pipeline_mode<synchronous>, transform_indices = @transform_4, window_bounds = array<i64: 2, 96>}, {pipeline_mode = #tpu.pipeline_mode<synchronous>, transform_indices = @transform_5, window_bounds = array<i64: 2, 32, 32>}, {pipeline_mode = #tpu.pipeline_mode<synchronous>, transform_indices = @transform_6, window_bounds = array<i64: 2, 32>}, {pipeline_mode = #tpu.pipeline_mode<synchronous>, transform_indices = @transform_7, window_bounds = array<i64: 1, 32>}, {pipeline_mode = #tpu.pipeline_mode<synchronous>, transform_indices = @transform_8, window_bounds = array<i64: 1, 32>}, {pipeline_mode = #tpu.pipeline_mode<synchronous>, transform_indices = @transform_9, window_bounds = array<i64: 2, 32, 128>}, {pipeline_mode = #tpu.pipeline_mode<synchronous>, transform_indices = @transform_10, window_bounds = array<i64: 2, 128>}, {pipeline_mode = #tpu.pipeline_mode<synchronous>, transform_indices = @transform_11, window_bounds = array<i64: 2, 128, 32>}, {pipeline_mode = #tpu.pipeline_mode<synchronous>, transform_indices = @transform_12, window_bounds = array<i64: 2, 32>}, {pipeline_mode = #tpu.pipeline_mode<synchronous>, transform_indices = @transform_13, window_bounds = array<i64: 2, 32>}, {pipeline_mode = #tpu.pipeline_mode<synchronous>, transform_indices = @transform_14, window_bounds = array<i64: 2, 32>}, {transform_indices = @transform_15, window_bounds = array<i64: 1, 8, 32>}, {transform_indices = @transform_16, window_bounds = array<i64: 1, 8, 32>}, {transform_indices = @transform_17, window_bounds = array<i64: 1, 2, 8, 8>}]} {
    %c0 = arith.constant 0 : index
    %c0_0 = arith.constant 0 : index
    %c0_1 = arith.constant 0 : index
    %0 = vector.load %arg1[%c0, %c0_0, %c0_1] : memref<1x8x32xf32, #tpu.memory_space<vmem>>, vector<1x8x32xf32>
    %1 = vector.shape_cast %0 : vector<1x8x32xf32> to vector<8x32xf32>
    %c0_2 = arith.constant 0 : index
    %c0_3 = arith.constant 0 : index
    %c0_4 = arith.constant 0 : index
    %2 = vector.load %arg2[%c0_2, %c0_3, %c0_4] : memref<1x8x32xf32, #tpu.memory_space<vmem>>, vector<1x8x32xf32>
    %3 = vector.shape_cast %2 : vector<1x8x32xf32> to vector<8x32xf32>
    %c0_5 = arith.constant 0 : index
    %c0_6 = arith.constant 0 : index
    %c0_7 = arith.constant 0 : index
    %4 = vector.load %arg3[%c0_5, %c0_6, %c0_7] : memref<1x1x8xf32, #tpu.memory_space<vmem>>, vector<1x1x8xf32>
    %5 = vector.shape_cast %4 : vector<1x1x8xf32> to vector<1x8xf32>
    %c0_8 = arith.constant 0 : index
    %c0_9 = arith.constant 0 : index
    %6 = vector.load %arg5[%c0_8, %c0_9] : memref<2x96xf32, #tpu.memory_space<vmem>>, vector<2x96xf32>
    %c0_10 = arith.constant 0 : index
    %c0_11 = arith.constant 0 : index
    %c0_12 = arith.constant 0 : index
    %7 = vector.load %arg4[%c0_10, %c0_11, %c0_12] : memref<2x32x96xbf16, #tpu.memory_space<vmem>>, vector<1x32x96xbf16>
    %8 = vector.shape_cast %7 : vector<1x32x96xbf16> to vector<32x96xbf16>
    %9 = arith.truncf %1 : vector<8x32xf32> to vector<8x32xbf16>
    %cst = arith.constant dense<0.000000e+00> : vector<8x96xf32>
    %10 = tpu.matmul %9, %8, %cst {dimension_numbers = #tpu.dot_dimension_numbers<[1], [0], [0], [1], [0, 0, 1, 1], [], []>} : vector<8x32xbf16>, vector<32x96xbf16>, vector<8x96xf32> -> vector<8x96xf32>
    %11 = vector.extract_strided_slice %6 {offsets = [0, 0], sizes = [1, 96], strides = [1, 1]} : vector<2x96xf32> to vector<1x96xf32>
    %12 = vector.broadcast %11 : vector<1x96xf32> to vector<8x96xf32>
    %13 = arith.addf %10, %12 : vector<8x96xf32>
    %c1 = arith.constant 1 : index
    %c0_13 = arith.constant 0 : index
    %c0_14 = arith.constant 0 : index
    %14 = vector.load %arg4[%c1, %c0_13, %c0_14] : memref<2x32x96xbf16, #tpu.memory_space<vmem>>, vector<1x32x96xbf16>
    %15 = vector.shape_cast %14 : vector<1x32x96xbf16> to vector<32x96xbf16>
    %16 = arith.truncf %3 : vector<8x32xf32> to vector<8x32xbf16>
    %cst_15 = arith.constant dense<0.000000e+00> : vector<8x96xf32>
    %17 = tpu.matmul %16, %15, %cst_15 {dimension_numbers = #tpu.dot_dimension_numbers<[1], [0], [0], [1], [0, 0, 1, 1], [], []>} : vector<8x32xbf16>, vector<32x96xbf16>, vector<8x96xf32> -> vector<8x96xf32>
    %18 = vector.extract_strided_slice %6 {offsets = [1, 0], sizes = [1, 96], strides = [1, 1]} : vector<2x96xf32> to vector<1x96xf32>
    %19 = vector.broadcast %18 : vector<1x96xf32> to vector<8x96xf32>
    %20 = arith.addf %17, %19 : vector<8x96xf32>
    %cst_16 = arith.constant 0.000000e+00 : f32
    %21 = vector.broadcast %cst_16 : f32 to vector<8x96xf32>
    %22 = arith.cmpf ogt, %20, %21 : vector<8x96xf32>
    %cst_17 = arith.constant 0.000000e+00 : f32
    %23 = vector.broadcast %cst_17 : f32 to vector<8x96xf32>
    %24 = arith.minimumf %20, %23 : vector<8x96xf32>
    %25 = math.exp %24 : vector<8x96xf32>
    %cst_18 = arith.constant 1.000000e+00 : f32
    %26 = vector.broadcast %cst_18 : f32 to vector<8x96xf32>
    %27 = arith.subf %25, %26 : vector<8x96xf32>
    %28 = arith.select %22, %20, %27 : vector<8x96xi1>, vector<8x96xf32>
    %cst_19 = arith.constant 1.000000e+00 : f32
    %29 = vector.broadcast %cst_19 : f32 to vector<8x96xf32>
    %30 = arith.addf %28, %29 : vector<8x96xf32>
    %31 = vector.extract_strided_slice %13 {offsets = [0, 0], sizes = [8, 32], strides = [1, 1]} : vector<8x96xf32> to vector<8x32xf32>
    %32 = vector.extract_strided_slice %13 {offsets = [0, 32], sizes = [8, 32], strides = [1, 1]} : vector<8x96xf32> to vector<8x32xf32>
    %33 = vector.extract_strided_slice %13 {offsets = [0, 64], sizes = [8, 32], strides = [1, 1]} : vector<8x96xf32> to vector<8x32xf32>
    %34 = vector.extract_strided_slice %30 {offsets = [0, 0], sizes = [8, 32], strides = [1, 1]} : vector<8x96xf32> to vector<8x32xf32>
    %35 = vector.extract_strided_slice %30 {offsets = [0, 32], sizes = [8, 32], strides = [1, 1]} : vector<8x96xf32> to vector<8x32xf32>
    %36 = vector.extract_strided_slice %30 {offsets = [0, 64], sizes = [8, 32], strides = [1, 1]} : vector<8x96xf32> to vector<8x32xf32>
    %37 = vector.extract_strided_slice %30 {offsets = [0, 0], sizes = [8, 64], strides = [1, 1]} : vector<8x96xf32> to vector<8x64xf32>
    %cst_20 = arith.constant 1.000000e-24 : f32
    %38 = vector.broadcast %cst_20 : f32 to vector<8x64xf32>
    %39 = arith.maximumf %37, %38 : vector<8x64xf32>
    %40 = math.sqrt %39 : vector<8x64xf32>
    %41 = vector.extract_strided_slice %31 {offsets = [0, 0], sizes = [8, 16], strides = [1, 1]} : vector<8x32xf32> to vector<8x16xf32>
    %42 = vector.extract_strided_slice %32 {offsets = [0, 0], sizes = [8, 16], strides = [1, 1]} : vector<8x32xf32> to vector<8x16xf32>
    %43 = vector.extract_strided_slice %33 {offsets = [0, 0], sizes = [8, 16], strides = [1, 1]} : vector<8x32xf32> to vector<8x16xf32>
    %44 = vector.extract_strided_slice %34 {offsets = [0, 0], sizes = [8, 16], strides = [1, 1]} : vector<8x32xf32> to vector<8x16xf32>
    %45 = vector.extract_strided_slice %35 {offsets = [0, 0], sizes = [8, 16], strides = [1, 1]} : vector<8x32xf32> to vector<8x16xf32>
    %46 = vector.extract_strided_slice %36 {offsets = [0, 0], sizes = [8, 16], strides = [1, 1]} : vector<8x32xf32> to vector<8x16xf32>
    %47 = vector.extract_strided_slice %40 {offsets = [0, 0], sizes = [8, 16], strides = [1, 1]} : vector<8x64xf32> to vector<8x16xf32>
    %48 = vector.extract_strided_slice %40 {offsets = [0, 32], sizes = [8, 16], strides = [1, 1]} : vector<8x64xf32> to vector<8x16xf32>
    %49 = tpu.concatenate %41, %47 in 1 : vector<8x16xf32>, vector<8x16xf32> -> vector<8x32xf32>
    %cst_21 = arith.constant 5.000000e-01 : f32
    %50 = vector.broadcast %cst_21 : f32 to vector<8x32xf32>
    %51 = arith.mulf %49, %50 : vector<8x32xf32>
    %52 = arith.truncf %51 : vector<8x32xf32> to vector<8x32xbf16>
    %53 = tpu.concatenate %42, %48 in 1 : vector<8x16xf32>, vector<8x16xf32> -> vector<8x32xf32>
    %54 = arith.truncf %53 : vector<8x32xf32> to vector<8x32xbf16>
    %cst_22 = arith.constant dense<0.000000e+00> : vector<8x8xf32>
    %55 = tpu.matmul %52, %54, %cst_22 {dimension_numbers = #tpu.dot_dimension_numbers<[1], [1], [0], [0], [0, 0, 1, 0], [], []>} : vector<8x32xbf16>, vector<8x32xbf16>, vector<8x8xf32> -> vector<8x8xf32>
    %56 = arith.mulf %41, %41 : vector<8x16xf32>
    %cst_23 = arith.constant dense<0.000000e+00> : vector<8xf32>
    %57 = vector.multi_reduction <add>, %56, %cst_23 [1] : vector<8x16xf32> to vector<8xf32>
    %58 = vector.shape_cast %57 : vector<8xf32> to vector<8x1xf32>
    %cst_24 = arith.constant dense<0.000000e+00> : vector<8xf32>
    %59 = vector.multi_reduction <add>, %44, %cst_24 [1] : vector<8x16xf32> to vector<8xf32>
    %60 = vector.shape_cast %59 : vector<8xf32> to vector<8x1xf32>
    %61 = arith.addf %58, %60 : vector<8x1xf32>
    %cst_25 = arith.constant 2.500000e-01 : f32
    %62 = vector.broadcast %cst_25 : f32 to vector<8x1xf32>
    %63 = arith.mulf %62, %61 : vector<8x1xf32>
    %64 = arith.mulf %42, %42 : vector<8x16xf32>
    %cst_26 = arith.constant dense<0.000000e+00> : vector<8xf32>
    %65 = vector.multi_reduction <add>, %64, %cst_26 [1] : vector<8x16xf32> to vector<8xf32>
    %66 = vector.shape_cast %65 : vector<8xf32> to vector<8x1xf32>
    %cst_27 = arith.constant dense<0.000000e+00> : vector<8xf32>
    %67 = vector.multi_reduction <add>, %45, %cst_27 [1] : vector<8x16xf32> to vector<8xf32>
    %68 = vector.shape_cast %67 : vector<8xf32> to vector<8x1xf32>
    %69 = arith.addf %66, %68 : vector<8x1xf32>
    %cst_28 = arith.constant 2.500000e-01 : f32
    %70 = vector.broadcast %cst_28 : f32 to vector<8x1xf32>
    %71 = arith.mulf %70, %69 : vector<8x1xf32>
    %72 = tpu.transpose %71, [1, 0] : vector<8x1xf32> -> vector<1x8xf32>
    %73 = arith.subf %5, %72 : vector<1x8xf32>
    %74 = vector.broadcast %63 : vector<8x1xf32> to vector<8x8xf32>
    %75 = arith.subf %55, %74 : vector<8x8xf32>
    %76 = vector.broadcast %73 : vector<1x8xf32> to vector<8x8xf32>
    %77 = arith.addf %75, %76 : vector<8x8xf32>
    %cst_29 = arith.constant dense<0xFF800000> : vector<8xf32>
    %78 = vector.multi_reduction <maximumf>, %77, %cst_29 [1] : vector<8x8xf32> to vector<8xf32>
    %79 = vector.shape_cast %78 : vector<8xf32> to vector<8x1xf32>
    %80 = vector.broadcast %79 : vector<8x1xf32> to vector<8x8xf32>
    %81 = arith.subf %77, %80 : vector<8x8xf32>
    %82 = math.exp %81 : vector<8x8xf32>
    %cst_30 = arith.constant dense<0.000000e+00> : vector<8xf32>
    %83 = vector.multi_reduction <add>, %82, %cst_30 [1] : vector<8x8xf32> to vector<8xf32>
    %84 = vector.shape_cast %83 : vector<8xf32> to vector<8x1xf32>
    %85 = tpu.reciprocal %84 {approx = true} : vector<8x1xf32> -> vector<8x1xf32>
    %86 = vector.broadcast %85 : vector<8x1xf32> to vector<8x8xf32>
    %87 = arith.mulf %82, %86 : vector<8x8xf32>
    %c0_31 = arith.constant 0 : index
    %c0_32 = arith.constant 0 : index
    %c0_33 = arith.constant 0 : index
    %c0_34 = arith.constant 0 : index
    %88 = vector.load %arg18[%c0_31, %c0_32, %c0_33, %c0_34] : memref<1x2x8x8xf32, #tpu.memory_space<vmem>>, vector<1x1x8x8xf32>
    %89 = vector.shape_cast %88 : vector<1x1x8x8xf32> to vector<8x8xf32>
    %90 = vector.shape_cast %87 : vector<8x8xf32> to vector<1x1x8x8xf32>
    tpu.vector_store %arg18[%c0_31, %c0_32, %c0_33, %c0_34], %90 {strides = array<i32>} : memref<1x2x8x8xf32, #tpu.memory_space<vmem>>, vector<1x1x8x8xf32>,
    %91 = arith.truncf %87 : vector<8x8xf32> to vector<8x8xbf16>
    %92 = arith.truncf %43 : vector<8x16xf32> to vector<8x16xbf16>
    %cst_35 = arith.constant dense<0.000000e+00> : vector<8x16xf32>
    %93 = tpu.matmul %91, %92, %cst_35 {dimension_numbers = #tpu.dot_dimension_numbers<[1], [0], [0], [1], [0, 0, 1, 1], [], []>} : vector<8x8xbf16>, vector<8x16xbf16>, vector<8x16xf32> -> vector<8x16xf32>
    %94 = arith.mulf %87, %87 : vector<8x8xf32>
    %95 = arith.truncf %94 : vector<8x8xf32> to vector<8x8xbf16>
    %96 = arith.truncf %46 : vector<8x16xf32> to vector<8x16xbf16>
    %cst_36 = arith.constant dense<0.000000e+00> : vector<8x16xf32>
    %97 = tpu.matmul %95, %96, %cst_36 {dimension_numbers = #tpu.dot_dimension_numbers<[1], [0], [0], [1], [0, 0, 1, 1], [], []>} : vector<8x8xbf16>, vector<8x16xbf16>, vector<8x16xf32> -> vector<8x16xf32>
    %98 = vector.extract_strided_slice %31 {offsets = [0, 16], sizes = [8, 16], strides = [1, 1]} : vector<8x32xf32> to vector<8x16xf32>
    %99 = vector.extract_strided_slice %32 {offsets = [0, 16], sizes = [8, 16], strides = [1, 1]} : vector<8x32xf32> to vector<8x16xf32>
    %100 = vector.extract_strided_slice %33 {offsets = [0, 16], sizes = [8, 16], strides = [1, 1]} : vector<8x32xf32> to vector<8x16xf32>
    %101 = vector.extract_strided_slice %34 {offsets = [0, 16], sizes = [8, 16], strides = [1, 1]} : vector<8x32xf32> to vector<8x16xf32>
    %102 = vector.extract_strided_slice %35 {offsets = [0, 16], sizes = [8, 16], strides = [1, 1]} : vector<8x32xf32> to vector<8x16xf32>
    %103 = vector.extract_strided_slice %36 {offsets = [0, 16], sizes = [8, 16], strides = [1, 1]} : vector<8x32xf32> to vector<8x16xf32>
    %104 = vector.extract_strided_slice %40 {offsets = [0, 16], sizes = [8, 16], strides = [1, 1]} : vector<8x64xf32> to vector<8x16xf32>
    %105 = vector.extract_strided_slice %40 {offsets = [0, 48], sizes = [8, 16], strides = [1, 1]} : vector<8x64xf32> to vector<8x16xf32>
    %106 = tpu.concatenate %98, %104 in 1 : vector<8x16xf32>, vector<8x16xf32> -> vector<8x32xf32>
    %cst_37 = arith.constant 5.000000e-01 : f32
    %107 = vector.broadcast %cst_37 : f32 to vector<8x32xf32>
    %108 = arith.mulf %106, %107 : vector<8x32xf32>
    %109 = arith.truncf %108 : vector<8x32xf32> to vector<8x32xbf16>
    %110 = tpu.concatenate %99, %105 in 1 : vector<8x16xf32>, vector<8x16xf32> -> vector<8x32xf32>
    %111 = arith.truncf %110 : vector<8x32xf32> to vector<8x32xbf16>
    %cst_38 = arith.constant dense<0.000000e+00> : vector<8x8xf32>
    %112 = tpu.matmul %109, %111, %cst_38 {dimension_numbers = #tpu.dot_dimension_numbers<[1], [1], [0], [0], [0, 0, 1, 0], [], []>} : vector<8x32xbf16>, vector<8x32xbf16>, vector<8x8xf32> -> vector<8x8xf32>
    %113 = arith.mulf %98, %98 : vector<8x16xf32>
    %cst_39 = arith.constant dense<0.000000e+00> : vector<8xf32>
    %114 = vector.multi_reduction <add>, %113, %cst_39 [1] : vector<8x16xf32> to vector<8xf32>
    %115 = vector.shape_cast %114 : vector<8xf32> to vector<8x1xf32>
    %cst_40 = arith.constant dense<0.000000e+00> : vector<8xf32>
    %116 = vector.multi_reduction <add>, %101, %cst_40 [1] : vector<8x16xf32> to vector<8xf32>
    %117 = vector.shape_cast %116 : vector<8xf32> to vector<8x1xf32>
    %118 = arith.addf %115, %117 : vector<8x1xf32>
    %cst_41 = arith.constant 2.500000e-01 : f32
    %119 = vector.broadcast %cst_41 : f32 to vector<8x1xf32>
    %120 = arith.mulf %119, %118 : vector<8x1xf32>
    %121 = arith.mulf %99, %99 : vector<8x16xf32>
    %cst_42 = arith.constant dense<0.000000e+00> : vector<8xf32>
    %122 = vector.multi_reduction <add>, %121, %cst_42 [1] : vector<8x16xf32> to vector<8xf32>
    %123 = vector.shape_cast %122 : vector<8xf32> to vector<8x1xf32>
    %cst_43 = arith.constant dense<0.000000e+00> : vector<8xf32>
    %124 = vector.multi_reduction <add>, %102, %cst_43 [1] : vector<8x16xf32> to vector<8xf32>
    %125 = vector.shape_cast %124 : vector<8xf32> to vector<8x1xf32>
    %126 = arith.addf %123, %125 : vector<8x1xf32>
    %cst_44 = arith.constant 2.500000e-01 : f32
    %127 = vector.broadcast %cst_44 : f32 to vector<8x1xf32>
    %128 = arith.mulf %127, %126 : vector<8x1xf32>
    %129 = tpu.transpose %128, [1, 0] : vector<8x1xf32> -> vector<1x8xf32>
    %130 = arith.subf %5, %129 : vector<1x8xf32>
    %131 = vector.broadcast %120 : vector<8x1xf32> to vector<8x8xf32>
    %132 = arith.subf %112, %131 : vector<8x8xf32>
    %133 = vector.broadcast %130 : vector<1x8xf32> to vector<8x8xf32>
    %134 = arith.addf %132, %133 : vector<8x8xf32>
    %cst_45 = arith.constant dense<0xFF800000> : vector<8xf32>
    %135 = vector.multi_reduction <maximumf>, %134, %cst_45 [1] : vector<8x8xf32> to vector<8xf32>
    %136 = vector.shape_cast %135 : vector<8xf32> to vector<8x1xf32>
    %137 = vector.broadcast %136 : vector<8x1xf32> to vector<8x8xf32>
    %138 = arith.subf %134, %137 : vector<8x8xf32>
    %139 = math.exp %138 : vector<8x8xf32>
    %cst_46 = arith.constant dense<0.000000e+00> : vector<8xf32>
    %140 = vector.multi_reduction <add>, %139, %cst_46 [1] : vector<8x8xf32> to vector<8xf32>
    %141 = vector.shape_cast %140 : vector<8xf32> to vector<8x1xf32>
    %142 = tpu.reciprocal %141 {approx = true} : vector<8x1xf32> -> vector<8x1xf32>
    %143 = vector.broadcast %142 : vector<8x1xf32> to vector<8x8xf32>
    %144 = arith.mulf %139, %143 : vector<8x8xf32>
    %c0_47 = arith.constant 0 : index
    %c1_48 = arith.constant 1 : index
    %c0_49 = arith.constant 0 : index
    %c0_50 = arith.constant 0 : index
    %145 = vector.load %arg18[%c0_47, %c1_48, %c0_49, %c0_50] : memref<1x2x8x8xf32, #tpu.memory_space<vmem>>, vector<1x1x8x8xf32>
    %146 = vector.shape_cast %145 : vector<1x1x8x8xf32> to vector<8x8xf32>
    %147 = vector.shape_cast %144 : vector<8x8xf32> to vector<1x1x8x8xf32>
    tpu.vector_store %arg18[%c0_47, %c1_48, %c0_49, %c0_50], %147 {strides = array<i32>} : memref<1x2x8x8xf32, #tpu.memory_space<vmem>>, vector<1x1x8x8xf32>,
    %148 = arith.truncf %144 : vector<8x8xf32> to vector<8x8xbf16>
    %149 = arith.truncf %100 : vector<8x16xf32> to vector<8x16xbf16>
    %cst_51 = arith.constant dense<0.000000e+00> : vector<8x16xf32>
    %150 = tpu.matmul %148, %149, %cst_51 {dimension_numbers = #tpu.dot_dimension_numbers<[1], [0], [0], [1], [0, 0, 1, 1], [], []>} : vector<8x8xbf16>, vector<8x16xbf16>, vector<8x16xf32> -> vector<8x16xf32>
    %151 = arith.mulf %144, %144 : vector<8x8xf32>
    %152 = arith.truncf %151 : vector<8x8xf32> to vector<8x8xbf16>
    %153 = arith.truncf %103 : vector<8x16xf32> to vector<8x16xbf16>
    %cst_52 = arith.constant dense<0.000000e+00> : vector<8x16xf32>
    %154 = tpu.matmul %152, %153, %cst_52 {dimension_numbers = #tpu.dot_dimension_numbers<[1], [0], [0], [1], [0, 0, 1, 1], [], []>} : vector<8x8xbf16>, vector<8x16xbf16>, vector<8x16xf32> -> vector<8x16xf32>
    %155 = tpu.concatenate %93, %150 in 1 : vector<8x16xf32>, vector<8x16xf32> -> vector<8x32xf32>
    %156 = tpu.concatenate %97, %154 in 1 : vector<8x16xf32>, vector<8x16xf32> -> vector<8x32xf32>
    %c0_53 = arith.constant 0 : index
    %c0_54 = arith.constant 0 : index
    %157 = vector.load %arg7[%c0_53, %c0_54] : memref<2x32xf32, #tpu.memory_space<vmem>>, vector<2x32xf32>
    %c0_55 = arith.constant 0 : index
    %c0_56 = arith.constant 0 : index
    %c0_57 = arith.constant 0 : index
    %158 = vector.load %arg6[%c0_55, %c0_56, %c0_57] : memref<2x32x32xbf16, #tpu.memory_space<vmem>>, vector<1x32x32xbf16>
    %159 = vector.shape_cast %158 : vector<1x32x32xbf16> to vector<32x32xbf16>
    %160 = arith.truncf %155 : vector<8x32xf32> to vector<8x32xbf16>
    %cst_58 = arith.constant dense<0.000000e+00> : vector<8x32xf32>
    %161 = tpu.matmul %160, %159, %cst_58 {dimension_numbers = #tpu.dot_dimension_numbers<[1], [0], [0], [1], [0, 0, 1, 1], [], []>} : vector<8x32xbf16>, vector<32x32xbf16>, vector<8x32xf32> -> vector<8x32xf32>
    %162 = vector.extract_strided_slice %157 {offsets = [0, 0], sizes = [1, 32], strides = [1, 1]} : vector<2x32xf32> to vector<1x32xf32>
    %163 = vector.broadcast %162 : vector<1x32xf32> to vector<8x32xf32>
    %164 = arith.addf %161, %163 : vector<8x32xf32>
    %c1_59 = arith.constant 1 : index
    %c0_60 = arith.constant 0 : index
    %c0_61 = arith.constant 0 : index
    %165 = vector.load %arg6[%c1_59, %c0_60, %c0_61] : memref<2x32x32xbf16, #tpu.memory_space<vmem>>, vector<1x32x32xbf16>
    %166 = vector.shape_cast %165 : vector<1x32x32xbf16> to vector<32x32xbf16>
    %167 = arith.truncf %156 : vector<8x32xf32> to vector<8x32xbf16>
    %cst_62 = arith.constant dense<0.000000e+00> : vector<8x32xf32>
    %168 = tpu.matmul %167, %166, %cst_62 {dimension_numbers = #tpu.dot_dimension_numbers<[1], [0], [0], [1], [0, 0, 1, 1], [], []>} : vector<8x32xbf16>, vector<32x32xbf16>, vector<8x32xf32> -> vector<8x32xf32>
    %169 = vector.extract_strided_slice %157 {offsets = [1, 0], sizes = [1, 32], strides = [1, 1]} : vector<2x32xf32> to vector<1x32xf32>
    %170 = vector.broadcast %169 : vector<1x32xf32> to vector<8x32xf32>
    %171 = arith.addf %168, %170 : vector<8x32xf32>
    %c0_63 = arith.constant 0 : index
    %c0_64 = arith.constant 0 : index
    %172 = vector.load %arg8[%c0_63, %c0_64] : memref<1x32xf32, #tpu.memory_space<vmem>>, vector<1x32xf32>
    %c0_65 = arith.constant 0 : index
    %c0_66 = arith.constant 0 : index
    %173 = vector.load %arg9[%c0_65, %c0_66] : memref<1x32xf32, #tpu.memory_space<vmem>>, vector<1x32xf32>
    %174 = arith.addf %164, %1 : vector<8x32xf32>
    %cst_67 = arith.constant dense<0.000000e+00> : vector<8xf32>
    %175 = vector.multi_reduction <add>, %174, %cst_67 [1] : vector<8x32xf32> to vector<8xf32>
    %176 = vector.shape_cast %175 : vector<8xf32> to vector<8x1xf32>
    %cst_68 = arith.constant 3.200000e+01 : f32
    %177 = vector.broadcast %cst_68 : f32 to vector<8x1xf32>
    %178 = arith.divf %176, %177 : vector<8x1xf32>
    %179 = vector.broadcast %178 : vector<8x1xf32> to vector<8x32xf32>
    %180 = arith.subf %174, %179 : vector<8x32xf32>
    %181 = arith.mulf %180, %180 : vector<8x32xf32>
    %cst_69 = arith.constant dense<0.000000e+00> : vector<8xf32>
    %182 = vector.multi_reduction <add>, %181, %cst_69 [1] : vector<8x32xf32> to vector<8xf32>
    %183 = vector.shape_cast %182 : vector<8xf32> to vector<8x1xf32>
    %cst_70 = arith.constant 3.200000e+01 : f32
    %184 = vector.broadcast %cst_70 : f32 to vector<8x1xf32>
    %185 = arith.divf %183, %184 : vector<8x1xf32>
    %186 = vector.broadcast %178 : vector<8x1xf32> to vector<8x32xf32>
    %187 = arith.subf %174, %186 : vector<8x32xf32>
    %cst_71 = arith.constant 9.99999996E-13 : f32
    %188 = vector.broadcast %cst_71 : f32 to vector<8x1xf32>
    %189 = arith.addf %185, %188 : vector<8x1xf32>
    %190 = math.sqrt %189 : vector<8x1xf32>
    %191 = vector.broadcast %190 : vector<8x1xf32> to vector<8x32xf32>
    %192 = arith.divf %187, %191 : vector<8x32xf32>
    %193 = vector.broadcast %172 : vector<1x32xf32> to vector<8x32xf32>
    %194 = arith.mulf %193, %192 : vector<8x32xf32>
    %195 = vector.broadcast %173 : vector<1x32xf32> to vector<8x32xf32>
    %196 = arith.addf %194, %195 : vector<8x32xf32>
    %197 = arith.addf %171, %3 : vector<8x32xf32>
    %cst_72 = arith.constant dense<0.000000e+00> : vector<8xf32>
    %198 = vector.multi_reduction <add>, %197, %cst_72 [1] : vector<8x32xf32> to vector<8xf32>
    %199 = vector.shape_cast %198 : vector<8xf32> to vector<8x1xf32>
    %cst_73 = arith.constant 3.200000e+01 : f32
    %200 = vector.broadcast %cst_73 : f32 to vector<8x1xf32>
    %201 = arith.divf %199, %200 : vector<8x1xf32>
    %202 = vector.broadcast %201 : vector<8x1xf32> to vector<8x32xf32>
    %203 = arith.subf %197, %202 : vector<8x32xf32>
    %204 = arith.mulf %203, %203 : vector<8x32xf32>
    %cst_74 = arith.constant dense<0.000000e+00> : vector<8xf32>
    %205 = vector.multi_reduction <add>, %204, %cst_74 [1] : vector<8x32xf32> to vector<8xf32>
    %206 = vector.shape_cast %205 : vector<8xf32> to vector<8x1xf32>
    %cst_75 = arith.constant 3.200000e+01 : f32
    %207 = vector.broadcast %cst_75 : f32 to vector<8x1xf32>
    %208 = arith.divf %206, %207 : vector<8x1xf32>
    %209 = vector.broadcast %201 : vector<8x1xf32> to vector<8x32xf32>
    %210 = arith.subf %197, %209 : vector<8x32xf32>
    %cst_76 = arith.constant 9.99999996E-13 : f32
    %211 = vector.broadcast %cst_76 : f32 to vector<8x1xf32>
    %212 = arith.addf %208, %211 : vector<8x1xf32>
    %213 = math.sqrt %212 : vector<8x1xf32>
    %214 = vector.broadcast %213 : vector<8x1xf32> to vector<8x32xf32>
    %215 = arith.divf %210, %214 : vector<8x32xf32>
    %216 = vector.broadcast %172 : vector<1x32xf32> to vector<8x32xf32>
    %217 = arith.mulf %216, %215 : vector<8x32xf32>
    %218 = vector.broadcast %173 : vector<1x32xf32> to vector<8x32xf32>
    %219 = arith.addf %217, %218 : vector<8x32xf32>
    %c0_77 = arith.constant 0 : index
    %c0_78 = arith.constant 0 : index
    %220 = vector.load %arg11[%c0_77, %c0_78] : memref<2x128xf32, #tpu.memory_space<vmem>>, vector<2x128xf32>
    %c0_79 = arith.constant 0 : index
    %c0_80 = arith.constant 0 : index
    %221 = vector.load %arg13[%c0_79, %c0_80] : memref<2x32xf32, #tpu.memory_space<vmem>>, vector<2x32xf32>
    %c0_81 = arith.constant 0 : index
    %c0_82 = arith.constant 0 : index
    %222 = vector.load %arg14[%c0_81, %c0_82] : memref<2x32xf32, #tpu.memory_space<vmem>>, vector<2x32xf32>
    %c0_83 = arith.constant 0 : index
    %c0_84 = arith.constant 0 : index
    %223 = vector.load %arg15[%c0_83, %c0_84] : memref<2x32xf32, #tpu.memory_space<vmem>>, vector<2x32xf32>
    %c0_85 = arith.constant 0 : index
    %c0_86 = arith.constant 0 : index
    %c0_87 = arith.constant 0 : index
    %224 = vector.load %arg10[%c0_85, %c0_86, %c0_87] : memref<2x32x128xbf16, #tpu.memory_space<vmem>>, vector<1x32x128xbf16>
    %225 = vector.shape_cast %224 : vector<1x32x128xbf16> to vector<32x128xbf16>
    %226 = arith.truncf %196 : vector<8x32xf32> to vector<8x32xbf16>
    %cst_88 = arith.constant dense<0.000000e+00> : vector<8x128xf32>
    %227 = tpu.matmul %226, %225, %cst_88 {dimension_numbers = #tpu.dot_dimension_numbers<[1], [0], [0], [1], [0, 0, 1, 1], [], []>} : vector<8x32xbf16>, vector<32x128xbf16>, vector<8x128xf32> -> vector<8x128xf32>
    %228 = vector.extract_strided_slice %220 {offsets = [0, 0], sizes = [1, 128], strides = [1, 1]} : vector<2x128xf32> to vector<1x128xf32>
    %229 = vector.broadcast %228 : vector<1x128xf32> to vector<8x128xf32>
    %230 = arith.addf %227, %229 : vector<8x128xf32>
    %cst_89 = arith.constant 0.000000e+00 : f32
    %231 = vector.broadcast %cst_89 : f32 to vector<8x128xf32>
    %232 = arith.cmpf ogt, %230, %231 : vector<8x128xf32>
    %cst_90 = arith.constant 0.000000e+00 : f32
    %233 = vector.broadcast %cst_90 : f32 to vector<8x128xf32>
    %234 = arith.minimumf %230, %233 : vector<8x128xf32>
    %235 = math.exp %234 : vector<8x128xf32>
    %cst_91 = arith.constant 1.000000e+00 : f32
    %236 = vector.broadcast %cst_91 : f32 to vector<8x128xf32>
    %237 = arith.subf %235, %236 : vector<8x128xf32>
    %238 = arith.select %232, %230, %237 : vector<8x128xi1>, vector<8x128xf32>
    %c0_92 = arith.constant 0 : index
    %c0_93 = arith.constant 0 : index
    %c0_94 = arith.constant 0 : index
    %239 = vector.load %arg12[%c0_92, %c0_93, %c0_94] : memref<2x128x32xbf16, #tpu.memory_space<vmem>>, vector<1x128x32xbf16>
    %240 = vector.shape_cast %239 : vector<1x128x32xbf16> to vector<128x32xbf16>
    %241 = arith.truncf %238 : vector<8x128xf32> to vector<8x128xbf16>
    %cst_95 = arith.constant dense<0.000000e+00> : vector<8x32xf32>
    %242 = tpu.matmul %241, %240, %cst_95 {dimension_numbers = #tpu.dot_dimension_numbers<[1], [0], [0], [1], [0, 0, 1, 1], [], []>} : vector<8x128xbf16>, vector<128x32xbf16>, vector<8x32xf32> -> vector<8x32xf32>
    %243 = vector.extract_strided_slice %221 {offsets = [0, 0], sizes = [1, 32], strides = [1, 1]} : vector<2x32xf32> to vector<1x32xf32>
    %244 = vector.broadcast %243 : vector<1x32xf32> to vector<8x32xf32>
    %245 = arith.addf %242, %244 : vector<8x32xf32>
    %246 = arith.addf %245, %196 : vector<8x32xf32>
    %247 = vector.extract_strided_slice %222 {offsets = [0, 0], sizes = [1, 32], strides = [1, 1]} : vector<2x32xf32> to vector<1x32xf32>
    %248 = vector.extract_strided_slice %223 {offsets = [0, 0], sizes = [1, 32], strides = [1, 1]} : vector<2x32xf32> to vector<1x32xf32>
    %cst_96 = arith.constant dense<0.000000e+00> : vector<8xf32>
    %249 = vector.multi_reduction <add>, %246, %cst_96 [1] : vector<8x32xf32> to vector<8xf32>
    %250 = vector.shape_cast %249 : vector<8xf32> to vector<8x1xf32>
    %cst_97 = arith.constant 3.200000e+01 : f32
    %251 = vector.broadcast %cst_97 : f32 to vector<8x1xf32>
    %252 = arith.divf %250, %251 : vector<8x1xf32>
    %253 = vector.broadcast %252 : vector<8x1xf32> to vector<8x32xf32>
    %254 = arith.subf %246, %253 : vector<8x32xf32>
    %255 = arith.mulf %254, %254 : vector<8x32xf32>
    %cst_98 = arith.constant dense<0.000000e+00> : vector<8xf32>
    %256 = vector.multi_reduction <add>, %255, %cst_98 [1] : vector<8x32xf32> to vector<8xf32>
    %257 = vector.shape_cast %256 : vector<8xf32> to vector<8x1xf32>
    %cst_99 = arith.constant 3.200000e+01 : f32
    %258 = vector.broadcast %cst_99 : f32 to vector<8x1xf32>
    %259 = arith.divf %257, %258 : vector<8x1xf32>
    %260 = vector.broadcast %252 : vector<8x1xf32> to vector<8x32xf32>
    %261 = arith.subf %246, %260 : vector<8x32xf32>
    %cst_100 = arith.constant 9.99999996E-13 : f32
    %262 = vector.broadcast %cst_100 : f32 to vector<8x1xf32>
    %263 = arith.addf %259, %262 : vector<8x1xf32>
    %264 = math.sqrt %263 : vector<8x1xf32>
    %265 = vector.broadcast %264 : vector<8x1xf32> to vector<8x32xf32>
    %266 = arith.divf %261, %265 : vector<8x32xf32>
    %267 = vector.broadcast %247 : vector<1x32xf32> to vector<8x32xf32>
    %268 = arith.mulf %267, %266 : vector<8x32xf32>
    %269 = vector.broadcast %248 : vector<1x32xf32> to vector<8x32xf32>
    %270 = arith.addf %268, %269 : vector<8x32xf32>
    %c0_101 = arith.constant 0 : index
    %c0_102 = arith.constant 0 : index
    %c0_103 = arith.constant 0 : index
    %271 = vector.load %arg16[%c0_101, %c0_102, %c0_103] : memref<1x8x32xf32, #tpu.memory_space<vmem>>, vector<1x8x32xf32>
    %272 = vector.shape_cast %271 : vector<1x8x32xf32> to vector<8x32xf32>
    %273 = vector.shape_cast %270 : vector<8x32xf32> to vector<1x8x32xf32>
    tpu.vector_store %arg16[%c0_101, %c0_102, %c0_103], %273 {strides = array<i32>} : memref<1x8x32xf32, #tpu.memory_space<vmem>>, vector<1x8x32xf32>,
    %c1_104 = arith.constant 1 : index
    %c0_105 = arith.constant 0 : index
    %c0_106 = arith.constant 0 : index
    %274 = vector.load %arg10[%c1_104, %c0_105, %c0_106] : memref<2x32x128xbf16, #tpu.memory_space<vmem>>, vector<1x32x128xbf16>
    %275 = vector.shape_cast %274 : vector<1x32x128xbf16> to vector<32x128xbf16>
    %276 = arith.truncf %219 : vector<8x32xf32> to vector<8x32xbf16>
    %cst_107 = arith.constant dense<0.000000e+00> : vector<8x128xf32>
    %277 = tpu.matmul %276, %275, %cst_107 {dimension_numbers = #tpu.dot_dimension_numbers<[1], [0], [0], [1], [0, 0, 1, 1], [], []>} : vector<8x32xbf16>, vector<32x128xbf16>, vector<8x128xf32> -> vector<8x128xf32>
    %278 = vector.extract_strided_slice %220 {offsets = [1, 0], sizes = [1, 128], strides = [1, 1]} : vector<2x128xf32> to vector<1x128xf32>
    %279 = vector.broadcast %278 : vector<1x128xf32> to vector<8x128xf32>
    %280 = arith.addf %277, %279 : vector<8x128xf32>
    %cst_108 = arith.constant 0.000000e+00 : f32
    %281 = vector.broadcast %cst_108 : f32 to vector<8x128xf32>
    %282 = arith.cmpf ogt, %280, %281 : vector<8x128xf32>
    %cst_109 = arith.constant 0.000000e+00 : f32
    %283 = vector.broadcast %cst_109 : f32 to vector<8x128xf32>
    %284 = arith.minimumf %280, %283 : vector<8x128xf32>
    %285 = math.exp %284 : vector<8x128xf32>
    %cst_110 = arith.constant 1.000000e+00 : f32
    %286 = vector.broadcast %cst_110 : f32 to vector<8x128xf32>
    %287 = arith.subf %285, %286 : vector<8x128xf32>
    %288 = arith.select %282, %280, %287 : vector<8x128xi1>, vector<8x128xf32>
    %c1_111 = arith.constant 1 : index
    %c0_112 = arith.constant 0 : index
    %c0_113 = arith.constant 0 : index
    %289 = vector.load %arg12[%c1_111, %c0_112, %c0_113] : memref<2x128x32xbf16, #tpu.memory_space<vmem>>, vector<1x128x32xbf16>
    %290 = vector.shape_cast %289 : vector<1x128x32xbf16> to vector<128x32xbf16>
    %291 = arith.truncf %288 : vector<8x128xf32> to vector<8x128xbf16>
    %cst_114 = arith.constant dense<0.000000e+00> : vector<8x32xf32>
    %292 = tpu.matmul %291, %290, %cst_114 {dimension_numbers = #tpu.dot_dimension_numbers<[1], [0], [0], [1], [0, 0, 1, 1], [], []>} : vector<8x128xbf16>, vector<128x32xbf16>, vector<8x32xf32> -> vector<8x32xf32>
    %293 = vector.extract_strided_slice %221 {offsets = [1, 0], sizes = [1, 32], strides = [1, 1]} : vector<2x32xf32> to vector<1x32xf32>
    %294 = vector.broadcast %293 : vector<1x32xf32> to vector<8x32xf32>
    %295 = arith.addf %292, %294 : vector<8x32xf32>
    %296 = arith.addf %295, %219 : vector<8x32xf32>
    %297 = vector.extract_strided_slice %222 {offsets = [1, 0], sizes = [1, 32], strides = [1, 1]} : vector<2x32xf32> to vector<1x32xf32>
    %298 = vector.extract_strided_slice %223 {offsets = [1, 0], sizes = [1, 32], strides = [1, 1]} : vector<2x32xf32> to vector<1x32xf32>
    %cst_115 = arith.constant dense<0.000000e+00> : vector<8xf32>
    %299 = vector.multi_reduction <add>, %296, %cst_115 [1] : vector<8x32xf32> to vector<8xf32>
    %300 = vector.shape_cast %299 : vector<8xf32> to vector<8x1xf32>
    %cst_116 = arith.constant 3.200000e+01 : f32
    %301 = vector.broadcast %cst_116 : f32 to vector<8x1xf32>
    %302 = arith.divf %300, %301 : vector<8x1xf32>
    %303 = vector.broadcast %302 : vector<8x1xf32> to vector<8x32xf32>
    %304 = arith.subf %296, %303 : vector<8x32xf32>
    %305 = arith.mulf %304, %304 : vector<8x32xf32>
    %cst_117 = arith.constant dense<0.000000e+00> : vector<8xf32>
    %306 = vector.multi_reduction <add>, %305, %cst_117 [1] : vector<8x32xf32> to vector<8xf32>
    %307 = vector.shape_cast %306 : vector<8xf32> to vector<8x1xf32>
    %cst_118 = arith.constant 3.200000e+01 : f32
    %308 = vector.broadcast %cst_118 : f32 to vector<8x1xf32>
    %309 = arith.divf %307, %308 : vector<8x1xf32>
    %310 = vector.broadcast %302 : vector<8x1xf32> to vector<8x32xf32>
    %311 = arith.subf %296, %310 : vector<8x32xf32>
    %cst_119 = arith.constant 9.99999996E-13 : f32
    %312 = vector.broadcast %cst_119 : f32 to vector<8x1xf32>
    %313 = arith.addf %309, %312 : vector<8x1xf32>
    %314 = math.sqrt %313 : vector<8x1xf32>
    %315 = vector.broadcast %314 : vector<8x1xf32> to vector<8x32xf32>
    %316 = arith.divf %311, %315 : vector<8x32xf32>
    %317 = vector.broadcast %297 : vector<1x32xf32> to vector<8x32xf32>
    %318 = arith.mulf %317, %316 : vector<8x32xf32>
    %319 = vector.broadcast %298 : vector<1x32xf32> to vector<8x32xf32>
    %320 = arith.addf %318, %319 : vector<8x32xf32>
    %cst_120 = arith.constant 0.000000e+00 : f32
    %321 = vector.broadcast %cst_120 : f32 to vector<8x32xf32>
    %322 = arith.cmpf ogt, %320, %321 : vector<8x32xf32>
    %cst_121 = arith.constant 0.000000e+00 : f32
    %323 = vector.broadcast %cst_121 : f32 to vector<8x32xf32>
    %324 = arith.minimumf %320, %323 : vector<8x32xf32>
    %325 = math.exp %324 : vector<8x32xf32>
    %cst_122 = arith.constant 1.000000e+00 : f32
    %326 = vector.broadcast %cst_122 : f32 to vector<8x32xf32>
    %327 = arith.subf %325, %326 : vector<8x32xf32>
    %328 = arith.select %322, %320, %327 : vector<8x32xi1>, vector<8x32xf32>
    %cst_123 = arith.constant 1.000000e+00 : f32
    %329 = vector.broadcast %cst_123 : f32 to vector<8x32xf32>
    %330 = arith.addf %328, %329 : vector<8x32xf32>
    %c0_124 = arith.constant 0 : index
    %c0_125 = arith.constant 0 : index
    %c0_126 = arith.constant 0 : index
    %331 = vector.load %arg17[%c0_124, %c0_125, %c0_126] : memref<1x8x32xf32, #tpu.memory_space<vmem>>, vector<1x8x32xf32>
    %332 = vector.shape_cast %331 : vector<1x8x32xf32> to vector<8x32xf32>
    %333 = vector.shape_cast %330 : vector<8x32xf32> to vector<1x8x32xf32>
    tpu.vector_store %arg17[%c0_124, %c0_125, %c0_126], %333 {strides = array<i32>} : memref<1x8x32xf32, #tpu.memory_space<vmem>>, vector<1x8x32xf32>,
    return
  }
  func.func @transform_0(%arg0: i32) -> (i32, i32, i32) {
    %c0_i32 = arith.constant 0 : i32
    %c0_i32_0 = arith.constant 0 : i32
    %c0_i32_1 = arith.constant 0 : i32
    return %arg0, %c0_i32, %c0_i32_0 : i32, i32, i32
  }
  func.func @transform_1(%arg0: i32) -> (i32, i32, i32) {
    %c0_i32 = arith.constant 0 : i32
    %c0_i32_0 = arith.constant 0 : i32
    %c0_i32_1 = arith.constant 0 : i32
    return %arg0, %c0_i32, %c0_i32_0 : i32, i32, i32
  }
  func.func @transform_2(%arg0: i32) -> (i32, i32, i32) {
    %c0_i32 = arith.constant 0 : i32
    %c0_i32_0 = arith.constant 0 : i32
    %c0_i32_1 = arith.constant 0 : i32
    return %arg0, %c0_i32, %c0_i32_0 : i32, i32, i32
  }
  func.func @transform_3(%arg0: i32) -> (i32, i32, i32) {
    %c0_i32 = arith.constant 0 : i32
    %c0_i32_0 = arith.constant 0 : i32
    %c0_i32_1 = arith.constant 0 : i32
    %c0_i32_2 = arith.constant 0 : i32
    return %c0_i32, %c0_i32_0, %c0_i32_1 : i32, i32, i32
  }
  func.func @transform_4(%arg0: i32) -> (i32, i32) {
    %c0_i32 = arith.constant 0 : i32
    %c0_i32_0 = arith.constant 0 : i32
    %c0_i32_1 = arith.constant 0 : i32
    return %c0_i32, %c0_i32_0 : i32, i32
  }
  func.func @transform_5(%arg0: i32) -> (i32, i32, i32) {
    %c0_i32 = arith.constant 0 : i32
    %c0_i32_0 = arith.constant 0 : i32
    %c0_i32_1 = arith.constant 0 : i32
    %c0_i32_2 = arith.constant 0 : i32
    return %c0_i32, %c0_i32_0, %c0_i32_1 : i32, i32, i32
  }
  func.func @transform_6(%arg0: i32) -> (i32, i32) {
    %c0_i32 = arith.constant 0 : i32
    %c0_i32_0 = arith.constant 0 : i32
    %c0_i32_1 = arith.constant 0 : i32
    return %c0_i32, %c0_i32_0 : i32, i32
  }
  func.func @transform_7(%arg0: i32) -> (i32, i32) {
    %c0_i32 = arith.constant 0 : i32
    %c0_i32_0 = arith.constant 0 : i32
    %c0_i32_1 = arith.constant 0 : i32
    return %c0_i32, %c0_i32_0 : i32, i32
  }
  func.func @transform_8(%arg0: i32) -> (i32, i32) {
    %c0_i32 = arith.constant 0 : i32
    %c0_i32_0 = arith.constant 0 : i32
    %c0_i32_1 = arith.constant 0 : i32
    return %c0_i32, %c0_i32_0 : i32, i32
  }
  func.func @transform_9(%arg0: i32) -> (i32, i32, i32) {
    %c0_i32 = arith.constant 0 : i32
    %c0_i32_0 = arith.constant 0 : i32
    %c0_i32_1 = arith.constant 0 : i32
    %c0_i32_2 = arith.constant 0 : i32
    return %c0_i32, %c0_i32_0, %c0_i32_1 : i32, i32, i32
  }
  func.func @transform_10(%arg0: i32) -> (i32, i32) {
    %c0_i32 = arith.constant 0 : i32
    %c0_i32_0 = arith.constant 0 : i32
    %c0_i32_1 = arith.constant 0 : i32
    return %c0_i32, %c0_i32_0 : i32, i32
  }
  func.func @transform_11(%arg0: i32) -> (i32, i32, i32) {
    %c0_i32 = arith.constant 0 : i32
    %c0_i32_0 = arith.constant 0 : i32
    %c0_i32_1 = arith.constant 0 : i32
    %c0_i32_2 = arith.constant 0 : i32
    return %c0_i32, %c0_i32_0, %c0_i32_1 : i32, i32, i32
  }
  func.func @transform_12(%arg0: i32) -> (i32, i32) {
    %c0_i32 = arith.constant 0 : i32
    %c0_i32_0 = arith.constant 0 : i32
    %c0_i32_1 = arith.constant 0 : i32
    return %c0_i32, %c0_i32_0 : i32, i32
  }
  func.func @transform_13(%arg0: i32) -> (i32, i32) {
    %c0_i32 = arith.constant 0 : i32
    %c0_i32_0 = arith.constant 0 : i32
    %c0_i32_1 = arith.constant 0 : i32
    return %c0_i32, %c0_i32_0 : i32, i32
  }
  func.func @transform_14(%arg0: i32) -> (i32, i32) {
    %c0_i32 = arith.constant 0 : i32
    %c0_i32_0 = arith.constant 0 : i32
    %c0_i32_1 = arith.constant 0 : i32
    return %c0_i32, %c0_i32_0 : i32, i32
  }
  func.func @transform_15(%arg0: i32) -> (i32, i32, i32) {
    %c0_i32 = arith.constant 0 : i32
    %c0_i32_0 = arith.constant 0 : i32
    %c0_i32_1 = arith.constant 0 : i32
    return %arg0, %c0_i32, %c0_i32_0 : i32, i32, i32
  }
  func.func @transform_16(%arg0: i32) -> (i32, i32, i32) {
    %c0_i32 = arith.constant 0 : i32
    %c0_i32_0 = arith.constant 0 : i32
    %c0_i32_1 = arith.constant 0 : i32
    return %arg0, %c0_i32, %c0_i32_0 : i32, i32, i32
  }
  func.func @transform_17(%arg0: i32) -> (i32, i32, i32, i32) {
    %c0_i32 = arith.constant 0 : i32
    %c0_i32_0 = arith.constant 0 : i32
    %c0_i32_1 = arith.constant 0 : i32
    %c0_i32_2 = arith.constant 0 : i32
    return %arg0, %c0_i32, %c0_i32_0, %c0_i32_1 : i32, i32, i32, i32
  }
}

</mosaic_0001>

<bundles_post_ra>
// kernel: tpu_custom_call.1
= control target key start
LH: loop header
LB: loop body
LE: loop exit
PB: predicated region body
PF: predicated region fallthrough
CT: control target
= control target key end

     0   :  { %s3181_s0 = inlined_call_operand.vmem [shape: f32[2,8,32], index: 0, kind: input, shape index: {}]   ;;  %s3182_s1 = inlined_call_operand.vmem [shape: f32[2,8,32], index: 1, kind: input, shape index: {}]   ;;  %s3183_s2 = inlined_call_operand.vmem [shape: f32[2,1,8], index: 2, kind: input, shape index: {}]   ;;  %s3184_s3 = inlined_call_operand.vmem [shape: bf16[2,32,96], index: 3, kind: input, shape index: {}]   ;;  %s3185_s4 = inlined_call_operand.vmem [shape: f32[2,96], index: 4, kind: input, shape index: {}]   ;;  %s3186_s5 = inlined_call_operand.vmem [shape: bf16[2,32,32], index: 5, kind: input, shape index: {}]   ;;  %s3187_s6 = inlined_call_operand.vmem [shape: f32[2,32], index: 6, kind: input, shape index: {}]   ;;  %s3188_s7 = inlined_call_operand.vmem [shape: f32[1,32], index: 7, kind: input, shape index: {}]   ;;  %s3189_s8 = inlined_call_operand.vmem [shape: f32[1,32], index: 8, kind: input, shape index: {}]   ;;  %s3190_s9 = inlined_call_operand.vmem [shape: bf16[2,32,128], index: 9, kind: input, shape index: {}]   ;;  %s3191_s10 = inlined_call_operand.vmem [shape: f32[2,128], index: 10, kind: input, shape index: {}]   ;;  %s3192_s11 = inlined_call_operand.vmem [shape: bf16[2,128,32], index: 11, kind: input, shape index: {}]   ;;  %s3193_s12 = inlined_call_operand.vmem [shape: f32[2,32], index: 12, kind: input, shape index: {}]   ;;  %s3194_s13 = inlined_call_operand.vmem [shape: f32[2,32], index: 13, kind: input, shape index: {}]   ;;  %s3195_s14 = inlined_call_operand.vmem [shape: f32[2,32], index: 14, kind: input, shape index: {}]   ;;  %s3196_s15 = inlined_call_operand.hbm [shape: f32[2,8,32], index: 15, kind: output, shape index: {0}]   ;;  %s3197_s16 = inlined_call_operand.hbm [shape: f32[2,8,32], index: 16, kind: output, shape index: {1}]   ;;  %s3198_s17 = inlined_call_operand.hbm [shape: f32[2,2,8,8], index: 17, kind: output, shape index: {2}]  }
   0x1   :  { %3209 = sst [smem:[#allocation15_spill]] %s3181_s0 }
   0x2   :  { %3210 = sst [smem:[#allocation16_spill]] %s3182_s1 }
   0x3   :  { %3211 = sst [smem:[#allocation17_spill]] %s3183_s2 }
   0x4   :  { %3212 = sst [smem:[#allocation18_spill]] %s3184_s3 }
   0x5   :  { %3213 = sst [smem:[#allocation19_spill]] %s3185_s4 }
   0x6   :  { %23 = vsyncpa [#allocation3], 0 }
   0x7   :  { %25 = vsyncpa [#allocation3 + $0x1], 0 }
   0x8   :  { %26 = vsyncpa [#allocation5], 0 }
   0x9   :  { %28 = vsyncpa [#allocation5 + $0x1], 0  ;;  %s2674_s24 = smov 0   ;;  %s2676_s25 = smov 0  }
   0xa   :  { %s2678_s26 = smov 0   ;;  %s2680_s27 = smov 0  }
   0xb LB: > { %3214 = sst [smem:[#allocation9_spill]] %s2557_s24  ;;  %s2695_s28 = sadd.s32 4294967295, %s2569_s27   ;;  %s2569_s27 = sphi %s2680_s27, %s3233_s27   ;;  %s2565_s26 = sphi %s2678_s26, %s3235_s26   ;;  %s2561_s25 = sphi %s2676_s25, %s3237_s25   ;;  %s2557_s24 = sphi %s2674_s24, %s3236_s24  }
   0xc   : > { %3215 = sst [smem:[#allocation10_spill]] %s2565_s26  ;;  %s3199_s29 = sadd.s32 4294967294, %s2569_s27  }
   0xd   : > { %3216 = sst [smem:[#allocation11_spill]] %s2569_s27  ;;  %s2699_s0 = sadd.s32 1, %s2569_s27  }
   0xe   : > { %3217 = sst [smem:[#allocation12_spill]] %s2699_s0  ;;  %s371_s30 = sadd.s32 1, %s2565_s26 }
   0xf   : > { %s368_s18 = ssub.s32 %s2569_s27, %s2699_s0  ;;  %p381_p0 = scmp.ne.s32.totalorder %s2565_s26, %s2561_s25 }
  0x10   : > { %p369_p1 = scmp.eq.s32.totalorder %s368_s18, 0  ;;  %p382_p2 = scmp.eq.s32.totalorder %s2695_s28, 1 }
  0x11   : > { %p387_p3 = scmp.ne.s32.totalorder %s2561_s25, %s2557_s24  ;;  %p388_p4 = scmp.eq.s32.totalorder %s3199_s29, 1 }
  0x12   : > { %s2712_s19 = scalar_select %p369_p1, %s2565_s26, %s371_s30  }
  0x13   : > { %p2714_p5 = por %p382_p2, %p381_p0  ;;  %p2718_p6 = por %p388_p4, %p387_p3 }
  0x14   : > { %3218 = sst [smem:[#allocation13_spill]] %s2712_s19  ;;  %p2063_p7 = scmp.ge.s32.totalorder %s2569_s27, 1 }
  0x15   : > { %s3220_s20 = scalar_select %p2718_p6, 1, 0 }
  0x16   : > { %p514_p8 = scmp.lt.s32.totalorder %s2569_s27, 3 }
  0x17   : > { %3221 = sst [smem:[#allocation14_spill]] %s3220_s20 }
  0x18   : > { %p515_p9 = pnand %p2063_p7, %p514_p8 }
  0x19   : > { %s3222_s3 = sld [smem:[#allocation18_spill]] (!%p515_p9)  ;;  %v2571_v1 = vmov (!%p515_p9), 0.0   ;;  %vm2572_vm0 = vmmov (!%p515_p9), 0   ;;  %p582_p10 = scmp.lt.s32.totalorder (!%p515_p9), %s2695_s28, 1  ;;  %vm619_vm1 = vcmask (!%p515_p9), 261120   ;;  %v603_v9 = vlaneseq (!%p515_p9) }
  0x1a   : > { %518 = sbr.rel (%p515_p9) target bundleno = 3342 (0xd0e), region = 80  ;;  %2202 = vmatprep.subr.bf16.mxu1 (!%p515_p9), %v2571_v1  ;;  %2218 = vmatprep.subr.bf16.mxu0 (!%p515_p9), %v2571_v1  ;;  %s3223_s19 = sld [smem:[#allocation15_spill]] (!%p515_p9)  ;;  %vm747_vm5 = vcmask (!%p515_p9), 130048   ;;  %vm872_vm6 = vcmask (!%p515_p9), 64512   ;;  %vm893_vm7 = vcmask (!%p515_p9), 1043456  }
  0x1b   : > { %2206 = vmatprep.mubr.msk.bf16.mxu1 (!%p515_p9), %vm2572_vm0, %v2571_v1  ;;  %2220 = vmatprep.mubr.msk.bf16.mxu0 (!%p515_p9), %vm2572_vm0, %v2571_v1  ;;  %s3224_s0 = sld [smem:[#allocation16_spill]] (!%p515_p9)  ;;  %v604_v10 = vshrl.u32 (!%p515_p9), %v603_v9, 7  ;;  %s3225_s4 = sld [smem:[#allocation19_spill]] (!%p515_p9) }
  0x1c   : > { %s2573_s27 = smov (!%p515_p9), 96   ;;  %s3226_s2 = sld [smem:[#allocation17_spill]] (!%p515_p9) }
  0x1d   : > { %v2771_v11 = vsub.s32 (!%p515_p9), 0, %v604_v10  ;;  %v2779_v17 = vsub.s32 (!%p515_p9), 1, %v604_v10  ;;  %s2577_s30 = smov (!%p515_p9), 80   ;;  %s2845_s29 = sand.u32 (!%p515_p9), 1, %s2561_s25  }
  0x1e   : > { %s2578_s26 = smov (!%p515_p9), 48   ;;  %s3208_s22 = sshll.u32 (!%p515_p9), %s2695_s28, 7 }
  0x1f   : > { %v2385_v0 = vld [vmem:[%s3222_s3] sm:$0xff] (!%p515_p9)   ;;  %v2386_v2 = vld [vmem:[%s3222_s3 + $0x8] sm:$0xff] (!%p515_p9)   ;;  %v2387_v4 = vld [vmem:[%s3222_s3 + $0x10] sm:$0xff] (!%p515_p9)  }
  0x20   : > { %2203 = vmatpush3.bf16.msra.mxu1 (!%p515_p9), %v2385_v0  ;;  %v2388_v7 = vld [vmem:[%s3222_s3 + $0x18] sm:$0xff] (!%p515_p9)  }
  0x21   : > { %2204 = vmatprep.subr.bf16.mxu1 %v2571_v1  ;;  %s2739_s18 = scalar_select %p582_p10, %s2695_s28, 1  ;;  %v597_v12 = vld [vmem:[%s3225_s4] sm:$0x3] }
  0x22   : > { %v606_v13 = vrot.slane %v597_v12, %v2771_v11  ;;  %v672_v20 = vrot.slane %v597_v12, %v2779_v17 }
  0x23   : > { %s2067_s21 = sshll.u32 %s2739_s18, 3 }
  0x24   : > { %2205 = vmatpush3.bf16.msra.mxu1 %v2386_v2  ;;  %s585_s23 = scalar_lea.vmem %s3223_s19, %s2067_s21  ;;  %s589_s20 = scalar_lea.vmem %s3224_s0, %s2067_s21 }
  0x25   : > { %2210 = vmatprep.subr.bf16.mxu1 %v2571_v1  ;;  %v2749_v3 = vld [vmem:[%s585_s23] sm:$0xff]  ;;  %s2574_s0 = smov 16   ;;  %s592_s23 = scalar_lea.vmem %s3226_s2, %s2739_s18 }
  0x26   : > { %v602_v5 = vpack.c.bf16 %v2749_v3, %v2749_v3  ;;  %v2756_v6 = vld [vmem:[%s589_s20] sm:$0xff]  ;;  %s2575_s20 = smov 112   ;;  %s2576_s18 = smov 64  }
  0x27   : > { %v668_v8 = vpack.c.bf16 %v2756_v6, %v2756_v6  ;;  %v2821_v2 = vld [vmem:[%s592_s23] sm:$0x1]  ;;  %s2066_s19 = sshll.u32 %s2845_s29, 4  ;;  %s3207_s21 = sshll.u32 %s2845_s29, 3 }
  0x28   : > { %2207 = vmatmul.mubr.msk.bf16.vlgmr.msra.gmra.mrb[0].mxu1 %vm619_vm1, %v602_v5  ;;  %s2852_s24 = scalar_lea.vmem [#allocation6], %s2066_s19  ;;  %s567_s23 = scalar_lea.vmem [#allocation2], %s3207_s21 }
  0x29   : > { %2211 = vmatpush3.bf16.msra.mxu1 %v2387_v4  ;;  %2214 = vmatprep.mubr.msk.bf16.mxu1 %vm2572_vm0, %v2571_v1 }
  0x2a   : > { %2212 = vmatprep.subr.bf16.mxu1 %v2571_v1 }
  0x2d   : > { %2213 = vmatpush3.bf16.msra.mxu1 %v2388_v7 }
  0x2e   : > { %2224 = vmatprep.subr.bf16.mxu1 %v2571_v1 }
  0x30   : > { %2215 = vmatmul.mubr.msk.bf16.vlgmr.msra.gmra.mrb[4].mxu1 %vm619_vm1, %v668_v8 }
  0x31   : > { %2226 = vmatprep.mubr.msk.bf16.mxu1 %vm2572_vm0, %v2571_v1 }
  0xfb   : > { %v657_v14 = vpop.f32.mrb[0].mxu1 }
  0xfc   : > { %v2777_v15 = vadd.f32 %v657_v14, %v606_v13  ;;  %v2208_v16 = vpop.f32.mrb[1].mxu1 }
  0xfd   : > { %v660_v18 = vpop.f32.mrb[2].mxu1 }
  0xfe   : > { %752 = vrot.lane.b32.xlu0 %v2777_v15, %s2573_s27  ;;  %v2209_v19 = vpop.f32.mrb[3].mxu1  ;;  %v2795_v38 = vmul.f32 %v2777_v15, %v2777_v15  ;;  %v2828_v13 = vpack.c.bf16 %v2777_v15, %v2777_v15 }
 0x100   : > { %v807_v52 = vsel %vm747_vm5, %v2795_v38, 0.0 }
 0x103   : > { %v722_v21 = vpop.f32.mrb[4].mxu1 }
 0x104   : > { %v723_v22 = vadd.f32 %v722_v21, %v672_v20  ;;  %v2216_v23 = vpop.f32.mrb[5].mxu1 }
 0x105   : > { %v725_v24 = vpop.f32.mrb[6].mxu1 }
 0x106   : > { %v729_v25 = vmin.f32 %v723_v22, 0.0  ;;  %v2217_v26 = vpop.f32.mrb[7].mxu1  ;;  %vm728_vm2 = vcmp.gt.f32.partialorder %v723_v22, 0.0 }
 0x108   : > { %v730_v27 = vmul.f32 1.442695, %v729_v25 }
 0x10a   : > { %2413 = vpow2.f32 %v730_v27 }
 0x114   : > { %v2414_v28 = vpop.eup %2413 }
 0x115   : > { %v2079_v29 = vadd.f32 -1.0, %v2414_v28 }
 0x117   : > { %v733_v30 = vsel %vm728_vm2, %v723_v22, %v2079_v29 }
 0x118   : > { %v2784_v31 = vadd.f32 1.0, %v733_v30 }
 0x11a   : > { %v735_v32 = vmax.f32 %v2784_v31, 1e-24  ;;  %v810_v51 = vsel %vm747_vm5, %v2784_v31, 0.0 }
 0x11c   : > { %2415 = vrsqrt.f32 %v735_v32  ;;  %vm738_vm3 = vcmp.eq.f32.partialorder %v735_v32, inf  ;;  %v741_v35 = vand.u32 2147483648, %v735_v32  ;;  %vm740_vm4 = vcmp.eq.f32.partialorder %v735_v32, 0.0 }
 0x126   : > { %v2416_v33 = vpop.eup %2415 }
 0x127   : > { %v737_v34 = vmul.f32 %v2416_v33, %v735_v32 }
 0x129   : > { %v739_v36 = vsel %vm738_vm3, %v735_v32, %v737_v34 }
 0x12a   : > { %v2787_v37 = vsel %vm740_vm4, %v741_v35, %v739_v36 }
 0x12b   : > { %744 = vrot.lane.b32.xlu1 %v2787_v37, %s2574_s0  ;;  %755 = vrot.lane.b32.xlu0 %v2787_v37, %s2575_s20 }
 0x12f   : > { %816 = vrot.lane.b32.xlu1 %v2795_v38, %s2573_s27  ;;  %823 = vrot.lane.b32.xlu0 %v2784_v31, %s2573_s27 }
 0x170   : > { %v753_v39 = vpop.permute.xlu0 %752 }
 0x19d   : > { %v745_v40 = vpop.permute.xlu1 %744  ;;  %v756_v41 = vpop.permute.xlu0 %755 }
 0x19e   : > { %v758_v42 = vsel %vm747_vm5, %v753_v39, %v756_v41  ;;  %v748_v44 = vsel %vm747_vm5, %v2777_v15, %v745_v40 }
 0x19f   : > { %v759_v43 = vpack.c.bf16 %v758_v42, %v758_v42  ;;  %v749_v50 = vmul.f32 0.5, %v748_v44 }
 0x1a1   : > { %v817_v45 = vpop.permute.xlu1 %816  ;;  %v824_v46 = vpop.permute.xlu0 %823  ;;  %v764_v47 = vsel %vm619_vm1, %v759_v43, 0  ;;  %v750_v53 = vpack.c.bf16 %v749_v50, %v749_v50 }
 0x1a2   : > { %2219 = vmatpush3.bf16.xpose.msra.mxu0 %v764_v47  ;;  %v819_v48 = vsel %vm747_vm5, %v817_v45, 0.0  ;;  %v826_v49 = vsel %vm747_vm5, %v824_v46, 0.0 }
 0x1a3   : > { %820 = vadd.xlane.f32.xlu1 %v819_v48  ;;  %827 = vadd.xlane.f32.xlu0 %v826_v49 }
 0x1a4   : > { %2230 = vmatprep.subr.bf16.mxu0 %v2571_v1 }
 0x1a7   : > { %811 = vadd.xlane.f32.xlu1 %v810_v51  ;;  %808 = vadd.xlane.f32.xlu0 %v807_v52 }
 0x1a9   : > { %2221 = vmatmul.mubr.msk.bf16.vlgmr.msra.gmra.mrb[0].mxu0 %vm619_vm1, %v750_v53 }
 0x1aa   : > { %2232 = vmatprep.mubr.msk.bf16.mxu0 %vm2572_vm0, %v2571_v1 }
 0x230   : > { %v821_v54 = vpop.xlane.xlu1 %820  ;;  %v828_v55 = vpop.xlane.xlu0 %827 }
 0x231   : > { %v829_v56 = vadd.f32 %v828_v55, %v821_v54 }
 0x233   : > { %v830_v57 = vmul.f32 0.25, %v829_v56 }
 0x234   : > { %v812_v62 = vpop.xlane.xlu1 %811  ;;  %v809_v63 = vpop.xlane.xlu0 %808 }
 0x235   : > { %831 = vxpose.xlu0.b32.start.end [1/1] (short) (narrow) %v830_v57, 8  ;;  %v813_v0 = vadd.f32 %v812_v62, %v809_v63 }
 0x237   : > { %v814_v5 = vmul.f32 0.25, %v813_v0 }
 0x25e   : > { %1049 = vrot.lane.b32.xlu0 %v2795_v38, %s2575_s20 }
 0x27c   : > { %v800_v58 = vpop.f32.mrb[0].mxu0 }
 0x27d   : > { %v2222_v59 = vpop.f32.mrb[1].mxu0  ;;  %v864_v8 = vsub.f32 %v800_v58, %v814_v5 }
 0x27e   : > { %v803_v60 = vpop.f32.mrb[2].mxu0 }
 0x27f   : > { %v2223_v61 = vpop.f32.mrb[3].mxu0 }
 0x2b5   : > { %v847_v4 = vpop.trf.xlu0 }
 0x2b6   : > { %v863_v7 = vsub.f32 %v2821_v2, %v847_v4 }
 0x2b8   : > { %v869_v9 = vrot.slane %v863_v7, %v2771_v11 }
 0x2ba   : > { %v871_v10 = vadd.f32 %v869_v9, %v864_v8 }
 0x2bc   : > { %v873_v12 = vsel %vm872_vm6, %v871_v10, -inf }
 0x2bd   : > { %874 = vmax.xlane.f32.xlu1 %v873_v12  ;;  %v939_v12 = vpack.c.bf16 %v2784_v31, %v2784_v31 }
 0x2ce   : > { %888 = vrot.lane.b32.xlu1 %v2828_v13, %s2576_s18 }
 0x2d0   : > { %v1050_v29 = vpop.permute.xlu0 %1049 }
 0x2d1   : > { %v1052_v36 = vsel %vm747_vm5, %v1050_v29, 0.0  ;;  %v2392_v29 = vld [vmem:[%s3186_s5 + $0x18] sm:$0xff]  }
 0x2d2   : > { %995 = vrot.lane.b32.xlu1 %v2777_v15, %s2577_s30 }
 0x2d6   : > { %998 = vrot.lane.b32.xlu1 %v2787_v37, %s2573_s27 }
 0x34a   : > { %v875_v14 = vpop.xlane.xlu1 %874 }
 0x34b   : > { %v876_v16 = vsub.f32 %v871_v10, %v875_v14 }
 0x34d   : > { %v877_v18 = vmul.f32 1.442695, %v876_v16 }
 0x34e   : > { %v889_v19 = vpop.permute.xlu1 %888 }
 0x34f   : > { %2417 = vpow2.f32 %v877_v18  ;;  %v895_v20 = vsel %vm893_vm7, %v889_v19, 0 }
 0x350   : > { %2225 = vmatpush3.bf16.msra.mxu1 %v895_v20 }
 0x351   : > { %2236 = vmatprep.subr.bf16.mxu1 %v2571_v1 }
 0x352   : > { %v996_v23 = vpop.permute.xlu1 %995 }
 0x356   : > { %v999_v24 = vpop.permute.xlu1 %998 }
 0x357   : > { %v1001_v28 = vsel %vm747_vm5, %v996_v23, %v999_v24 }
 0x358   : > { %v1002_v32 = vpack.c.bf16 %v1001_v28, %v1001_v28  ;;  %v2390_v28 = vld [vmem:[%s3186_s5 + $0x8] sm:$0xff]  }
 0x359   : > { %v2418_v21 = vpop.eup %2417 }
 0x35a   : > { %v879_v22 = vsel %vm872_vm6, %v2418_v21, 0.0  ;;  %v1007_v40 = vsel %vm619_vm1, %v1002_v32, 0 }
 0x35b   : > { %880 = vadd.xlane.f32.xlu1 %v879_v22 }
 0x36c   : > { %989 = vrot.lane.b32.xlu1 %v2777_v15, %s2575_s20 }
 0x370   : > { %1063 = vrot.lane.b32.xlu1 %v2795_v38, %s2577_s30 }
 0x374   : > { %1069 = vrot.lane.b32.xlu1 %v2784_v31, %s2577_s30 }
 0x378   : > { %1055 = vrot.lane.b32.xlu1 %v2784_v31, %s2575_s20  ;;  %s2579_s20 = smov [#allocation2]  }
 0x379   : > { %s2451_s21 = sshll.u32 %s2579_s20, 4  ;;  %s2452_s21 = int_to_ptr.vmem [resolvable:$false] %s2451_s21 }
 0x37a   : > { %s2453_s30 = scalar_lea.vmem %s2452_s21, 256 }
 0x3e8   : > { %v881_v25 = vpop.xlane.xlu1 %880 }
 0x3e9   : > { %2419 = vrcp.f32 %v881_v25 }
 0x3ec   : > { %v990_v26 = vpop.permute.xlu1 %989 }
 0x3ed   : > { %v992_v39 = vsel %vm747_vm5, %v990_v26, %v2787_v37 }
 0x3ee   : > { %v993_v43 = vmul.f32 0.5, %v992_v39 }
 0x3f0   : > { %v1064_v27 = vpop.permute.xlu1 %1063  ;;  %v994_v44 = vpack.c.bf16 %v993_v43, %v993_v43 }
 0x3f1   : > { %v1066_v15 = vsel %vm747_vm5, %v1064_v27, 0.0  ;;  %v2389_v27 = vld [vmem:[%s3186_s5] sm:$0xff]  }
 0x3f2   : > { %1067 = vadd.xlane.f32.xlu1 %v1066_v15  ;;  %v2391_v15 = vld [vmem:[%s3186_s5 + $0x10] sm:$0xff]  }
 0x3f3   : > { %v2420_v30 = vpop.eup %2419 }
 0x3f4   : > { %v883_v33 = vmul.f32 %v2420_v30, %v2418_v21  ;;  %v1070_v34 = vpop.permute.xlu1 %1069 }
 0x3f5   : > { %v1072_v35 = vsel %vm747_vm5, %v1070_v34, 0.0 }
 0x3f6   : > { %1073 = vadd.xlane.f32.xlu0 %v1072_v35  ;;  %1053 = vadd.xlane.f32.xlu1 %v1052_v36  ;;  %v885_v38 = vpack.c.bf16 %v883_v33, %v883_v33  ;;  %884 = vst.msk [vmem:[%s2852_s24] sm:$0xff] %vm872_vm6, %v883_v33 }
 0x3f8   : > { %2227 = vmatmul.mubr.msk.bf16.vlgmr.msra.gmra.mrb[8].mxu1 %vm872_vm6, %v885_v38  ;;  %v1056_v41 = vpop.permute.xlu1 %1055 }
 0x3f9   : > { %2237 = vmatpush3.bf16.xpose.msra.mxu1 %v1007_v40  ;;  %v1058_v42 = vsel %vm747_vm5, %v1056_v41, 0.0  ;;  %2238 = vmatprep.mubr.msk.bf16.mxu1 %vm2572_vm0, %v2571_v1 }
 0x3fa   : > { %1059 = vadd.xlane.f32.xlu1 %v1058_v42  ;;  %2248 = vmatprep.subr.bf16.mxu1 %v2571_v1 }
 0x400   : > { %2239 = vmatmul.mubr.msk.bf16.vlgmr.msra.gmra.mrb[12].mxu1 %vm619_vm1, %v994_v44 }
 0x401   : > { %2250 = vmatprep.mubr.msk.bf16.mxu1 %vm2572_vm0, %v2571_v1 }
 0x47f   : > { %v1068_v37 = vpop.xlane.xlu1 %1067 }
 0x483   : > { %v1074_v45 = vpop.xlane.xlu0 %1073  ;;  %v1054_v56 = vpop.xlane.xlu1 %1053 }
 0x484   : > { %v1075_v46 = vadd.f32 %v1074_v45, %v1068_v37 }
 0x486   : > { %v1076_v47 = vmul.f32 0.25, %v1075_v46 }
 0x487   : > { %v1060_v57 = vpop.xlane.xlu1 %1059 }
 0x488   : > { %1077 = vxpose.xlu1.b32.start.end [1/1] (short) (narrow) %v1076_v47, 8  ;;  %v1061_v58 = vadd.f32 %v1060_v57, %v1054_v56 }
 0x48a   : > { %v1062_v60 = vmul.f32 0.25, %v1061_v58 }
 0x4a6   : > { %1132 = vrot.lane.b32.xlu1 %v2828_v13, %s2578_s26  ;;  %v937_v13 = vmul.f32 %v883_v33, %v883_v33 }
 0x4a8   : > { %v938_v19 = vpack.c.bf16 %v937_v13, %v937_v13 }
 0x4cb   : > { %v2869_v48 = vpop.f32.mrb[8].mxu1 }
 0x4cc   : > { %v2228_v49 = vpop.f32.mrb[9].mxu1 }
 0x4cd   : > { %v934_v50 = vpop.f32.mrb[10].mxu1 }
 0x4ce   : > { %v2229_v51 = vpop.f32.mrb[11].mxu1  ;;  %v1240_v50 = vld [vmem:[%s3187_s6] sm:$0x3] }
 0x4d3   : > { %v1043_v52 = vpop.f32.mrb[12].mxu1 }
 0x4d4   : > { %v2240_v53 = vpop.f32.mrb[13].mxu1  ;;  %v1110_v62 = vsub.f32 %v1043_v52, %v1062_v60 }
 0x4d5   : > { %v1046_v54 = vpop.f32.mrb[14].mxu1 }
 0x4d6   : > { %v2241_v55 = vpop.f32.mrb[15].mxu1  ;;  %v1314_v54 = vrot.slane %v1240_v50, %v2779_v17 }
 0x508   : > { %v1093_v59 = vpop.trf.xlu1 }
 0x509   : > { %v1109_v61 = vsub.f32 %v2821_v2, %v1093_v59 }
 0x50b   : > { %v1115_v63 = vrot.slane %v1109_v61, %v2771_v11 }
 0x50d   : > { %v1117_v0 = vadd.f32 %v1115_v63, %v1110_v62 }
 0x50f   : > { %v1118_v4 = vsel %vm872_vm6, %v1117_v0, -inf }
 0x510   : > { %1119 = vmax.xlane.f32.xlu0 %v1118_v4 }
 0x518   : > { %v1133_v18 = vpop.permute.xlu1 %1132 }
 0x519   : > { %v1138_v21 = vsel %vm893_vm7, %v1133_v18, 0  ;;  %v2397_v18 = vld [vmem:[%s3192_s11] sm:$0xff]  }
 0x59d   : > { %v1120_v5 = vpop.xlane.xlu0 %1119 }
 0x59e   : > { %v1121_v7 = vsub.f32 %v1117_v0, %v1120_v5 }
 0x5a0   : > { %v1122_v8 = vmul.f32 1.442695, %v1121_v7 }
 0x5a2   : > { %2421 = vpow2.f32 %v1122_v8 }
 0x5ac   : > { %v2422_v9 = vpop.eup %2421 }
 0x5ad   : > { %v1124_v10 = vsel %vm872_vm6, %v2422_v9, 0.0 }
 0x5ae   : > { %1125 = vadd.xlane.f32.xlu0 %v1124_v10 }
 0x5c4   : > { %941 = vrot.lane.b32.xlu0 %v939_v12, %s2576_s18  ;;  %s1890_s18 = sshll.u32 %s567_s23, 4  ;;  %s3069_s18 = int_to_ptr.vmem [resolvable:$true] %s1890_s18 }
 0x5c5   : > { %s2447_s27 = scalar_lea.vmem %s3069_s18, 128  ;;  %p2454_p0 = scmp.lt.s32.totalorder %s3069_s18, %s2452_s21 }
 0x5c6   : > { %p2448_p11 = scmp.ne.s32.totalorder %s3069_s18, %s2447_s27  ;;  %p2455_p1 = scmp.lt.s32.totalorder %s2453_s30, %s2447_s27 }
 0x5c8   : > { %1182 = vrot.lane.b32.xlu0 %v939_v12, %s2578_s26  ;;  %s1867_s26 = scalar_lea.sflag [#allocation3], %s2845_s29  ;;  %p2449_p12 = pnand %p2448_p11, %p2714_p5 }
 0x5c9   : > { %p2456_p2 = por %p2455_p1, %p2454_p0 }
 0x5ca   : > { %p2450_p13 = pneg %p2449_p12 }
 0x5cc   : > { %p2457_p3 = pnand %p2456_p2, %p2450_p13 }
 0x63b   : > { %v1126_v2 = vpop.xlane.xlu0 %1125 }
 0x63c   : > { %2423 = vrcp.f32 %v1126_v2 }
 0x63f   : > { %v942_v14 = vpop.permute.xlu0 %941 }
 0x640   : > { %v947_v16 = vsel %vm893_vm7, %v942_v14, 0 }
 0x641   : > { %2231 = vmatpush3.bf16.msra.mxu0 %v947_v16  ;;  %v2394_v16 = vld [vmem:[%s3190_s9 + $0x8] sm:$0xff]  }
 0x642   : > { %2242 = vmatprep.subr.bf16.mxu0 %v2571_v1 }
 0x643   : > { %v1183_v20 = vpop.permute.xlu0 %1182 }
 0x644   : > { %v1188_v31 = vsel %vm893_vm7, %v1183_v20, 0  ;;  %2233 = vmatmul.mubr.msk.bf16.vlgmr.msra.gmra.mrb[4].mxu0 %vm872_vm6, %v938_v19  ;;  %v2398_v19 = vld [vmem:[%s3192_s11 + $0x8] sm:$0xff]  }
 0x645   : > { %2243 = vmatpush3.bf16.msra.mxu0 %v1138_v21  ;;  %2249 = vmatpush3.bf16.msra.mxu1 %v1188_v31 }
 0x646   : > { %v2424_v22 = vpop.eup %2423  ;;  %2244 = vmatprep.mubr.msk.bf16.mxu0 %vm2572_vm0, %v2571_v1  ;;  %2254 = vmatprep.subr.bf16.mxu0 %v2571_v1 }
 0x647   : > { %v1128_v23 = vmul.f32 %v2424_v22, %v2422_v9  ;;  %2262 = vmatprep.subr.bf16.mxu1 %v2571_v1 }
 0x649   : > { %v1131_v24 = vpack.c.bf16 %v1128_v23, %v1128_v23  ;;  %v1180_v25 = vmul.f32 %v1128_v23, %v1128_v23  ;;  %2084 = vst.msk [vmem:[%s2852_s24 + $0x8] sm:$0xff] %vm872_vm6, %v1128_v23 }
 0x64b   : > { %v1181_v26 = vpack.c.bf16 %v1180_v25, %v1180_v25 }
 0x64c   : > { %2245 = vmatmul.mubr.msk.bf16.vlgmr.msra.gmra.mrb[8].mxu0 %vm872_vm6, %v1131_v24 }
 0x64d   : > { %2251 = vmatmul.mubr.msk.bf16.vlgmr.msra.gmra.mrb[16].mxu1 %vm872_vm6, %v1181_v26  ;;  %2258 = vmatprep.mubr.msk.bf16.mxu0 %vm2572_vm0, %v2571_v1 }
 0x64e   : > { %2266 = vmatprep.mubr.msk.bf16.mxu1 %vm2572_vm0, %v2571_v1  ;;  %2255 = vmatpush3.bf16.msra.mxu0 %v2389_v27 }
 0x64f   : > { %2256 = vmatprep.subr.bf16.mxu0 %v2571_v1  ;;  %2263 = vmatpush3.bf16.msra.mxu1 %v2391_v15 }
 0x650   : > { %2264 = vmatprep.subr.bf16.mxu1 %v2571_v1 }
 0x652   : > { %2257 = vmatpush3.bf16.msra.mxu0 %v2390_v28 }
 0x653   : > { %2270 = vmatprep.subr.bf16.mxu0 %v2571_v1  ;;  %2265 = vmatpush3.bf16.msra.mxu1 %v2392_v29 }
 0x654   : > { %2278 = vmatprep.subr.bf16.mxu1 %v2571_v1 }
 0x717   : > { %v983_v30 = vpop.f32.mrb[4].mxu0 }
 0x718   : > { %v2234_v32 = vpop.f32.mrb[5].mxu0 }
 0x719   : > { %v986_v33 = vpop.f32.mrb[6].mxu0 }
 0x71a   : > { %v2235_v34 = vpop.f32.mrb[7].mxu0 }
 0x71f   : > { %v1174_v35 = vpop.f32.mrb[8].mxu0 }
 0x720   : > { %1231 = vrot.lane.b32.xlu0 %v1174_v35, %s2574_s0  ;;  %v2246_v36 = vpop.f32.mrb[9].mxu0  ;;  %v1224_v38 = vpop.f32.mrb[16].mxu1 }
 0x721   : > { %v1177_v39 = vpop.f32.mrb[10].mxu0  ;;  %v2252_v40 = vpop.f32.mrb[17].mxu1  ;;  %v2097_v36 = vld [vmem:[%s3188_s7] ss:$0 sm:$0xff] }
 0x722   : > { %v2247_v41 = vpop.f32.mrb[11].mxu0  ;;  %v1227_v42 = vpop.f32.mrb[18].mxu1  ;;  %v2098_v39 = vld [vmem:[%s3189_s8] ss:$0 sm:$0xff] }
 0x723   : > { %v2253_v43 = vpop.f32.mrb[19].mxu1 }
 0x724   : > { %1236 = vrot.lane.b32.xlu0 %v1224_v38, %s2574_s0  ;;  %v2395_v43 = vld [vmem:[%s3190_s9 + $0x10] sm:$0xff]   ;;  %s3067_s0 = scalar_lea.hbm %s3196_s15, %s3208_s22 }
 0x792   : > { %v1232_v44 = vpop.permute.xlu0 %1231 }
 0x793   : > { %v1234_v37 = vsel %vm747_vm5, %v2869_v48, %v1232_v44  ;;  %v1249_v48 = vrot.slane %v1240_v50, %v2771_v11  ;;  %v2399_v50 = vld [vmem:[%s3192_s11 + $0x10] sm:$0xff]  }
 0x794   : > { %v1245_v45 = vpack.c.bf16 %v1234_v37, %v1234_v37 }
 0x796   : > { %2259 = vmatmul.mubr.msk.bf16.vlgmr.msra.gmra.mrb[12].mxu0 %vm619_vm1, %v1245_v45  ;;  %v1237_v46 = vpop.permute.xlu0 %1236 }
 0x797   : > { %v1239_v47 = vsel %vm747_vm5, %v983_v30, %v1237_v46  ;;  %2274 = vmatprep.mubr.msk.bf16.mxu0 %vm2572_vm0, %v2571_v1  ;;  %v2396_v46 = vld [vmem:[%s3190_s9 + $0x18] sm:$0xff]  }
 0x798   : > { %v1310_v49 = vpack.c.bf16 %v1239_v47, %v1239_v47 }
 0x79a   : > { %2267 = vmatmul.mubr.msk.bf16.vlgmr.msra.gmra.mrb[20].mxu1 %vm619_vm1, %v1310_v49 }
 0x79b   : > { %2294 = vmatprep.mubr.msk.bf16.mxu1 %vm2572_vm0, %v2571_v1  ;;  %2279 = vmatpush3.bf16.msra.mxu1 %v2397_v18 }
 0x79c   : > { %2280 = vmatprep.subr.bf16.mxu1 %v2571_v1 }
 0x79f   : > { %2281 = vmatpush3.bf16.msra.mxu1 %v2398_v19 }
 0x7a0   : > { %2282 = vmatprep.subr.bf16.mxu1 %v2571_v1 }
 0x7a3   : > { %2283 = vmatpush3.bf16.msra.mxu1 %v2399_v50 }
 0x7a4   : > { %2284 = vmatprep.subr.bf16.mxu1 %v2571_v1 }
 0x869   : > { %v1299_v51 = vpop.f32.mrb[12].mxu0 }
 0x86a   : > { %v1300_v52 = vadd.f32 %v1299_v51, %v1249_v48  ;;  %v2260_v53 = vpop.f32.mrb[13].mxu0  ;;  %v2400_v48 = vld [vmem:[%s3192_s11 + $0x40] sm:$0xff]   ;;  %v2401_v51 = vld [vmem:[%s3192_s11 + $0x18] sm:$0xff]  }
 0x86b   : > { %v1302_v55 = vpop.f32.mrb[14].mxu0  ;;  %2285 = vmatpush3.bf16.msra.mxu1 %v2401_v51  ;;  %v2403_v53 = vld [vmem:[%s3192_s11 + $0x20] sm:$0xff]  }
 0x86c   : > { %v2261_v56 = vpop.f32.mrb[15].mxu0  ;;  %v1372_v57 = vadd.f32 %v1300_v52, %v2749_v3  ;;  %v2402_v52 = vld [vmem:[%s3192_s11 + $0x48] sm:$0xff]   ;;  %2286 = vmatprep.subr.bf16.mxu1 %v2571_v1 }
 0x86d   : > { %v1364_v58 = vpop.f32.mrb[20].mxu1  ;;  %v2405_v55 = vld [vmem:[%s3192_s11 + $0x28] sm:$0xff]   ;;  %v2406_v56 = vld [vmem:[%s3192_s11 + $0x58] sm:$0xff]  }
 0x86e   : > { %v1365_v59 = vadd.f32 %v1364_v58, %v1314_v54  ;;  %v2268_v60 = vpop.f32.mrb[21].mxu1  ;;  %v1373_v61 = vsel %vm619_vm1, %v1372_v57, 0.0  ;;  %v2404_v54 = vld [vmem:[%s3192_s11 + $0x50] sm:$0xff]   ;;  %v2408_v58 = vld [vmem:[%s3192_s11 + $0x60] sm:$0xff]  }
 0x86f   : > { %1374 = vadd.xlane.f32.xlu0 %v1373_v61  ;;  %v1367_v62 = vpop.f32.mrb[22].mxu1  ;;  %2287 = vmatpush3.bf16.msra.mxu1 %v2403_v53  ;;  %v2410_v60 = vld [vmem:[%s3192_s11 + $0x68] sm:$0xff]   ;;  %v2411_v61 = vld [vmem:[%s3192_s11 + $0x70] sm:$0xff]  }
 0x870   : > { %v2269_v63 = vpop.f32.mrb[23].mxu1  ;;  %v1408_v0 = vadd.f32 %v1365_v59, %v2756_v6  ;;  %v2393_v6 = vld [vmem:[%s3190_s9] sm:$0xff]   ;;  %2288 = vmatprep.subr.bf16.mxu1 %v2571_v1  ;;  %v2409_v59 = vld [vmem:[%s3192_s11 + $0x38] sm:$0xff]  }
 0x871   : > { %2271 = vmatpush3.bf16.msra.mxu0 %v2393_v6  ;;  %v2412_v62 = vld [vmem:[%s3192_s11 + $0x78] sm:$0xff]   ;;  %v1431_v63 = vld [vmem:[%s3191_s10] sm:$0x3] }
 0x872   : > { %v1409_v4 = vsel %vm619_vm1, %v1408_v0, 0.0  ;;  %2272 = vmatprep.subr.bf16.mxu0 %v2571_v1 }
 0x873   : > { %1410 = vadd.xlane.f32.xlu1 %v1409_v4  ;;  %2289 = vmatpush3.bf16.msra.mxu1 %v2405_v55 }
 0x874   : > { %2290 = vmatprep.subr.bf16.mxu1 %v2571_v1 }
 0x875   : > { %2273 = vmatpush3.bf16.msra.mxu0 %v2394_v16 }
 0x876   : > { %2298 = vmatprep.subr.bf16.mxu0 %v2571_v1 }
 0x8fc   : > { %v1375_v5 = vpop.xlane.xlu0 %1374 }
 0x8fd   : > { %v1377_v7 = vmul.f32 0.03125, %v1375_v5 }
 0x8ff   : > { %v1378_v8 = vsub.f32 %v1372_v57, %v1377_v7  ;;  %v2407_v57 = vld [vmem:[%s3192_s11 + $0x30] sm:$0xff]  }
 0x900   : > { %v1411_v9 = vpop.xlane.xlu1 %1410  ;;  %2291 = vmatpush3.bf16.msra.mxu1 %v2407_v57 }
 0x901   : > { %v1412_v10 = vmul.f32 0.03125, %v1411_v9  ;;  %v1379_v12 = vmul.f32 %v1378_v8, %v1378_v8  ;;  %2292 = vmatprep.subr.bf16.mxu1 %v2571_v1 }
 0x903   : > { %v1413_v3 = vsub.f32 %v1408_v0, %v1412_v10  ;;  %v1380_v2 = vsel %vm619_vm1, %v1379_v12, 0.0  ;;  %v1443_v0 = vrot.slane %v1431_v63, %v2771_v11 }
 0x904   : > { %1381 = vadd.xlane.f32.xlu0 %v1380_v2  ;;  %2293 = vmatpush3.bf16.msra.mxu1 %v2409_v59 }
 0x905   : > { %v1414_v13 = vmul.f32 %v1413_v3, %v1413_v3 }
 0x907   : > { %v1415_v14 = vsel %vm619_vm1, %v1414_v13, 0.0 }
 0x908   : > { %1416 = vadd.xlane.f32.xlu0 %v1415_v14 }
 0x991   : > { %v1382_v20 = vpop.xlane.xlu0 %1381 }
 0x992   : > { %v1383_v21 = vmul.f32 0.03125, %v1382_v20 }
 0x994   : > { %v1384_v31 = vadd.f32 1e-12, %v1383_v21 }
 0x995   : > { %v1417_v22 = vpop.xlane.xlu0 %1416 }
 0x996   : > { %2425 = vrsqrt.f32 %v1384_v31  ;;  %v1418_v23 = vmul.f32 0.03125, %v1417_v22  ;;  %vm1387_vm8 = vcmp.eq.f32.partialorder %v1384_v31, inf  ;;  %v1390_v27 = vand.u32 2147483648, %v1384_v31 }
 0x997   : > { %vm1389_vm9 = vcmp.eq.f32.partialorder %v1384_v31, 0.0 }
 0x998   : > { %v1419_v24 = vadd.f32 1e-12, %v1418_v23 }
 0x99a   : > { %2427 = vrsqrt.f32 %v1419_v24  ;;  %vm1422_vm10 = vcmp.eq.f32.partialorder %v1419_v24, inf  ;;  %v1425_v32 = vand.u32 2147483648, %v1419_v24  ;;  %vm1424_vm11 = vcmp.eq.f32.partialorder %v1419_v24, 0.0 }
 0x9a0   : > { %v2426_v25 = vpop.eup %2425 }
 0x9a1   : > { %v1386_v26 = vmul.f32 %v2426_v25, %v1384_v31 }
 0x9a3   : > { %v1388_v28 = vsel %vm1387_vm8, %v1384_v31, %v1386_v26 }
 0x9a4   : > { %v1391_v15 = vsel %vm1389_vm9, %v1390_v27, %v1388_v28  ;;  %v2428_v29 = vpop.eup %2427  ;;  %v1432_v28 = vld [vmem:[%s3193_s12] sm:$0x3] }
 0x9a5   : > { %2429 = vrcp.f32 %v1391_v15  ;;  %v1421_v30 = vmul.f32 %v2428_v29, %v1419_v24 }
 0x9a7   : > { %v1423_v33 = vsel %vm1422_vm10, %v1419_v24, %v1421_v30  ;;  %v1525_v30 = vrot.slane %v1432_v28, %v2771_v11 }
 0x9a8   : > { %v1426_v34 = vsel %vm1424_vm11, %v1425_v32, %v1423_v33  ;;  %v1738_v32 = vrot.slane %v1432_v28, %v2779_v17 }
 0x9a9   : > { %2431 = vrcp.f32 %v1426_v34 }
 0x9af   : > { %v2430_v35 = vpop.eup %2429 }
 0x9b0   : > { %v1393_v38 = vmul.f32 %v2430_v35, %v1378_v8 }
 0x9b2   : > { %v1400_v40 = vmul.f32 %v2097_v36, %v1393_v38 }
 0x9b3   : > { %v2432_v41 = vpop.eup %2431 }
 0x9b4   : > { %v2956_v42 = vadd.f32 %v2098_v39, %v1400_v40  ;;  %v1428_v44 = vmul.f32 %v2432_v41, %v1413_v3 }
 0x9b6   : > { %v1439_v37 = vpack.c.bf16 %v2956_v42, %v2956_v42  ;;  %v1429_v45 = vmul.f32 %v2097_v36, %v1428_v44 }
 0x9b8   : > { %2275 = vmatmul.mubr.msk.bf16.vlgmr.msra.gmra.mrb[16].mxu0 %vm619_vm1, %v1439_v37  ;;  %v2970_v47 = vadd.f32 %v2098_v39, %v1429_v45 }
 0x9b9   : > { %2299 = vmatpush3.bf16.msra.mxu0 %v2395_v43  ;;  %2302 = vmatprep.mubr.msk.bf16.mxu0 %vm2572_vm0, %v2571_v1 }
 0x9ba   : > { %2300 = vmatprep.subr.bf16.mxu0 %v2571_v1  ;;  %v1651_v49 = vpack.c.bf16 %v2970_v47, %v2970_v47 }
 0x9bd   : > { %2301 = vmatpush3.bf16.msra.mxu0 %v2396_v46 }
 0x9be   : > { %2306 = vmatprep.subr.bf16.mxu0 %v2571_v1 }
 0x9c0   : > { %2303 = vmatmul.mubr.msk.bf16.vlgmr.msra.gmra.mrb[20].mxu0 %vm619_vm1, %v1651_v49 }
 0x9c1   : > { %2322 = vmatprep.mubr.msk.bf16.mxu0 %vm2572_vm0, %v2571_v1  ;;  %2307 = vmatpush3.bf16.msra.mxu0 %v2400_v48 }
 0x9c2   : > { %2308 = vmatprep.subr.bf16.mxu0 %v2571_v1 }
 0x9c5   : > { %2309 = vmatpush3.bf16.msra.mxu0 %v2402_v52 }
 0x9c6   : > { %2310 = vmatprep.subr.bf16.mxu0 %v2571_v1 }
 0x9c9   : > { %2311 = vmatpush3.bf16.msra.mxu0 %v2404_v54 }
 0x9ca   : > { %2312 = vmatprep.subr.bf16.mxu0 %v2571_v1 }
 0x9cd   : > { %2313 = vmatpush3.bf16.msra.mxu0 %v2406_v56 }
 0x9ce   : > { %2314 = vmatprep.subr.bf16.mxu0 %v2571_v1 }
 0x9d1   : > { %2315 = vmatpush3.bf16.msra.mxu0 %v2408_v58 }
 0x9d2   : > { %2316 = vmatprep.subr.bf16.mxu0 %v2571_v1 }
 0x9d5   : > { %2317 = vmatpush3.bf16.msra.mxu0 %v2410_v60 }
 0x9d6   : > { %2318 = vmatprep.subr.bf16.mxu0 %v2571_v1 }
 0x9d9   : > { %2319 = vmatpush3.bf16.msra.mxu0 %v2411_v61 }
 0x9da   : > { %2320 = vmatprep.subr.bf16.mxu0 %v2571_v1  ;;  %v1655_v1 = vrot.slane %v1431_v63, %v2779_v17 }
 0x9dd   : > { %2321 = vmatpush3.bf16.msra.mxu0 %v2412_v62 }
 0xa8b   : > { %v1493_v4 = vpop.f32.mrb[16].mxu0 }
 0xa8c   : > { %v1494_v5 = vadd.f32 %v1493_v4, %v1443_v0  ;;  %v2276_v7 = vpop.f32.mrb[17].mxu0 }
 0xa8d   : > { %v1496_v8 = vpop.f32.mrb[18].mxu0 }
 0xa8e   : > { %v1500_v9 = vmin.f32 %v1494_v5, 0.0  ;;  %v2277_v10 = vpop.f32.mrb[19].mxu0  ;;  %vm1499_vm12 = vcmp.gt.f32.partialorder %v1494_v5, 0.0 }
 0xa8f   : > { %v1434_v10 = vld [vmem:[%s3195_s14] sm:$0x3] }
 0xa90   : > { %v1501_v12 = vmul.f32 1.442695, %v1500_v9  ;;  %v1433_v9 = vld [vmem:[%s3194_s13] sm:$0x3] }
 0xa92   : > { %2433 = vpow2.f32 %v1501_v12  ;;  %v1851_v12 = vrot.slane %v1433_v9, %v2779_v17 }
 0xa93   : > { %v1705_v3 = vpop.f32.mrb[20].mxu0 }
 0xa94   : > { %v1706_v2 = vadd.f32 %v1705_v3, %v1655_v1  ;;  %v2304_v13 = vpop.f32.mrb[21].mxu0 }
 0xa95   : > { %v1708_v14 = vpop.f32.mrb[22].mxu0 }
 0xa96   : > { %v1712_v6 = vmin.f32 %v1706_v2, 0.0  ;;  %v2305_v16 = vpop.f32.mrb[23].mxu0  ;;  %vm1711_vm13 = vcmp.gt.f32.partialorder %v1706_v2, 0.0  ;;  %v1638_v14 = vrot.slane %v1433_v9, %v2771_v11 }
 0xa98   : > { %v1713_v18 = vmul.f32 1.442695, %v1712_v6 }
 0xa9a   : > { %2435 = vpow2.f32 %v1713_v18 }
 0xa9c   : > { %v2434_v19 = vpop.eup %2433 }
 0xa9d   : > { %v2102_v20 = vadd.f32 -1.0, %v2434_v19  ;;  %v1643_v19 = vrot.slane %v1434_v10, %v2771_v11 }
 0xa9f   : > { %v1504_v21 = vsel %vm1499_vm12, %v1494_v5, %v2102_v20 }
 0xaa0   : > { %v1521_v31 = vpack.c.bf16 %v1504_v21, %v1504_v21 }
 0xaa2   : > { %2295 = vmatmul.mubr.bf16.vlgmr.msra.gmra.mrb[24].mxu1 %v1521_v31 }
 0xaa4   : > { %v2436_v22 = vpop.eup %2435 }
 0xaa5   : > { %v2118_v23 = vadd.f32 -1.0, %v2436_v22 }
 0xaa7   : > { %v1716_v24 = vsel %vm1711_vm13, %v1706_v2, %v2118_v23  ;;  %v1856_v2 = vrot.slane %v1434_v10, %v2779_v17 }
 0xaa8   : > { %v1734_v25 = vpack.c.bf16 %v1716_v24, %v1716_v24 }
 0xaaa   : > { %2323 = vmatmul.mubr.bf16.vlgmr.msra.gmra.mrb[24].mxu0 %v1734_v25 }
 0xb75   : > { %v1608_v26 = vpop.f32.mrb[24].mxu1 }
 0xb76   : > { %v2296_v27 = vpop.f32.mrb[25].mxu1  ;;  %v1609_v34 = vadd.f32 %v1608_v26, %v1525_v30 }
 0xb77   : > { %v1611_v15 = vpop.f32.mrb[26].mxu1 }
 0xb78   : > { %v2297_v29 = vpop.f32.mrb[27].mxu1  ;;  %v1614_v43 = vadd.f32 %v1609_v34, %v2956_v42 }
 0xb7a   : > { %v1615_v44 = vsel %vm619_vm1, %v1614_v43, 0.0 }
 0xb7d   : > { %v1821_v33 = vpop.f32.mrb[24].mxu0 }
 0xb7e   : > { %v1822_v35 = vadd.f32 %v1821_v33, %v1738_v32  ;;  %v2324_v36 = vpop.f32.mrb[25].mxu0 }
 0xb7f   : > { %v1824_v38 = vpop.f32.mrb[26].mxu0 }
 0xb80   : > { %v2325_v39 = vpop.f32.mrb[27].mxu0  ;;  %v1827_v40 = vadd.f32 %v1822_v35, %v2970_v47 }
 0xb82   : > { %v1828_v41 = vsel %vm619_vm1, %v1827_v40, 0.0 }
 0xb83   : > { %1829 = vadd.xlane.f32.xlu0 %v1828_v41 }
 0xb87   : > { %1616 = vadd.xlane.f32.xlu0 %v1615_v44 }
 0xc10   : > { %v1830_v37 = vpop.xlane.xlu0 %1829 }
 0xc11   : > { %v1831_v45 = vmul.f32 0.03125, %v1830_v37 }
 0xc13   : > { %v1832_v46 = vsub.f32 %v1827_v40, %v1831_v45 }
 0xc14   : > { %v1617_v49 = vpop.xlane.xlu0 %1616 }
 0xc15   : > { %v1618_v50 = vmul.f32 0.03125, %v1617_v49  ;;  %v1833_v48 = vmul.f32 %v1832_v46, %v1832_v46 }
 0xc17   : > { %v1619_v51 = vsub.f32 %v1614_v43, %v1618_v50  ;;  %v1834_v52 = vsel %vm619_vm1, %v1833_v48, 0.0 }
 0xc18   : > { %1835 = vadd.xlane.f32.xlu0 %v1834_v52 }
 0xc19   : > { %v1620_v53 = vmul.f32 %v1619_v51, %v1619_v51 }
 0xc1b   : > { %v1621_v47 = vsel %vm619_vm1, %v1620_v53, 0.0 }
 0xc1c   : > { %1622 = vadd.xlane.f32.xlu0 %v1621_v47 }
 0xca5   : > { %v1836_v54 = vpop.xlane.xlu0 %1835 }
 0xca6   : > { %v1837_v42 = vmul.f32 0.03125, %v1836_v54 }
 0xca8   : > { %v1838_v55 = vadd.f32 1e-12, %v1837_v42 }
 0xca9   : > { %v1623_v56 = vpop.xlane.xlu0 %1622 }
 0xcaa   : > { %2437 = vrsqrt.f32 %v1838_v55  ;;  %v1624_v57 = vmul.f32 0.03125, %v1623_v56  ;;  %vm1841_vm14 = vcmp.eq.f32.partialorder %v1838_v55, inf  ;;  %v1844_v61 = vand.u32 2147483648, %v1838_v55 }
 0xcab   : > { %vm1843_vm15 = vcmp.eq.f32.partialorder %v1838_v55, 0.0 }
 0xcac   : > { %v1625_v58 = vadd.f32 1e-12, %v1624_v57 }
 0xcae   : > { %2439 = vrsqrt.f32 %v1625_v58  ;;  %vm1628_vm0 = vcmp.eq.f32.partialorder %v1625_v58, inf  ;;  %v1631_v5 = vand.u32 2147483648, %v1625_v58  ;;  %vm1630_vm2 = vcmp.eq.f32.partialorder %v1625_v58, 0.0 }
 0xcb4   : > { %v2438_v59 = vpop.eup %2437 }
 0xcb5   : > { %v1840_v60 = vmul.f32 %v2438_v59, %v1838_v55 }
 0xcb7   : > { %v1842_v62 = vsel %vm1841_vm14, %v1838_v55, %v1840_v60 }
 0xcb8   : > { %v1845_v63 = vsel %vm1843_vm15, %v1844_v61, %v1842_v62  ;;  %v2440_v0 = vpop.eup %2439 }
 0xcb9   : > { %2441 = vrcp.f32 %v1845_v63  ;;  %v1627_v4 = vmul.f32 %v2440_v0, %v1625_v58 }
 0xcbb   : > { %v1629_v7 = vsel %vm1628_vm0, %v1625_v58, %v1627_v4 }
 0xcbc   : > { %v1632_v8 = vsel %vm1630_vm2, %v1631_v5, %v1629_v7 }
 0xcbd   : > { %2443 = vrcp.f32 %v1632_v8 }
 0xcc3   : > { %v2442_v1 = vpop.eup %2441 }
 0xcc4   : > { %v1847_v3 = vmul.f32 %v2442_v1, %v1832_v46 }
 0xcc6   : > { %v1852_v13 = vmul.f32 %v1851_v12, %v1847_v3 }
 0xcc7   : > { %v2444_v6 = vpop.eup %2443 }
 0xcc8   : > { %v1857_v16 = vadd.f32 %v1856_v2, %v1852_v13  ;;  %v1634_v18 = vmul.f32 %v2444_v6, %v1619_v51 }
 0xcca   : > { %v1859_v20 = vmin.f32 %v1857_v16, 0.0  ;;  %v1639_v21 = vmul.f32 %v1638_v14, %v1634_v18 }
 0xccc   : > { %v1860_v31 = vmul.f32 1.442695, %v1859_v20  ;;  %v1644_v22 = vadd.f32 %v1643_v19, %v1639_v21 }
 0xcce   : > { %2445 = vpow2.f32 %v1860_v31  ;;  %1645 = vst.msk [vmem:[%s567_s23] sm:$0xff] %vm619_vm1, %v1644_v22 }
 0xccf   : > { %2460 = shalt.err (!%p2457_p3)
}
 0xcd0   : > { %s2461_s23 = scalar_lea.hbm %s3067_s0, 128  ;;  %s2465_s20 = scalar_lea.hbm %s3196_s15, 256 }
 0xcd1   : > { %p2462_p4 = scmp.ne.s32.totalorder %s3067_s0, %s2461_s23  ;;  %p2466_p9 = scmp.lt.u32.totalorder %s3067_s0, %s3196_s15 }
 0xcd2   : > { %p2467_p10 = scmp.lt.u32.totalorder %s2465_s20, %s2461_s23  ;;  %p2469_p12 = scmp.lt.u32.totalorder %s2461_s23, %s3067_s0 }
 0xcd3   : > { %p2463_p7 = pnand %p2462_p4, %p2714_p5 }
 0xcd4   : > { %p2468_p11 = por %p2467_p10, %p2466_p9 }
 0xcd5   : > { %p2464_p8 = pneg %p2463_p7 }
 0xcd6   : > { %p2470_p13 = por %p2469_p12, %p2468_p11 }
 0xcd8   : > { %p2471_p0 = pnand %p2470_p13, %p2464_p8 }
 0xcda   : > { %2474 = shalt.err (!%p2471_p0)
}
 0xcdb   : > { %2326 = dma.vmem_to_hbm [thread:$0]  (%p2714_p5), %s3069_s18, 128, %s3067_s0, %s1867_s26   ;;  %v2446_v11 = vpop.eup %2445  ;;  %vm1858_vm3 = vcmp.gt.f32.partialorder %v1857_v16, 0.0 }
 0xcdc   : > { %s1871_s22 = sand.u32 1, %s2695_s28   ;;  %s3227_s2 = sshll.u32 %s2845_s29, 3  ;;  %v2143_v17 = vadd.f32 -1.0, %v2446_v11 }
 0xcdd   : > { %s574_s27 = scalar_lea.vmem [#allocation4], %s3227_s2  ;;  %s1916_s23 = sshll.u32 %s2852_s24, 4  ;;  %s3108_s23 = int_to_ptr.vmem [resolvable:$true] %s1916_s23 }
 0xcde   : > { %s1903_s30 = sshll.u32 %s574_s27, 4  ;;  %s2153_s19 = sshll.u32 %s2695_s28, 8  ;;  %v1863_v23 = vsel %vm1858_vm3, %v1857_v16, %v2143_v17  ;;  %s3106_s30 = int_to_ptr.vmem [resolvable:$true] %s1903_s30 }
 0xcdf   : > { %s3228_s20 = sshll.u32 %s2695_s28, 7  ;;  %v1864_v24 = vadd.f32 1.0, %v1863_v23  ;;  %s3113_s24 = scalar_lea.hbm %s3198_s17, %s2153_s19 }
 0xce0   : > { %s3104_s4 = scalar_lea.hbm %s3197_s16, %s3228_s20  ;;  %s3116_s28 = scalar_lea.sflag [#allocation5], %s1871_s22 }
 0xce1   : > { %1865 = vst.msk [vmem:[%s574_s27] sm:$0xff] %vm619_vm1, %v1864_v24  ;;  %s2475_s3 = scalar_lea.vmem %s3106_s30, 128  ;;  %s2580_s0 = smov [#allocation4]  }
 0xce2   : > { %p2476_p1 = scmp.ne.s32.totalorder %s3106_s30, %s2475_s3  ;;  %s2479_s26 = sshll.u32 %s2580_s0, 4  ;;  %s2480_s26 = int_to_ptr.vmem [resolvable:$false] %s2479_s26 }
 0xce3   : > { %s2481_s2 = scalar_lea.vmem %s2480_s26, 256  ;;  %p2482_p4 = scmp.lt.s32.totalorder %s3106_s30, %s2480_s26 }
 0xce4   : > { %p2477_p2 = pnand %p2476_p1, %p2714_p5  ;;  %p2483_p7 = scmp.lt.s32.totalorder %s2481_s2, %s2475_s3 }
 0xce6   : > { %p2478_p3 = pneg %p2477_p2  ;;  %p2484_p8 = por %p2483_p7, %p2482_p4 }
 0xce8   : > { %p2485_p9 = pnand %p2484_p8, %p2478_p3 }
 0xcea   : > { %2488 = shalt.err (!%p2485_p9)
}
 0xceb   : > { %s2489_s22 = scalar_lea.hbm %s3104_s4, 128  ;;  %s2493_s20 = scalar_lea.hbm %s3197_s16, 256 }
 0xcec   : > { %p2490_p10 = scmp.ne.s32.totalorder %s3104_s4, %s2489_s22  ;;  %p2494_p13 = scmp.lt.u32.totalorder %s3104_s4, %s3197_s16 }
 0xced   : > { %p2495_p0 = scmp.lt.u32.totalorder %s2493_s20, %s2489_s22  ;;  %p2497_p2 = scmp.lt.u32.totalorder %s2489_s22, %s3104_s4 }
 0xcee   : > { %p2491_p11 = pnand %p2490_p10, %p2714_p5 }
 0xcef   : > { %p2496_p1 = por %p2495_p0, %p2494_p13 }
 0xcf0   : > { %p2492_p12 = pneg %p2491_p11 }
 0xcf1   : > { %p2498_p3 = por %p2497_p2, %p2496_p1 }
 0xcf3   : > { %p2499_p4 = pnand %p2498_p3, %p2492_p12 }
 0xcf5   : > { %2502 = shalt.err (!%p2499_p4)
}
 0xcf6   : > { %2327 = dma.vmem_to_hbm [thread:$0]  (%p2714_p5), %s3106_s30, 128, %s3104_s4, %s3116_s28  }
 0xcf7   : > { %s2503_s18 = scalar_lea.vmem %s3108_s23, 256  ;;  %s2581_s3 = smov [#allocation6]  }
 0xcf8   : > { %p2504_p7 = scmp.ne.s32.totalorder %s3108_s23, %s2503_s18  ;;  %s2507_s0 = sshll.u32 %s2581_s3, 4  ;;  %s2508_s0 = int_to_ptr.vmem [resolvable:$false] %s2507_s0 }
 0xcf9   : > { %s2509_s26 = scalar_lea.vmem %s2508_s0, 512  ;;  %p2510_p10 = scmp.lt.s32.totalorder %s3108_s23, %s2508_s0 }
 0xcfa   : > { %p2505_p8 = pnand %p2504_p7, %p2714_p5  ;;  %p2511_p11 = scmp.lt.s32.totalorder %s2509_s26, %s2503_s18 }
 0xcfc   : > { %p2506_p9 = pneg %p2505_p8  ;;  %p2512_p12 = por %p2511_p11, %p2510_p10 }
 0xcfe   : > { %p2513_p13 = pnand %p2512_p12, %p2506_p9 }
 0xd00   : > { %2516 = shalt.err (!%p2513_p13)
}
 0xd01   : > { %s2517_s4 = scalar_lea.hbm %s3113_s24, 256  ;;  %s2521_s22 = scalar_lea.hbm %s3198_s17, 512 }
 0xd02   : > { %p2518_p0 = scmp.ne.s32.totalorder %s3113_s24, %s2517_s4  ;;  %p2522_p3 = scmp.lt.u32.totalorder %s3113_s24, %s3198_s17 }
 0xd03   : > { %p2523_p4 = scmp.lt.u32.totalorder %s2521_s22, %s2517_s4  ;;  %p2525_p8 = scmp.lt.u32.totalorder %s2517_s4, %s3113_s24 }
 0xd04   : > { %p2519_p1 = pnand %p2518_p0, %p2714_p5 }
 0xd05   : > { %p2524_p7 = por %p2523_p4, %p2522_p3 }
 0xd06   : > { %p2520_p2 = pneg %p2519_p1 }
 0xd07   : > { %p2526_p9 = por %p2525_p8, %p2524_p7 }
 0xd09   : > { %p2527_p10 = pnand %p2526_p9, %p2520_p2 }
 0xd0b   : > { %2530 = shalt.err (!%p2527_p10)
}
 0xd0c   : > { %s2582_s20 = smov 128   ;;  %s2583_s21 = smov 8  }
 0xd0d   : > { %2328 = dma.vmem_to_hbm [thread:$0]  (%p2714_p5), %s3108_s23, 256, %s3113_s24, %s3116_s28, %s2582_s20, %s2582_s20, %s2583_s21  }
 0xd0e PF: > { %s3229_s29 = sld [smem:[#allocation11_spill]]  ;;  %s3230_s18 = sld [smem:[#allocation9_spill]] }
 0xd14   : > { %p2342_p11 = scmp.ge.s32.totalorder %s3229_s29, 2  ;;  %s1931_s0 = sand.u32 1, %s3230_s18  }
 0xd15   : > { %s1932_s26 = scalar_lea.sflag [#allocation3], %s1931_s0 }
 0xd16   : > { %p2333_p12 = pnand %p2342_p11, %p2718_p6 }
 0xd18   : > { %2548 = dma.done.wait (!%p2333_p12), %s1932_s26, 128  }
 0xd19   : > { %2550 = vsyncadd (!%p2333_p12), %s1932_s26, 4294967168  ;;  %s3232_s4 = sadd.s32 4294967294, %s3229_s29  }
 0xd1a   : > { %s1940_s30 = sand.u32 1, %s3232_s4  }
 0xd1b   : > { %s1941_s2 = scalar_lea.sflag [#allocation5], %s1940_s30 }
 0xd1c   : > { %2552 = dma.done.wait (!%p2333_p12), %s1941_s2, 384  }
 0xd1d   : > { %2554 = vsyncadd (!%p2333_p12), %s1941_s2, 4294966912  ;;  %s3233_s27 = sld [smem:[#allocation12_spill]]  ;;  %s3234_s1 = sld [smem:[#allocation10_spill]] }
 0xd1e   : > { %s3235_s26 = sld [smem:[#allocation13_spill]]  ;;  %s3236_s24 = smov %s2561_s25 }
 0xd23   : > { %p31_p5 = scmp.ge.s32.totalorder %s3233_s27, 4   ;;  %s3237_s25 = smov %s3234_s1 }
 0xd25   :  { %33 = sbr.rel (!%p31_p5) target bundleno = 11 (0xb), region = 158 }
 0xd2c   :  { %1955 = vsyncpa [#allocation3], 1 }
 0xd2d   :  { %1957 = vsyncpa [#allocation3 + $0x1], 1 }
 0xd2e   :  { %1958 = vsyncpa [#allocation5], 1 }
 0xd2f   :  { %1960 = vsyncpa [#allocation5 + $0x1], 1 }

// kernel: tpu_custom_call.1
= control target key start
LH: loop header
LB: loop body
LE: loop exit
PB: predicated region body
PF: predicated region fallthrough
CT: control target
= control target key end

     0   :  { %s3181_s0 = inlined_call_operand.vmem [shape: f32[2,8,32], index: 0, kind: input, shape index: {}]   ;;  %s3182_s1 = inlined_call_operand.vmem [shape: f32[2,8,32], index: 1, kind: input, shape index: {}]   ;;  %s3183_s2 = inlined_call_operand.vmem [shape: f32[2,1,8], index: 2, kind: input, shape index: {}]   ;;  %s3184_s3 = inlined_call_operand.vmem [shape: bf16[2,32,96], index: 3, kind: input, shape index: {}]   ;;  %s3185_s4 = inlined_call_operand.vmem [shape: f32[2,96], index: 4, kind: input, shape index: {}]   ;;  %s3186_s5 = inlined_call_operand.vmem [shape: bf16[2,32,32], index: 5, kind: input, shape index: {}]   ;;  %s3187_s6 = inlined_call_operand.vmem [shape: f32[2,32], index: 6, kind: input, shape index: {}]   ;;  %s3188_s7 = inlined_call_operand.vmem [shape: f32[1,32], index: 7, kind: input, shape index: {}]   ;;  %s3189_s8 = inlined_call_operand.vmem [shape: f32[1,32], index: 8, kind: input, shape index: {}]   ;;  %s3190_s9 = inlined_call_operand.vmem [shape: bf16[2,32,128], index: 9, kind: input, shape index: {}]   ;;  %s3191_s10 = inlined_call_operand.vmem [shape: f32[2,128], index: 10, kind: input, shape index: {}]   ;;  %s3192_s11 = inlined_call_operand.vmem [shape: bf16[2,128,32], index: 11, kind: input, shape index: {}]   ;;  %s3193_s12 = inlined_call_operand.vmem [shape: f32[2,32], index: 12, kind: input, shape index: {}]   ;;  %s3194_s13 = inlined_call_operand.vmem [shape: f32[2,32], index: 13, kind: input, shape index: {}]   ;;  %s3195_s14 = inlined_call_operand.vmem [shape: f32[2,32], index: 14, kind: input, shape index: {}]   ;;  %s3196_s15 = inlined_call_operand.hbm [shape: f32[2,8,32], index: 15, kind: output, shape index: {0}]   ;;  %s3197_s16 = inlined_call_operand.hbm [shape: f32[2,8,32], index: 16, kind: output, shape index: {1}]   ;;  %s3198_s17 = inlined_call_operand.hbm [shape: f32[2,2,8,8], index: 17, kind: output, shape index: {2}]  }
   0x1   :  { %3209 = sst [smem:[#allocation15_spill]] %s3181_s0 }
   0x2   :  { %3210 = sst [smem:[#allocation16_spill]] %s3182_s1 }
   0x3   :  { %3211 = sst [smem:[#allocation17_spill]] %s3183_s2 }
   0x4   :  { %3212 = sst [smem:[#allocation18_spill]] %s3184_s3 }
   0x5   :  { %3213 = sst [smem:[#allocation19_spill]] %s3185_s4 }
   0x6   :  { %23 = vsyncpa [#allocation3], 0 }
   0x7   :  { %25 = vsyncpa [#allocation3 + $0x1], 0 }
   0x8   :  { %26 = vsyncpa [#allocation5], 0 }
   0x9   :  { %28 = vsyncpa [#allocation5 + $0x1], 0  ;;  %s2674_s24 = smov 0   ;;  %s2676_s25 = smov 0  }
   0xa   :  { %s2678_s26 = smov 0   ;;  %s2680_s27 = smov 0  }
   0xb LB: > { %3214 = sst [smem:[#allocation9_spill]] %s2557_s24  ;;  %s2695_s28 = sadd.s32 4294967295, %s2569_s27   ;;  %s2569_s27 = sphi %s2680_s27, %s3233_s27   ;;  %s2565_s26 = sphi %s2678_s26, %s3235_s26   ;;  %s2561_s25 = sphi %s2676_s25, %s3237_s25   ;;  %s2557_s24 = sphi %s2674_s24, %s3236_s24  }
   0xc   : > { %3215 = sst [smem:[#allocation10_spill]] %s2565_s26  ;;  %s3199_s29 = sadd.s32 4294967294, %s2569_s27  }
   0xd   : > { %3216 = sst [smem:[#allocation11_spill]] %s2569_s27  ;;  %s2699_s0 = sadd.s32 1, %s2569_s27  }
   0xe   : > { %3217 = sst [smem:[#allocation12_spill]] %s2699_s0  ;;  %s371_s30 = sadd.s32 1, %s2565_s26 }
   0xf   : > { %s368_s18 = ssub.s32 %s2569_s27, %s2699_s0  ;;  %p381_p0 = scmp.ne.s32.totalorder %s2565_s26, %s2561_s25 }
  0x10   : > { %p369_p1 = scmp.eq.s32.totalorder %s368_s18, 0  ;;  %p382_p2 = scmp.eq.s32.totalorder %s2695_s28, 1 }
  0x11   : > { %p387_p3 = scmp.ne.s32.totalorder %s2561_s25, %s2557_s24  ;;  %p388_p4 = scmp.eq.s32.totalorder %s3199_s29, 1 }
  0x12   : > { %s2712_s19 = scalar_select %p369_p1, %s2565_s26, %s371_s30  }
  0x13   : > { %p2714_p5 = por %p382_p2, %p381_p0  ;;  %p2718_p6 = por %p388_p4, %p387_p3 }
  0x14   : > { %3218 = sst [smem:[#allocation13_spill]] %s2712_s19  ;;  %p2063_p7 = scmp.ge.s32.totalorder %s2569_s27, 1 }
  0x15   : > { %s3220_s20 = scalar_select %p2718_p6, 1, 0 }
  0x16   : > { %p514_p8 = scmp.lt.s32.totalorder %s2569_s27, 3 }
  0x17   : > { %3221 = sst [smem:[#allocation14_spill]] %s3220_s20 }
  0x18   : > { %p515_p9 = pnand %p2063_p7, %p514_p8 }
  0x19   : > { %s3222_s3 = sld [smem:[#allocation18_spill]] (!%p515_p9)  ;;  %v2571_v1 = vmov (!%p515_p9), 0.0   ;;  %vm2572_vm0 = vmmov (!%p515_p9), 0   ;;  %p582_p10 = scmp.lt.s32.totalorder (!%p515_p9), %s2695_s28, 1  ;;  %vm619_vm1 = vcmask (!%p515_p9), 261120   ;;  %v603_v9 = vlaneseq (!%p515_p9) }
  0x1a   : > { %518 = sbr.rel (%p515_p9) target bundleno = 3342 (0xd0e), region = 80  ;;  %2202 = vmatprep.subr.bf16.mxu1 (!%p515_p9), %v2571_v1  ;;  %2218 = vmatprep.subr.bf16.mxu0 (!%p515_p9), %v2571_v1  ;;  %s3223_s19 = sld [smem:[#allocation15_spill]] (!%p515_p9)  ;;  %vm747_vm5 = vcmask (!%p515_p9), 130048   ;;  %vm872_vm6 = vcmask (!%p515_p9), 64512   ;;  %vm893_vm7 = vcmask (!%p515_p9), 1043456  }
  0x1b   : > { %2206 = vmatprep.mubr.msk.bf16.mxu1 (!%p515_p9), %vm2572_vm0, %v2571_v1  ;;  %2220 = vmatprep.mubr.msk.bf16.mxu0 (!%p515_p9), %vm2572_vm0, %v2571_v1  ;;  %s3224_s0 = sld [smem:[#allocation16_spill]] (!%p515_p9)  ;;  %v604_v10 = vshrl.u32 (!%p515_p9), %v603_v9, 7  ;;  %s3225_s4 = sld [smem:[#allocation19_spill]] (!%p515_p9) }
  0x1c   : > { %s2573_s27 = smov (!%p515_p9), 96   ;;  %s3226_s2 = sld [smem:[#allocation17_spill]] (!%p515_p9) }
  0x1d   : > { %v2771_v11 = vsub.s32 (!%p515_p9), 0, %v604_v10  ;;  %v2779_v17 = vsub.s32 (!%p515_p9), 1, %v604_v10  ;;  %s2577_s30 = smov (!%p515_p9), 80   ;;  %s2845_s29 = sand.u32 (!%p515_p9), 1, %s2561_s25  }
  0x1e   : > { %s2578_s26 = smov (!%p515_p9), 48   ;;  %s3208_s22 = sshll.u32 (!%p515_p9), %s2695_s28, 7 }
  0x1f   : > { %v2385_v0 = vld [vmem:[%s3222_s3] sm:$0xff] (!%p515_p9)   ;;  %v2386_v2 = vld [vmem:[%s3222_s3 + $0x8] sm:$0xff] (!%p515_p9)   ;;  %v2387_v4 = vld [vmem:[%s3222_s3 + $0x10] sm:$0xff] (!%p515_p9)  }
  0x20   : > { %2203 = vmatpush3.bf16.msra.mxu1 (!%p515_p9), %v2385_v0  ;;  %v2388_v7 = vld [vmem:[%s3222_s3 + $0x18] sm:$0xff] (!%p515_p9)  }
  0x21   : > { %2204 = vmatprep.subr.bf16.mxu1 %v2571_v1  ;;  %s2739_s18 = scalar_select %p582_p10, %s2695_s28, 1  ;;  %v597_v12 = vld [vmem:[%s3225_s4] sm:$0x3] }
  0x22   : > { %v606_v13 = vrot.slane %v597_v12, %v2771_v11  ;;  %v672_v20 = vrot.slane %v597_v12, %v2779_v17 }
  0x23   : > { %s2067_s21 = sshll.u32 %s2739_s18, 3 }
  0x24   : > { %2205 = vmatpush3.bf16.msra.mxu1 %v2386_v2  ;;  %s585_s23 = scalar_lea.vmem %s3223_s19, %s2067_s21  ;;  %s589_s20 = scalar_lea.vmem %s3224_s0, %s2067_s21 }
  0x25   : > { %2210 = vmatprep.subr.bf16.mxu1 %v2571_v1  ;;  %v2749_v3 = vld [vmem:[%s585_s23] sm:$0xff]  ;;  %s2574_s0 = smov 16   ;;  %s592_s23 = scalar_lea.vmem %s3226_s2, %s2739_s18 }
  0x26   : > { %v602_v5 = vpack.c.bf16 %v2749_v3, %v2749_v3  ;;  %v2756_v6 = vld [vmem:[%s589_s20] sm:$0xff]  ;;  %s2575_s20 = smov 112   ;;  %s2576_s18 = smov 64  }
  0x27   : > { %v668_v8 = vpack.c.bf16 %v2756_v6, %v2756_v6  ;;  %v2821_v2 = vld [vmem:[%s592_s23] sm:$0x1]  ;;  %s2066_s19 = sshll.u32 %s2845_s29, 4  ;;  %s3207_s21 = sshll.u32 %s2845_s29, 3 }
  0x28   : > { %2207 = vmatmul.mubr.msk.bf16.vlgmr.msra.gmra.mrb[0].mxu1 %vm619_vm1, %v602_v5  ;;  %s2852_s24 = scalar_lea.vmem [#allocation6], %s2066_s19  ;;  %s567_s23 = scalar_lea.vmem [#allocation2], %s3207_s21 }
  0x29   : > { %2211 = vmatpush3.bf16.msra.mxu1 %v2387_v4  ;;  %2214 = vmatprep.mubr.msk.bf16.mxu1 %vm2572_vm0, %v2571_v1 }
  0x2a   : > { %2212 = vmatprep.subr.bf16.mxu1 %v2571_v1 }
  0x2d   : > { %2213 = vmatpush3.bf16.msra.mxu1 %v2388_v7 }
  0x2e   : > { %2224 = vmatprep.subr.bf16.mxu1 %v2571_v1 }
  0x30   : > { %2215 = vmatmul.mubr.msk.bf16.vlgmr.msra.gmra.mrb[4].mxu1 %vm619_vm1, %v668_v8 }
  0x31   : > { %2226 = vmatprep.mubr.msk.bf16.mxu1 %vm2572_vm0, %v2571_v1 }
  0xfb   : > { %v657_v14 = vpop.f32.mrb[0].mxu1 }
  0xfc   : > { %v2777_v15 = vadd.f32 %v657_v14, %v606_v13  ;;  %v2208_v16 = vpop.f32.mrb[1].mxu1 }
  0xfd   : > { %v660_v18 = vpop.f32.mrb[2].mxu1 }
  0xfe   : > { %752 = vrot.lane.b32.xlu0 %v2777_v15, %s2573_s27  ;;  %v2209_v19 = vpop.f32.mrb[3].mxu1  ;;  %v2795_v38 = vmul.f32 %v2777_v15, %v2777_v15  ;;  %v2828_v13 = vpack.c.bf16 %v2777_v15, %v2777_v15 }
 0x100   : > { %v807_v52 = vsel %vm747_vm5, %v2795_v38, 0.0 }
 0x103   : > { %v722_v21 = vpop.f32.mrb[4].mxu1 }
 0x104   : > { %v723_v22 = vadd.f32 %v722_v21, %v672_v20  ;;  %v2216_v23 = vpop.f32.mrb[5].mxu1 }
 0x105   : > { %v725_v24 = vpop.f32.mrb[6].mxu1 }
 0x106   : > { %v729_v25 = vmin.f32 %v723_v22, 0.0  ;;  %v2217_v26 = vpop.f32.mrb[7].mxu1  ;;  %vm728_vm2 = vcmp.gt.f32.partialorder %v723_v22, 0.0 }
 0x108   : > { %v730_v27 = vmul.f32 1.442695, %v729_v25 }
 0x10a   : > { %2413 = vpow2.f32 %v730_v27 }
 0x114   : > { %v2414_v28 = vpop.eup %2413 }
 0x115   : > { %v2079_v29 = vadd.f32 -1.0, %v2414_v28 }
 0x117   : > { %v733_v30 = vsel %vm728_vm2, %v723_v22, %v2079_v29 }
 0x118   : > { %v2784_v31 = vadd.f32 1.0, %v733_v30 }
 0x11a   : > { %v735_v32 = vmax.f32 %v2784_v31, 1e-24  ;;  %v810_v51 = vsel %vm747_vm5, %v2784_v31, 0.0 }
 0x11c   : > { %2415 = vrsqrt.f32 %v735_v32  ;;  %vm738_vm3 = vcmp.eq.f32.partialorder %v735_v32, inf  ;;  %v741_v35 = vand.u32 2147483648, %v735_v32  ;;  %vm740_vm4 = vcmp.eq.f32.partialorder %v735_v32, 0.0 }
 0x126   : > { %v2416_v33 = vpop.eup %2415 }
 0x127   : > { %v737_v34 = vmul.f32 %v2416_v33, %v735_v32 }
 0x129   : > { %v739_v36 = vsel %vm738_vm3, %v735_v32, %v737_v34 }
 0x12a   : > { %v2787_v37 = vsel %vm740_vm4, %v741_v35, %v739_v36 }
 0x12b   : > { %744 = vrot.lane.b32.xlu1 %v2787_v37, %s2574_s0  ;;  %755 = vrot.lane.b32.xlu0 %v2787_v37, %s2575_s20 }
 0x12f   : > { %816 = vrot.lane.b32.xlu1 %v2795_v38, %s2573_s27  ;;  %823 = vrot.lane.b32.xlu0 %v2784_v31, %s2573_s27 }
 0x170   : > { %v753_v39 = vpop.permute.xlu0 %752 }
 0x19d   : > { %v745_v40 = vpop.permute.xlu1 %744  ;;  %v756_v41 = vpop.permute.xlu0 %755 }
 0x19e   : > { %v758_v42 = vsel %vm747_vm5, %v753_v39, %v756_v41  ;;  %v748_v44 = vsel %vm747_vm5, %v2777_v15, %v745_v40 }
 0x19f   : > { %v759_v43 = vpack.c.bf16 %v758_v42, %v758_v42  ;;  %v749_v50 = vmul.f32 0.5, %v748_v44 }
 0x1a1   : > { %v817_v45 = vpop.permute.xlu1 %816  ;;  %v824_v46 = vpop.permute.xlu0 %823  ;;  %v764_v47 = vsel %vm619_vm1, %v759_v43, 0  ;;  %v750_v53 = vpack.c.bf16 %v749_v50, %v749_v50 }
 0x1a2   : > { %2219 = vmatpush3.bf16.xpose.msra.mxu0 %v764_v47  ;;  %v819_v48 = vsel %vm747_vm5, %v817_v45, 0.0  ;;  %v826_v49 = vsel %vm747_vm5, %v824_v46, 0.0 }
 0x1a3   : > { %820 = vadd.xlane.f32.xlu1 %v819_v48  ;;  %827 = vadd.xlane.f32.xlu0 %v826_v49 }
 0x1a4   : > { %2230 = vmatprep.subr.bf16.mxu0 %v2571_v1 }
 0x1a7   : > { %811 = vadd.xlane.f32.xlu1 %v810_v51  ;;  %808 = vadd.xlane.f32.xlu0 %v807_v52 }
 0x1a9   : > { %2221 = vmatmul.mubr.msk.bf16.vlgmr.msra.gmra.mrb[0].mxu0 %vm619_vm1, %v750_v53 }
 0x1aa   : > { %2232 = vmatprep.mubr.msk.bf16.mxu0 %vm2572_vm0, %v2571_v1 }
 0x230   : > { %v821_v54 = vpop.xlane.xlu1 %820  ;;  %v828_v55 = vpop.xlane.xlu0 %827 }
 0x231   : > { %v829_v56 = vadd.f32 %v828_v55, %v821_v54 }
 0x233   : > { %v830_v57 = vmul.f32 0.25, %v829_v56 }
 0x234   : > { %v812_v62 = vpop.xlane.xlu1 %811  ;;  %v809_v63 = vpop.xlane.xlu0 %808 }
 0x235   : > { %831 = vxpose.xlu0.b32.start.end [1/1] (short) (narrow) %v830_v57, 8  ;;  %v813_v0 = vadd.f32 %v812_v62, %v809_v63 }
 0x237   : > { %v814_v5 = vmul.f32 0.25, %v813_v0 }
 0x25e   : > { %1049 = vrot.lane.b32.xlu0 %v2795_v38, %s2575_s20 }
 0x27c   : > { %v800_v58 = vpop.f32.mrb[0].mxu0 }
 0x27d   : > { %v2222_v59 = vpop.f32.mrb[1].mxu0  ;;  %v864_v8 = vsub.f32 %v800_v58, %v814_v5 }
 0x27e   : > { %v803_v60 = vpop.f32.mrb[2].mxu0 }
 0x27f   : > { %v2223_v61 = vpop.f32.mrb[3].mxu0 }
 0x2b5   : > { %v847_v4 = vpop.trf.xlu0 }
 0x2b6   : > { %v863_v7 = vsub.f32 %v2821_v2, %v847_v4 }
 0x2b8   : > { %v869_v9 = vrot.slane %v863_v7, %v2771_v11 }
 0x2ba   : > { %v871_v10 = vadd.f32 %v869_v9, %v864_v8 }
 0x2bc   : > { %v873_v12 = vsel %vm872_vm6, %v871_v10, -inf }
 0x2bd   : > { %874 = vmax.xlane.f32.xlu1 %v873_v12  ;;  %v939_v12 = vpack.c.bf16 %v2784_v31, %v2784_v31 }
 0x2ce   : > { %888 = vrot.lane.b32.xlu1 %v2828_v13, %s2576_s18 }
 0x2d0   : > { %v1050_v29 = vpop.permute.xlu0 %1049 }
 0x2d1   : > { %v1052_v36 = vsel %vm747_vm5, %v1050_v29, 0.0  ;;  %v2392_v29 = vld [vmem:[%s3186_s5 + $0x18] sm:$0xff]  }
 0x2d2   : > { %995 = vrot.lane.b32.xlu1 %v2777_v15, %s2577_s30 }
 0x2d6   : > { %998 = vrot.lane.b32.xlu1 %v2787_v37, %s2573_s27 }
 0x34a   : > { %v875_v14 = vpop.xlane.xlu1 %874 }
 0x34b   : > { %v876_v16 = vsub.f32 %v871_v10, %v875_v14 }
 0x34d   : > { %v877_v18 = vmul.f32 1.442695, %v876_v16 }
 0x34e   : > { %v889_v19 = vpop.permute.xlu1 %888 }
 0x34f   : > { %2417 = vpow2.f32 %v877_v18  ;;  %v895_v20 = vsel %vm893_vm7, %v889_v19, 0 }
 0x350   : > { %2225 = vmatpush3.bf16.msra.mxu1 %v895_v20 }
 0x351   : > { %2236 = vmatprep.subr.bf16.mxu1 %v2571_v1 }
 0x352   : > { %v996_v23 = vpop.permute.xlu1 %995 }
 0x356   : > { %v999_v24 = vpop.permute.xlu1 %998 }
 0x357   : > { %v1001_v28 = vsel %vm747_vm5, %v996_v23, %v999_v24 }
 0x358   : > { %v1002_v32 = vpack.c.bf16 %v1001_v28, %v1001_v28  ;;  %v2390_v28 = vld [vmem:[%s3186_s5 + $0x8] sm:$0xff]  }
 0x359   : > { %v2418_v21 = vpop.eup %2417 }
 0x35a   : > { %v879_v22 = vsel %vm872_vm6, %v2418_v21, 0.0  ;;  %v1007_v40 = vsel %vm619_vm1, %v1002_v32, 0 }
 0x35b   : > { %880 = vadd.xlane.f32.xlu1 %v879_v22 }
 0x36c   : > { %989 = vrot.lane.b32.xlu1 %v2777_v15, %s2575_s20 }
 0x370   : > { %1063 = vrot.lane.b32.xlu1 %v2795_v38, %s2577_s30 }
 0x374   : > { %1069 = vrot.lane.b32.xlu1 %v2784_v31, %s2577_s30 }
 0x378   : > { %1055 = vrot.lane.b32.xlu1 %v2784_v31, %s2575_s20  ;;  %s2579_s20 = smov [#allocation2]  }
 0x379   : > { %s2451_s21 = sshll.u32 %s2579_s20, 4  ;;  %s2452_s21 = int_to_ptr.vmem [resolvable:$false] %s2451_s21 }
 0x37a   : > { %s2453_s30 = scalar_lea.vmem %s2452_s21, 256 }
 0x3e8   : > { %v881_v25 = vpop.xlane.xlu1 %880 }
 0x3e9   : > { %2419 = vrcp.f32 %v881_v25 }
 0x3ec   : > { %v990_v26 = vpop.permute.xlu1 %989 }
 0x3ed   : > { %v992_v39 = vsel %vm747_vm5, %v990_v26, %v2787_v37 }
 0x3ee   : > { %v993_v43 = vmul.f32 0.5, %v992_v39 }
 0x3f0   : > { %v1064_v27 = vpop.permute.xlu1 %1063  ;;  %v994_v44 = vpack.c.bf16 %v993_v43, %v993_v43 }
 0x3f1   : > { %v1066_v15 = vsel %vm747_vm5, %v1064_v27, 0.0  ;;  %v2389_v27 = vld [vmem:[%s3186_s5] sm:$0xff]  }
 0x3f2   : > { %1067 = vadd.xlane.f32.xlu1 %v1066_v15  ;;  %v2391_v15 = vld [vmem:[%s3186_s5 + $0x10] sm:$0xff]  }
 0x3f3   : > { %v2420_v30 = vpop.eup %2419 }
 0x3f4   : > { %v883_v33 = vmul.f32 %v2420_v30, %v2418_v21  ;;  %v1070_v34 = vpop.permute.xlu1 %1069 }
 0x3f5   : > { %v1072_v35 = vsel %vm747_vm5, %v1070_v34, 0.0 }
 0x3f6   : > { %1073 = vadd.xlane.f32.xlu0 %v1072_v35  ;;  %1053 = vadd.xlane.f32.xlu1 %v1052_v36  ;;  %v885_v38 = vpack.c.bf16 %v883_v33, %v883_v33  ;;  %884 = vst.msk [vmem:[%s2852_s24] sm:$0xff] %vm872_vm6, %v883_v33 }
 0x3f8   : > { %2227 = vmatmul.mubr.msk.bf16.vlgmr.msra.gmra.mrb[8].mxu1 %vm872_vm6, %v885_v38  ;;  %v1056_v41 = vpop.permute.xlu1 %1055 }
 0x3f9   : > { %2237 = vmatpush3.bf16.xpose.msra.mxu1 %v1007_v40  ;;  %v1058_v42 = vsel %vm747_vm5, %v1056_v41, 0.0  ;;  %2238 = vmatprep.mubr.msk.bf16.mxu1 %vm2572_vm0, %v2571_v1 }
 0x3fa   : > { %1059 = vadd.xlane.f32.xlu1 %v1058_v42  ;;  %2248 = vmatprep.subr.bf16.mxu1 %v2571_v1 }
 0x400   : > { %2239 = vmatmul.mubr.msk.bf16.vlgmr.msra.gmra.mrb[12].mxu1 %vm619_vm1, %v994_v44 }
 0x401   : > { %2250 = vmatprep.mubr.msk.bf16.mxu1 %vm2572_vm0, %v2571_v1 }
 0x47f   : > { %v1068_v37 = vpop.xlane.xlu1 %1067 }
 0x483   : > { %v1074_v45 = vpop.xlane.xlu0 %1073  ;;  %v1054_v56 = vpop.xlane.xlu1 %1053 }
 0x484   : > { %v1075_v46 = vadd.f32 %v1074_v45, %v1068_v37 }
 0x486   : > { %v1076_v47 = vmul.f32 0.25, %v1075_v46 }
 0x487   : > { %v1060_v57 = vpop.xlane.xlu1 %1059 }
 0x488   : > { %1077 = vxpose.xlu1.b32.start.end [1/1] (short) (narrow) %v1076_v47, 8  ;;  %v1061_v58 = vadd.f32 %v1060_v57, %v1054_v56 }
 0x48a   : > { %v1062_v60 = vmul.f32 0.25, %v1061_v58 }
 0x4a6   : > { %1132 = vrot.lane.b32.xlu1 %v2828_v13, %s2578_s26  ;;  %v937_v13 = vmul.f32 %v883_v33, %v883_v33 }
 0x4a8   : > { %v938_v19 = vpack.c.bf16 %v937_v13, %v937_v13 }
 0x4cb   : > { %v2869_v48 = vpop.f32.mrb[8].mxu1 }
 0x4cc   : > { %v2228_v49 = vpop.f32.mrb[9].mxu1 }
 0x4cd   : > { %v934_v50 = vpop.f32.mrb[10].mxu1 }
 0x4ce   : > { %v2229_v51 = vpop.f32.mrb[11].mxu1  ;;  %v1240_v50 = vld [vmem:[%s3187_s6] sm:$0x3] }
 0x4d3   : > { %v1043_v52 = vpop.f32.mrb[12].mxu1 }
 0x4d4   : > { %v2240_v53 = vpop.f32.mrb[13].mxu1  ;;  %v1110_v62 = vsub.f32 %v1043_v52, %v1062_v60 }
 0x4d5   : > { %v1046_v54 = vpop.f32.mrb[14].mxu1 }
 0x4d6   : > { %v2241_v55 = vpop.f32.mrb[15].mxu1  ;;  %v1314_v54 = vrot.slane %v1240_v50, %v2779_v17 }
 0x508   : > { %v1093_v59 = vpop.trf.xlu1 }
 0x509   : > { %v1109_v61 = vsub.f32 %v2821_v2, %v1093_v59 }
 0x50b   : > { %v1115_v63 = vrot.slane %v1109_v61, %v2771_v11 }
 0x50d   : > { %v1117_v0 = vadd.f32 %v1115_v63, %v1110_v62 }
 0x50f   : > { %v1118_v4 = vsel %vm872_vm6, %v1117_v0, -inf }
 0x510   : > { %1119 = vmax.xlane.f32.xlu0 %v1118_v4 }
 0x518   : > { %v1133_v18 = vpop.permute.xlu1 %1132 }
 0x519   : > { %v1138_v21 = vsel %vm893_vm7, %v1133_v18, 0  ;;  %v2397_v18 = vld [vmem:[%s3192_s11] sm:$0xff]  }
 0x59d   : > { %v1120_v5 = vpop.xlane.xlu0 %1119 }
 0x59e   : > { %v1121_v7 = vsub.f32 %v1117_v0, %v1120_v5 }
 0x5a0   : > { %v1122_v8 = vmul.f32 1.442695, %v1121_v7 }
 0x5a2   : > { %2421 = vpow2.f32 %v1122_v8 }
 0x5ac   : > { %v2422_v9 = vpop.eup %2421 }
 0x5ad   : > { %v1124_v10 = vsel %vm872_vm6, %v2422_v9, 0.0 }
 0x5ae   : > { %1125 = vadd.xlane.f32.xlu0 %v1124_v10 }
 0x5c4   : > { %941 = vrot.lane.b32.xlu0 %v939_v12, %s2576_s18  ;;  %s1890_s18 = sshll.u32 %s567_s23, 4  ;;  %s3069_s18 = int_to_ptr.vmem [resolvable:$true] %s1890_s18 }
 0x5c5   : > { %s2447_s27 = scalar_lea.vmem %s3069_s18, 128  ;;  %p2454_p0 = scmp.lt.s32.totalorder %s3069_s18, %s2452_s21 }
 0x5c6   : > { %p2448_p11 = scmp.ne.s32.totalorder %s3069_s18, %s2447_s27  ;;  %p2455_p1 = scmp.lt.s32.totalorder %s2453_s30, %s2447_s27 }
 0x5c8   : > { %1182 = vrot.lane.b32.xlu0 %v939_v12, %s2578_s26  ;;  %s1867_s26 = scalar_lea.sflag [#allocation3], %s2845_s29  ;;  %p2449_p12 = pnand %p2448_p11, %p2714_p5 }
 0x5c9   : > { %p2456_p2 = por %p2455_p1, %p2454_p0 }
 0x5ca   : > { %p2450_p13 = pneg %p2449_p12 }
 0x5cc   : > { %p2457_p3 = pnand %p2456_p2, %p2450_p13 }
 0x63b   : > { %v1126_v2 = vpop.xlane.xlu0 %1125 }
 0x63c   : > { %2423 = vrcp.f32 %v1126_v2 }
 0x63f   : > { %v942_v14 = vpop.permute.xlu0 %941 }
 0x640   : > { %v947_v16 = vsel %vm893_vm7, %v942_v14, 0 }
 0x641   : > { %2231 = vmatpush3.bf16.msra.mxu0 %v947_v16  ;;  %v2394_v16 = vld [vmem:[%s3190_s9 + $0x8] sm:$0xff]  }
 0x642   : > { %2242 = vmatprep.subr.bf16.mxu0 %v2571_v1 }
 0x643   : > { %v1183_v20 = vpop.permute.xlu0 %1182 }
 0x644   : > { %v1188_v31 = vsel %vm893_vm7, %v1183_v20, 0  ;;  %2233 = vmatmul.mubr.msk.bf16.vlgmr.msra.gmra.mrb[4].mxu0 %vm872_vm6, %v938_v19  ;;  %v2398_v19 = vld [vmem:[%s3192_s11 + $0x8] sm:$0xff]  }
 0x645   : > { %2243 = vmatpush3.bf16.msra.mxu0 %v1138_v21  ;;  %2249 = vmatpush3.bf16.msra.mxu1 %v1188_v31 }
 0x646   : > { %v2424_v22 = vpop.eup %2423  ;;  %2244 = vmatprep.mubr.msk.bf16.mxu0 %vm2572_vm0, %v2571_v1  ;;  %2254 = vmatprep.subr.bf16.mxu0 %v2571_v1 }
 0x647   : > { %v1128_v23 = vmul.f32 %v2424_v22, %v2422_v9  ;;  %2262 = vmatprep.subr.bf16.mxu1 %v2571_v1 }
 0x649   : > { %v1131_v24 = vpack.c.bf16 %v1128_v23, %v1128_v23  ;;  %v1180_v25 = vmul.f32 %v1128_v23, %v1128_v23  ;;  %2084 = vst.msk [vmem:[%s2852_s24 + $0x8] sm:$0xff] %vm872_vm6, %v1128_v23 }
 0x64b   : > { %v1181_v26 = vpack.c.bf16 %v1180_v25, %v1180_v25 }
 0x64c   : > { %2245 = vmatmul.mubr.msk.bf16.vlgmr.msra.gmra.mrb[8].mxu0 %vm872_vm6, %v1131_v24 }
 0x64d   : > { %2251 = vmatmul.mubr.msk.bf16.vlgmr.msra.gmra.mrb[16].mxu1 %vm872_vm6, %v1181_v26  ;;  %2258 = vmatprep.mubr.msk.bf16.mxu0 %vm2572_vm0, %v2571_v1 }
 0x64e   : > { %2266 = vmatprep.mubr.msk.bf16.mxu1 %vm2572_vm0, %v2571_v1  ;;  %2255 = vmatpush3.bf16.msra.mxu0 %v2389_v27 }
 0x64f   : > { %2256 = vmatprep.subr.bf16.mxu0 %v2571_v1  ;;  %2263 = vmatpush3.bf16.msra.mxu1 %v2391_v15 }
 0x650   : > { %2264 = vmatprep.subr.bf16.mxu1 %v2571_v1 }
 0x652   : > { %2257 = vmatpush3.bf16.msra.mxu0 %v2390_v28 }
 0x653   : > { %2270 = vmatprep.subr.bf16.mxu0 %v2571_v1  ;;  %2265 = vmatpush3.bf16.msra.mxu1 %v2392_v29 }
 0x654   : > { %2278 = vmatprep.subr.bf16.mxu1 %v2571_v1 }
 0x717   : > { %v983_v30 = vpop.f32.mrb[4].mxu0 }
 0x718   : > { %v2234_v32 = vpop.f32.mrb[5].mxu0 }
 0x719   : > { %v986_v33 = vpop.f32.mrb[6].mxu0 }
 0x71a   : > { %v2235_v34 = vpop.f32.mrb[7].mxu0 }
 0x71f   : > { %v1174_v35 = vpop.f32.mrb[8].mxu0 }
 0x720   : > { %1231 = vrot.lane.b32.xlu0 %v1174_v35, %s2574_s0  ;;  %v2246_v36 = vpop.f32.mrb[9].mxu0  ;;  %v1224_v38 = vpop.f32.mrb[16].mxu1 }
 0x721   : > { %v1177_v39 = vpop.f32.mrb[10].mxu0  ;;  %v2252_v40 = vpop.f32.mrb[17].mxu1  ;;  %v2097_v36 = vld [vmem:[%s3188_s7] ss:$0 sm:$0xff] }
 0x722   : > { %v2247_v41 = vpop.f32.mrb[11].mxu0  ;;  %v1227_v42 = vpop.f32.mrb[18].mxu1  ;;  %v2098_v39 = vld [vmem:[%s3189_s8] ss:$0 sm:$0xff] }
 0x723   : > { %v2253_v43 = vpop.f32.mrb[19].mxu1 }
 0x724   : > { %1236 = vrot.lane.b32.xlu0 %v1224_v38, %s2574_s0  ;;  %v2395_v43 = vld [vmem:[%s3190_s9 + $0x10] sm:$0xff]   ;;  %s3067_s0 = scalar_lea.hbm %s3196_s15, %s3208_s22 }
 0x792   : > { %v1232_v44 = vpop.permute.xlu0 %1231 }
 0x793   : > { %v1234_v37 = vsel %vm747_vm5, %v2869_v48, %v1232_v44  ;;  %v1249_v48 = vrot.slane %v1240_v50, %v2771_v11  ;;  %v2399_v50 = vld [vmem:[%s3192_s11 + $0x10] sm:$0xff]  }
 0x794   : > { %v1245_v45 = vpack.c.bf16 %v1234_v37, %v1234_v37 }
 0x796   : > { %2259 = vmatmul.mubr.msk.bf16.vlgmr.msra.gmra.mrb[12].mxu0 %vm619_vm1, %v1245_v45  ;;  %v1237_v46 = vpop.permute.xlu0 %1236 }
 0x797   : > { %v1239_v47 = vsel %vm747_vm5, %v983_v30, %v1237_v46  ;;  %2274 = vmatprep.mubr.msk.bf16.mxu0 %vm2572_vm0, %v2571_v1  ;;  %v2396_v46 = vld [vmem:[%s3190_s9 + $0x18] sm:$0xff]  }
 0x798   : > { %v1310_v49 = vpack.c.bf16 %v1239_v47, %v1239_v47 }
 0x79a   : > { %2267 = vmatmul.mubr.msk.bf16.vlgmr.msra.gmra.mrb[20].mxu1 %vm619_vm1, %v1310_v49 }
 0x79b   : > { %2294 = vmatprep.mubr.msk.bf16.mxu1 %vm2572_vm0, %v2571_v1  ;;  %2279 = vmatpush3.bf16.msra.mxu1 %v2397_v18 }
 0x79c   : > { %2280 = vmatprep.subr.bf16.mxu1 %v2571_v1 }
 0x79f   : > { %2281 = vmatpush3.bf16.msra.mxu1 %v2398_v19 }
 0x7a0   : > { %2282 = vmatprep.subr.bf16.mxu1 %v2571_v1 }
 0x7a3   : > { %2283 = vmatpush3.bf16.msra.mxu1 %v2399_v50 }
 0x7a4   : > { %2284 = vmatprep.subr.bf16.mxu1 %v2571_v1 }
 0x869   : > { %v1299_v51 = vpop.f32.mrb[12].mxu0 }
 0x86a   : > { %v1300_v52 = vadd.f32 %v1299_v51, %v1249_v48  ;;  %v2260_v53 = vpop.f32.mrb[13].mxu0  ;;  %v2400_v48 = vld [vmem:[%s3192_s11 + $0x40] sm:$0xff]   ;;  %v2401_v51 = vld [vmem:[%s3192_s11 + $0x18] sm:$0xff]  }
 0x86b   : > { %v1302_v55 = vpop.f32.mrb[14].mxu0  ;;  %2285 = vmatpush3.bf16.msra.mxu1 %v2401_v51  ;;  %v2403_v53 = vld [vmem:[%s3192_s11 + $0x20] sm:$0xff]  }
 0x86c   : > { %v2261_v56 = vpop.f32.mrb[15].mxu0  ;;  %v1372_v57 = vadd.f32 %v1300_v52, %v2749_v3  ;;  %v2402_v52 = vld [vmem:[%s3192_s11 + $0x48] sm:$0xff]   ;;  %2286 = vmatprep.subr.bf16.mxu1 %v2571_v1 }
 0x86d   : > { %v1364_v58 = vpop.f32.mrb[20].mxu1  ;;  %v2405_v55 = vld [vmem:[%s3192_s11 + $0x28] sm:$0xff]   ;;  %v2406_v56 = vld [vmem:[%s3192_s11 + $0x58] sm:$0xff]  }
 0x86e   : > { %v1365_v59 = vadd.f32 %v1364_v58, %v1314_v54  ;;  %v2268_v60 = vpop.f32.mrb[21].mxu1  ;;  %v1373_v61 = vsel %vm619_vm1, %v1372_v57, 0.0  ;;  %v2404_v54 = vld [vmem:[%s3192_s11 + $0x50] sm:$0xff]   ;;  %v2408_v58 = vld [vmem:[%s3192_s11 + $0x60] sm:$0xff]  }
 0x86f   : > { %1374 = vadd.xlane.f32.xlu0 %v1373_v61  ;;  %v1367_v62 = vpop.f32.mrb[22].mxu1  ;;  %2287 = vmatpush3.bf16.msra.mxu1 %v2403_v53  ;;  %v2410_v60 = vld [vmem:[%s3192_s11 + $0x68] sm:$0xff]   ;;  %v2411_v61 = vld [vmem:[%s3192_s11 + $0x70] sm:$0xff]  }
 0x870   : > { %v2269_v63 = vpop.f32.mrb[23].mxu1  ;;  %v1408_v0 = vadd.f32 %v1365_v59, %v2756_v6  ;;  %v2393_v6 = vld [vmem:[%s3190_s9] sm:$0xff]   ;;  %2288 = vmatprep.subr.bf16.mxu1 %v2571_v1  ;;  %v2409_v59 = vld [vmem:[%s3192_s11 + $0x38] sm:$0xff]  }
 0x871   : > { %2271 = vmatpush3.bf16.msra.mxu0 %v2393_v6  ;;  %v2412_v62 = vld [vmem:[%s3192_s11 + $0x78] sm:$0xff]   ;;  %v1431_v63 = vld [vmem:[%s3191_s10] sm:$0x3] }
 0x872   : > { %v1409_v4 = vsel %vm619_vm1, %v1408_v0, 0.0  ;;  %2272 = vmatprep.subr.bf16.mxu0 %v2571_v1 }
 0x873   : > { %1410 = vadd.xlane.f32.xlu1 %v1409_v4  ;;  %2289 = vmatpush3.bf16.msra.mxu1 %v2405_v55 }
 0x874   : > { %2290 = vmatprep.subr.bf16.mxu1 %v2571_v1 }
 0x875   : > { %2273 = vmatpush3.bf16.msra.mxu0 %v2394_v16 }
 0x876   : > { %2298 = vmatprep.subr.bf16.mxu0 %v2571_v1 }
 0x8fc   : > { %v1375_v5 = vpop.xlane.xlu0 %1374 }
 0x8fd   : > { %v1377_v7 = vmul.f32 0.03125, %v1375_v5 }
 0x8ff   : > { %v1378_v8 = vsub.f32 %v1372_v57, %v1377_v7  ;;  %v2407_v57 = vld [vmem:[%s3192_s11 + $0x30] sm:$0xff]  }
 0x900   : > { %v1411_v9 = vpop.xlane.xlu1 %1410  ;;  %2291 = vmatpush3.bf16.msra.mxu1 %v2407_v57 }
 0x901   : > { %v1412_v10 = vmul.f32 0.03125, %v1411_v9  ;;  %v1379_v12 = vmul.f32 %v1378_v8, %v1378_v8  ;;  %2292 = vmatprep.subr.bf16.mxu1 %v2571_v1 }
 0x903   : > { %v1413_v3 = vsub.f32 %v1408_v0, %v1412_v10  ;;  %v1380_v2 = vsel %vm619_vm1, %v1379_v12, 0.0  ;;  %v1443_v0 = vrot.slane %v1431_v63, %v2771_v11 }
 0x904   : > { %1381 = vadd.xlane.f32.xlu0 %v1380_v2  ;;  %2293 = vmatpush3.bf16.msra.mxu1 %v2409_v59 }
 0x905   : > { %v1414_v13 = vmul.f32 %v1413_v3, %v1413_v3 }
 0x907   : > { %v1415_v14 = vsel %vm619_vm1, %v1414_v13, 0.0 }
 0x908   : > { %1416 = vadd.xlane.f32.xlu0 %v1415_v14 }
 0x991   : > { %v1382_v20 = vpop.xlane.xlu0 %1381 }
 0x992   : > { %v1383_v21 = vmul.f32 0.03125, %v1382_v20 }
 0x994   : > { %v1384_v31 = vadd.f32 1e-12, %v1383_v21 }
 0x995   : > { %v1417_v22 = vpop.xlane.xlu0 %1416 }
 0x996   : > { %2425 = vrsqrt.f32 %v1384_v31  ;;  %v1418_v23 = vmul.f32 0.03125, %v1417_v22  ;;  %vm1387_vm8 = vcmp.eq.f32.partialorder %v1384_v31, inf  ;;  %v1390_v27 = vand.u32 2147483648, %v1384_v31 }
 0x997   : > { %vm1389_vm9 = vcmp.eq.f32.partialorder %v1384_v31, 0.0 }
 0x998   : > { %v1419_v24 = vadd.f32 1e-12, %v1418_v23 }
 0x99a   : > { %2427 = vrsqrt.f32 %v1419_v24  ;;  %vm1422_vm10 = vcmp.eq.f32.partialorder %v1419_v24, inf  ;;  %v1425_v32 = vand.u32 2147483648, %v1419_v24  ;;  %vm1424_vm11 = vcmp.eq.f32.partialorder %v1419_v24, 0.0 }
 0x9a0   : > { %v2426_v25 = vpop.eup %2425 }
 0x9a1   : > { %v1386_v26 = vmul.f32 %v2426_v25, %v1384_v31 }
 0x9a3   : > { %v1388_v28 = vsel %vm1387_vm8, %v1384_v31, %v1386_v26 }
 0x9a4   : > { %v1391_v15 = vsel %vm1389_vm9, %v1390_v27, %v1388_v28  ;;  %v2428_v29 = vpop.eup %2427  ;;  %v1432_v28 = vld [vmem:[%s3193_s12] sm:$0x3] }
 0x9a5   : > { %2429 = vrcp.f32 %v1391_v15  ;;  %v1421_v30 = vmul.f32 %v2428_v29, %v1419_v24 }
 0x9a7   : > { %v1423_v33 = vsel %vm1422_vm10, %v1419_v24, %v1421_v30  ;;  %v1525_v30 = vrot.slane %v1432_v28, %v2771_v11 }
 0x9a8   : > { %v1426_v34 = vsel %vm1424_vm11, %v1425_v32, %v1423_v33  ;;  %v1738_v32 = vrot.slane %v1432_v28, %v2779_v17 }
 0x9a9   : > { %2431 = vrcp.f32 %v1426_v34 }
 0x9af   : > { %v2430_v35 = vpop.eup %2429 }
 0x9b0   : > { %v1393_v38 = vmul.f32 %v2430_v35, %v1378_v8 }
 0x9b2   : > { %v1400_v40 = vmul.f32 %v2097_v36, %v1393_v38 }
 0x9b3   : > { %v2432_v41 = vpop.eup %2431 }
 0x9b4   : > { %v2956_v42 = vadd.f32 %v2098_v39, %v1400_v40  ;;  %v1428_v44 = vmul.f32 %v2432_v41, %v1413_v3 }
 0x9b6   : > { %v1439_v37 = vpack.c.bf16 %v2956_v42, %v2956_v42  ;;  %v1429_v45 = vmul.f32 %v2097_v36, %v1428_v44 }
 0x9b8   : > { %2275 = vmatmul.mubr.msk.bf16.vlgmr.msra.gmra.mrb[16].mxu0 %vm619_vm1, %v1439_v37  ;;  %v2970_v47 = vadd.f32 %v2098_v39, %v1429_v45 }
 0x9b9   : > { %2299 = vmatpush3.bf16.msra.mxu0 %v2395_v43  ;;  %2302 = vmatprep.mubr.msk.bf16.mxu0 %vm2572_vm0, %v2571_v1 }
 0x9ba   : > { %2300 = vmatprep.subr.bf16.mxu0 %v2571_v1  ;;  %v1651_v49 = vpack.c.bf16 %v2970_v47, %v2970_v47 }
 0x9bd   : > { %2301 = vmatpush3.bf16.msra.mxu0 %v2396_v46 }
 0x9be   : > { %2306 = vmatprep.subr.bf16.mxu0 %v2571_v1 }
 0x9c0   : > { %2303 = vmatmul.mubr.msk.bf16.vlgmr.msra.gmra.mrb[20].mxu0 %vm619_vm1, %v1651_v49 }
 0x9c1   : > { %2322 = vmatprep.mubr.msk.bf16.mxu0 %vm2572_vm0, %v2571_v1  ;;  %2307 = vmatpush3.bf16.msra.mxu0 %v2400_v48 }
 0x9c2   : > { %2308 = vmatprep.subr.bf16.mxu0 %v2571_v1 }
 0x9c5   : > { %2309 = vmatpush3.bf16.msra.mxu0 %v2402_v52 }
 0x9c6   : > { %2310 = vmatprep.subr.bf16.mxu0 %v2571_v1 }
 0x9c9   : > { %2311 = vmatpush3.bf16.msra.mxu0 %v2404_v54 }
 0x9ca   : > { %2312 = vmatprep.subr.bf16.mxu0 %v2571_v1 }
 0x9cd   : > { %2313 = vmatpush3.bf16.msra.mxu0 %v2406_v56 }
 0x9ce   : > { %2314 = vmatprep.subr.bf16.mxu0 %v2571_v1 }
 0x9d1   : > { %2315 = vmatpush3.bf16.msra.mxu0 %v2408_v58 }
 0x9d2   : > { %2316 = vmatprep.subr.bf16.mxu0 %v2571_v1 }
 0x9d5   : > { %2317 = vmatpush3.bf16.msra.mxu0 %v2410_v60 }
 0x9d6   : > { %2318 = vmatprep.subr.bf16.mxu0 %v2571_v1 }
 0x9d9   : > { %2319 = vmatpush3.bf16.msra.mxu0 %v2411_v61 }
 0x9da   : > { %2320 = vmatprep.subr.bf16.mxu0 %v2571_v1  ;;  %v1655_v1 = vrot.slane %v1431_v63, %v2779_v17 }
 0x9dd   : > { %2321 = vmatpush3.bf16.msra.mxu0 %v2412_v62 }
 0xa8b   : > { %v1493_v4 = vpop.f32.mrb[16].mxu0 }
 0xa8c   : > { %v1494_v5 = vadd.f32 %v1493_v4, %v1443_v0  ;;  %v2276_v7 = vpop.f32.mrb[17].mxu0 }
 0xa8d   : > { %v1496_v8 = vpop.f32.mrb[18].mxu0 }
 0xa8e   : > { %v1500_v9 = vmin.f32 %v1494_v5, 0.0  ;;  %v2277_v10 = vpop.f32.mrb[19].mxu0  ;;  %vm1499_vm12 = vcmp.gt.f32.partialorder %v1494_v5, 0.0 }
 0xa8f   : > { %v1434_v10 = vld [vmem:[%s3195_s14] sm:$0x3] }
 0xa90   : > { %v1501_v12 = vmul.f32 1.442695, %v1500_v9  ;;  %v1433_v9 = vld [vmem:[%s3194_s13] sm:$0x3] }
 0xa92   : > { %2433 = vpow2.f32 %v1501_v12  ;;  %v1851_v12 = vrot.slane %v1433_v9, %v2779_v17 }
 0xa93   : > { %v1705_v3 = vpop.f32.mrb[20].mxu0 }
 0xa94   : > { %v1706_v2 = vadd.f32 %v1705_v3, %v1655_v1  ;;  %v2304_v13 = vpop.f32.mrb[21].mxu0 }
 0xa95   : > { %v1708_v14 = vpop.f32.mrb[22].mxu0 }
 0xa96   : > { %v1712_v6 = vmin.f32 %v1706_v2, 0.0  ;;  %v2305_v16 = vpop.f32.mrb[23].mxu0  ;;  %vm1711_vm13 = vcmp.gt.f32.partialorder %v1706_v2, 0.0  ;;  %v1638_v14 = vrot.slane %v1433_v9, %v2771_v11 }
 0xa98   : > { %v1713_v18 = vmul.f32 1.442695, %v1712_v6 }
 0xa9a   : > { %2435 = vpow2.f32 %v1713_v18 }
 0xa9c   : > { %v2434_v19 = vpop.eup %2433 }
 0xa9d   : > { %v2102_v20 = vadd.f32 -1.0, %v2434_v19  ;;  %v1643_v19 = vrot.slane %v1434_v10, %v2771_v11 }
 0xa9f   : > { %v1504_v21 = vsel %vm1499_vm12, %v1494_v5, %v2102_v20 }
 0xaa0   : > { %v1521_v31 = vpack.c.bf16 %v1504_v21, %v1504_v21 }
 0xaa2   : > { %2295 = vmatmul.mubr.bf16.vlgmr.msra.gmra.mrb[24].mxu1 %v1521_v31 }
 0xaa4   : > { %v2436_v22 = vpop.eup %2435 }
 0xaa5   : > { %v2118_v23 = vadd.f32 -1.0, %v2436_v22 }
 0xaa7   : > { %v1716_v24 = vsel %vm1711_vm13, %v1706_v2, %v2118_v23  ;;  %v1856_v2 = vrot.slane %v1434_v10, %v2779_v17 }
 0xaa8   : > { %v1734_v25 = vpack.c.bf16 %v1716_v24, %v1716_v24 }
 0xaaa   : > { %2323 = vmatmul.mubr.bf16.vlgmr.msra.gmra.mrb[24].mxu0 %v1734_v25 }
 0xb75   : > { %v1608_v26 = vpop.f32.mrb[24].mxu1 }
 0xb76   : > { %v2296_v27 = vpop.f32.mrb[25].mxu1  ;;  %v1609_v34 = vadd.f32 %v1608_v26, %v1525_v30 }
 0xb77   : > { %v1611_v15 = vpop.f32.mrb[26].mxu1 }
 0xb78   : > { %v2297_v29 = vpop.f32.mrb[27].mxu1  ;;  %v1614_v43 = vadd.f32 %v1609_v34, %v2956_v42 }
 0xb7a   : > { %v1615_v44 = vsel %vm619_vm1, %v1614_v43, 0.0 }
 0xb7d   : > { %v1821_v33 = vpop.f32.mrb[24].mxu0 }
 0xb7e   : > { %v1822_v35 = vadd.f32 %v1821_v33, %v1738_v32  ;;  %v2324_v36 = vpop.f32.mrb[25].mxu0 }
 0xb7f   : > { %v1824_v38 = vpop.f32.mrb[26].mxu0 }
 0xb80   : > { %v2325_v39 = vpop.f32.mrb[27].mxu0  ;;  %v1827_v40 = vadd.f32 %v1822_v35, %v2970_v47 }
 0xb82   : > { %v1828_v41 = vsel %vm619_vm1, %v1827_v40, 0.0 }
 0xb83   : > { %1829 = vadd.xlane.f32.xlu0 %v1828_v41 }
 0xb87   : > { %1616 = vadd.xlane.f32.xlu0 %v1615_v44 }
 0xc10   : > { %v1830_v37 = vpop.xlane.xlu0 %1829 }
 0xc11   : > { %v1831_v45 = vmul.f32 0.03125, %v1830_v37 }
 0xc13   : > { %v1832_v46 = vsub.f32 %v1827_v40, %v1831_v45 }
 0xc14   : > { %v1617_v49 = vpop.xlane.xlu0 %1616 }
 0xc15   : > { %v1618_v50 = vmul.f32 0.03125, %v1617_v49  ;;  %v1833_v48 = vmul.f32 %v1832_v46, %v1832_v46 }
 0xc17   : > { %v1619_v51 = vsub.f32 %v1614_v43, %v1618_v50  ;;  %v1834_v52 = vsel %vm619_vm1, %v1833_v48, 0.0 }
 0xc18   : > { %1835 = vadd.xlane.f32.xlu0 %v1834_v52 }
 0xc19   : > { %v1620_v53 = vmul.f32 %v1619_v51, %v1619_v51 }
 0xc1b   : > { %v1621_v47 = vsel %vm619_vm1, %v1620_v53, 0.0 }
 0xc1c   : > { %1622 = vadd.xlane.f32.xlu0 %v1621_v47 }
 0xca5   : > { %v1836_v54 = vpop.xlane.xlu0 %1835 }
 0xca6   : > { %v1837_v42 = vmul.f32 0.03125, %v1836_v54 }
 0xca8   : > { %v1838_v55 = vadd.f32 1e-12, %v1837_v42 }
 0xca9   : > { %v1623_v56 = vpop.xlane.xlu0 %1622 }
 0xcaa   : > { %2437 = vrsqrt.f32 %v1838_v55  ;;  %v1624_v57 = vmul.f32 0.03125, %v1623_v56  ;;  %vm1841_vm14 = vcmp.eq.f32.partialorder %v1838_v55, inf  ;;  %v1844_v61 = vand.u32 2147483648, %v1838_v55 }
 0xcab   : > { %vm1843_vm15 = vcmp.eq.f32.partialorder %v1838_v55, 0.0 }
 0xcac   : > { %v1625_v58 = vadd.f32 1e-12, %v1624_v57 }
 0xcae   : > { %2439 = vrsqrt.f32 %v1625_v58  ;;  %vm1628_vm0 = vcmp.eq.f32.partialorder %v1625_v58, inf  ;;  %v1631_v5 = vand.u32 2147483648, %v1625_v58  ;;  %vm1630_vm2 = vcmp.eq.f32.partialorder %v1625_v58, 0.0 }
 0xcb4   : > { %v2438_v59 = vpop.eup %2437 }
 0xcb5   : > { %v1840_v60 = vmul.f32 %v2438_v59, %v1838_v55 }
 0xcb7   : > { %v1842_v62 = vsel %vm1841_vm14, %v1838_v55, %v1840_v60 }
 0xcb8   : > { %v1845_v63 = vsel %vm1843_vm15, %v1844_v61, %v1842_v62  ;;  %v2440_v0 = vpop.eup %2439 }
 0xcb9   : > { %2441 = vrcp.f32 %v1845_v63  ;;  %v1627_v4 = vmul.f32 %v2440_v0, %v1625_v58 }
 0xcbb   : > { %v1629_v7 = vsel %vm1628_vm0, %v1625_v58, %v1627_v4 }
 0xcbc   : > { %v1632_v8 = vsel %vm1630_vm2, %v1631_v5, %v1629_v7 }
 0xcbd   : > { %2443 = vrcp.f32 %v1632_v8 }
 0xcc3   : > { %v2442_v1 = vpop.eup %2441 }
 0xcc4   : > { %v1847_v3 = vmul.f32 %v2442_v1, %v1832_v46 }
 0xcc6   : > { %v1852_v13 = vmul.f32 %v1851_v12, %v1847_v3 }
 0xcc7   : > { %v2444_v6 = vpop.eup %2443 }
 0xcc8   : > { %v1857_v16 = vadd.f32 %v1856_v2, %v1852_v13  ;;  %v1634_v18 = vmul.f32 %v2444_v6, %v1619_v51 }
 0xcca   : > { %v1859_v20 = vmin.f32 %v1857_v16, 0.0  ;;  %v1639_v21 = vmul.f32 %v1638_v14, %v1634_v18 }
 0xccc   : > { %v1860_v31 = vmul.f32 1.442695, %v1859_v20  ;;  %v1644_v22 = vadd.f32 %v1643_v19, %v1639_v21 }
 0xcce   : > { %2445 = vpow2.f32 %v1860_v31  ;;  %1645 = vst.msk [vmem:[%s567_s23] sm:$0xff] %vm619_vm1, %v1644_v22 }
 0xccf   : > { %2460 = shalt.err (!%p2457_p3)
}
 0xcd0   : > { %s2461_s23 = scalar_lea.hbm %s3067_s0, 128  ;;  %s2465_s20 = scalar_lea.hbm %s3196_s15, 256 }
 0xcd1   : > { %p2462_p4 = scmp.ne.s32.totalorder %s3067_s0, %s2461_s23  ;;  %p2466_p9 = scmp.lt.u32.totalorder %s3067_s0, %s3196_s15 }
 0xcd2   : > { %p2467_p10 = scmp.lt.u32.totalorder %s2465_s20, %s2461_s23  ;;  %p2469_p12 = scmp.lt.u32.totalorder %s2461_s23, %s3067_s0 }
 0xcd3   : > { %p2463_p7 = pnand %p2462_p4, %p2714_p5 }
 0xcd4   : > { %p2468_p11 = por %p2467_p10, %p2466_p9 }
 0xcd5   : > { %p2464_p8 = pneg %p2463_p7 }
 0xcd6   : > { %p2470_p13 = por %p2469_p12, %p2468_p11 }
 0xcd8   : > { %p2471_p0 = pnand %p2470_p13, %p2464_p8 }
 0xcda   : > { %2474 = shalt.err (!%p2471_p0)
}
 0xcdb   : > { %2326 = dma.vmem_to_hbm [thread:$0]  (%p2714_p5), %s3069_s18, 128, %s3067_s0, %s1867_s26   ;;  %v2446_v11 = vpop.eup %2445  ;;  %vm1858_vm3 = vcmp.gt.f32.partialorder %v1857_v16, 0.0 }
 0xcdc   : > { %s1871_s22 = sand.u32 1, %s2695_s28   ;;  %s3227_s2 = sshll.u32 %s2845_s29, 3  ;;  %v2143_v17 = vadd.f32 -1.0, %v2446_v11 }
 0xcdd   : > { %s574_s27 = scalar_lea.vmem [#allocation4], %s3227_s2  ;;  %s1916_s23 = sshll.u32 %s2852_s24, 4  ;;  %s3108_s23 = int_to_ptr.vmem [resolvable:$true] %s1916_s23 }
 0xcde   : > { %s1903_s30 = sshll.u32 %s574_s27, 4  ;;  %s2153_s19 = sshll.u32 %s2695_s28, 8  ;;  %v1863_v23 = vsel %vm1858_vm3, %v1857_v16, %v2143_v17  ;;  %s3106_s30 = int_to_ptr.vmem [resolvable:$true] %s1903_s30 }
 0xcdf   : > { %s3228_s20 = sshll.u32 %s2695_s28, 7  ;;  %v1864_v24 = vadd.f32 1.0, %v1863_v23  ;;  %s3113_s24 = scalar_lea.hbm %s3198_s17, %s2153_s19 }
 0xce0   : > { %s3104_s4 = scalar_lea.hbm %s3197_s16, %s3228_s20  ;;  %s3116_s28 = scalar_lea.sflag [#allocation5], %s1871_s22 }
 0xce1   : > { %1865 = vst.msk [vmem:[%s574_s27] sm:$0xff] %vm619_vm1, %v1864_v24  ;;  %s2475_s3 = scalar_lea.vmem %s3106_s30, 128  ;;  %s2580_s0 = smov [#allocation4]  }
 0xce2   : > { %p2476_p1 = scmp.ne.s32.totalorder %s3106_s30, %s2475_s3  ;;  %s2479_s26 = sshll.u32 %s2580_s0, 4  ;;  %s2480_s26 = int_to_ptr.vmem [resolvable:$false] %s2479_s26 }
 0xce3   : > { %s2481_s2 = scalar_lea.vmem %s2480_s26, 256  ;;  %p2482_p4 = scmp.lt.s32.totalorder %s3106_s30, %s2480_s26 }
 0xce4   : > { %p2477_p2 = pnand %p2476_p1, %p2714_p5  ;;  %p2483_p7 = scmp.lt.s32.totalorder %s2481_s2, %s2475_s3 }
 0xce6   : > { %p2478_p3 = pneg %p2477_p2  ;;  %p2484_p8 = por %p2483_p7, %p2482_p4 }
 0xce8   : > { %p2485_p9 = pnand %p2484_p8, %p2478_p3 }
 0xcea   : > { %2488 = shalt.err (!%p2485_p9)
}
 0xceb   : > { %s2489_s22 = scalar_lea.hbm %s3104_s4, 128  ;;  %s2493_s20 = scalar_lea.hbm %s3197_s16, 256 }
 0xcec   : > { %p2490_p10 = scmp.ne.s32.totalorder %s3104_s4, %s2489_s22  ;;  %p2494_p13 = scmp.lt.u32.totalorder %s3104_s4, %s3197_s16 }
 0xced   : > { %p2495_p0 = scmp.lt.u32.totalorder %s2493_s20, %s2489_s22  ;;  %p2497_p2 = scmp.lt.u32.totalorder %s2489_s22, %s3104_s4 }
 0xcee   : > { %p2491_p11 = pnand %p2490_p10, %p2714_p5 }
 0xcef   : > { %p2496_p1 = por %p2495_p0, %p2494_p13 }
 0xcf0   : > { %p2492_p12 = pneg %p2491_p11 }
 0xcf1   : > { %p2498_p3 = por %p2497_p2, %p2496_p1 }
 0xcf3   : > { %p2499_p4 = pnand %p2498_p3, %p2492_p12 }
 0xcf5   : > { %2502 = shalt.err (!%p2499_p4)
}
 0xcf6   : > { %2327 = dma.vmem_to_hbm [thread:$0]  (%p2714_p5), %s3106_s30, 128, %s3104_s4, %s3116_s28  }
 0xcf7   : > { %s2503_s18 = scalar_lea.vmem %s3108_s23, 256  ;;  %s2581_s3 = smov [#allocation6]  }
 0xcf8   : > { %p2504_p7 = scmp.ne.s32.totalorder %s3108_s23, %s2503_s18  ;;  %s2507_s0 = sshll.u32 %s2581_s3, 4  ;;  %s2508_s0 = int_to_ptr.vmem [resolvable:$false] %s2507_s0 }
 0xcf9   : > { %s2509_s26 = scalar_lea.vmem %s2508_s0, 512  ;;  %p2510_p10 = scmp.lt.s32.totalorder %s3108_s23, %s2508_s0 }
 0xcfa   : > { %p2505_p8 = pnand %p2504_p7, %p2714_p5  ;;  %p2511_p11 = scmp.lt.s32.totalorder %s2509_s26, %s2503_s18 }
 0xcfc   : > { %p2506_p9 = pneg %p2505_p8  ;;  %p2512_p12 = por %p2511_p11, %p2510_p10 }
 0xcfe   : > { %p2513_p13 = pnand %p2512_p12, %p2506_p9 }
 0xd00   : > { %2516 = shalt.err (!%p2513_p13)
}
 0xd01   : > { %s2517_s4 = scalar_lea.hbm %s3113_s24, 256  ;;  %s2521_s22 = scalar_lea.hbm %s3198_s17, 512 }
 0xd02   : > { %p2518_p0 = scmp.ne.s32.totalorder %s3113_s24, %s2517_s4  ;;  %p2522_p3 = scmp.lt.u32.totalorder %s3113_s24, %s3198_s17 }
 0xd03   : > { %p2523_p4 = scmp.lt.u32.totalorder %s2521_s22, %s2517_s4  ;;  %p2525_p8 = scmp.lt.u32.totalorder %s2517_s4, %s3113_s24 }
 0xd04   : > { %p2519_p1 = pnand %p2518_p0, %p2714_p5 }
 0xd05   : > { %p2524_p7 = por %p2523_p4, %p2522_p3 }
 0xd06   : > { %p2520_p2 = pneg %p2519_p1 }
 0xd07   : > { %p2526_p9 = por %p2525_p8, %p2524_p7 }
 0xd09   : > { %p2527_p10 = pnand %p2526_p9, %p2520_p2 }
 0xd0b   : > { %2530 = shalt.err (!%p2527_p10)
}
 0xd0c   : > { %s2582_s20 = smov 128   ;;  %s2583_s21 = smov 8  }
 0xd0d   : > { %2328 = dma.vmem_to_hbm [thread:$0]  (%p2714_p5), %s3108_s23, 256, %s3113_s24, %s3116_s28, %s2582_s20, %s2582_s20, %s2583_s21  }
 0xd0e PF: > { %s3229_s29 = sld [smem:[#allocation11_spill]]  ;;  %s3230_s18 = sld [smem:[#allocation9_spill]] }
 0xd14   : > { %p2342_p11 = scmp.ge.s32.totalorder %s3229_s29, 2  ;;  %s1931_s0 = sand.u32 1, %s3230_s18  }
 0xd15   : > { %s1932_s26 = scalar_lea.sflag [#allocation3], %s1931_s0 }
 0xd16   : > { %p2333_p12 = pnand %p2342_p11, %p2718_p6 }
 0xd18   : > { %2548 = dma.done.wait (!%p2333_p12), %s1932_s26, 128  }
 0xd19   : > { %2550 = vsyncadd (!%p2333_p12), %s1932_s26, 4294967168  ;;  %s3232_s4 = sadd.s32 4294967294, %s3229_s29  }
 0xd1a   : > { %s1940_s30 = sand.u32 1, %s3232_s4  }
 0xd1b   : > { %s1941_s2 = scalar_lea.sflag [#allocation5], %s1940_s30 }
 0xd1c   : > { %2552 = dma.done.wait (!%p2333_p12), %s1941_s2, 384  }
 0xd1d   : > { %2554 = vsyncadd (!%p2333_p12), %s1941_s2, 4294966912  ;;  %s3233_s27 = sld [smem:[#allocation12_spill]]  ;;  %s3234_s1 = sld [smem:[#allocation10_spill]] }
 0xd1e   : > { %s3235_s26 = sld [smem:[#allocation13_spill]]  ;;  %s3236_s24 = smov %s2561_s25 }
 0xd23   : > { %p31_p5 = scmp.ge.s32.totalorder %s3233_s27, 4   ;;  %s3237_s25 = smov %s3234_s1 }
 0xd25   :  { %33 = sbr.rel (!%p31_p5) target bundleno = 11 (0xb), region = 158 }
 0xd2c   :  { %1955 = vsyncpa [#allocation3], 1 }
 0xd2d   :  { %1957 = vsyncpa [#allocation3 + $0x1], 1 }
 0xd2e   :  { %1958 = vsyncpa [#allocation5], 1 }
 0xd2f   :  { %1960 = vsyncpa [#allocation5 + $0x1], 1 }

</bundles_post_ra>
